<compile_context>
chip_gen: v7x
topology: tpu7x:2x2x1
jax: 0.10.0
libtpu: 0.0.40
codegen_flags: <defaults>
</compile_context>

<pallas_src>
import math
import functools

import jax
import jax.numpy as jnp
from jax.experimental import pallas as pl
from jax.experimental.pallas import tpu as pltpu

NEG_INF = -1e18
TQ_MAX = 256          # query-tile rows for the attention kernels


def _round_up(x, m):
    return (x + m - 1) // m * m


# ----------------------------------------------------------------------------
# Per-generation VMEM limit / row-tile selection
# ----------------------------------------------------------------------------
def _vmem_capacity_bytes():
    try:
        info = pltpu.get_tpu_info()
        for attr in ("vmem_capacity_bytes", "vmem_bytes", "vmem_size_bytes"):
            v = getattr(info, attr, None)
            if v:
                return int(v)
    except Exception:
        pass
    return 64 * 1024 * 1024  # conservative default (v7x-sized)


_VMEM_CAP = _vmem_capacity_bytes()
if _VMEM_CAP >= 128 * 1024 * 1024:        # v5e / v6e: 128 MiB physical VMEM
    VMEM_LIMIT = 96 * 1024 * 1024
    ROW_TILE = 1024
else:                                     # v7x: 64 MiB per TensorCore
    VMEM_LIMIT = 48 * 1024 * 1024
    ROW_TILE = 512


# ----------------------------------------------------------------------------
# Single-buffered const (weight) BlockSpecs, probed for support
# ----------------------------------------------------------------------------
def _probe_buffered():
    if not hasattr(pl, "Buffered"):
        return False
    try:
        def k(x_ref, o_ref):
            o_ref[...] = x_ref[...] + 1.0
        spec = pl.BlockSpec((8, 128), lambda i: (0, 0),
                            pipeline_mode=pl.Buffered(1))
        fn = pl.pallas_call(
            k, grid=(1,),
            in_specs=[spec],
            out_specs=pl.BlockSpec((8, 128), lambda i: (0, 0)),
            out_shape=jax.ShapeDtypeStruct((8, 128), jnp.float32))
        jax.block_until_ready(fn(jnp.zeros((8, 128), jnp.float32)))
        return True
    except Exception:
        return False


_BUFFERED_OK = _probe_buffered()


def _const_spec(shape):
    idx = lambda i, n=len(shape): (0,) * n
    if _BUFFERED_OK:
        # constant index_map across the grid -> single buffer is enough
        return pl.BlockSpec(shape, idx, pipeline_mode=pl.Buffered(1))
    return pl.BlockSpec(shape, idx)


# ----------------------------------------------------------------------------
# In-kernel helpers
# ----------------------------------------------------------------------------
def _ln(x, g, b):
    mu = jnp.mean(x, axis=-1, keepdims=True)
    var = jnp.mean((x - mu) ** 2, axis=-1, keepdims=True)
    return (x - mu) * jax.lax.rsqrt(var + 1e-6) * g + b


def _softmax_rows(s):
    s = s - jnp.max(s, axis=-1, keepdims=True)
    e = jnp.exp(s)
    return e * pl.reciprocal(jnp.sum(e, axis=-1, keepdims=True), approx=True)


# ----------------------------------------------------------------------------
# Row-tiled (M = B*T) fused kernels (weights resident; bf16 MXU, f32 accum)
# ----------------------------------------------------------------------------
def _ln_qkv_kernel(x_ref, g_ref, b_ref, wqkv_ref, bqkv_ref,
                   xn_ref, q_ref, k_ref, v_ref):
    # LayerNorm1 + fused QKV projection for self-attention.
    x = x_ref[...]
    xn = _ln(x, g_ref[...], b_ref[...]).astype(jnp.bfloat16)
    xn_ref[...] = xn
    qkv = jnp.dot(xn, wqkv_ref[...],
                  preferred_element_type=jnp.float32) + bqkv_ref[...]
    D = x.shape[-1]
    q_ref[...] = qkv[:, :D].astype(jnp.bfloat16)
    k_ref[...] = qkv[:, D:2 * D].astype(jnp.bfloat16)
    v_ref[...] = qkv[:, 2 * D:].astype(jnp.bfloat16)


def _selfproj_lnq_kernel(ctx_ref, x_ref, wo_ref, bo_ref, g_ref, b_ref,
                         wq_ref, bq_ref, query_ref, qctx_ref):
    # self-attn output proj + residual + LayerNorm2 + cross-attn Q projection.
    query = (jnp.dot(ctx_ref[...], wo_ref[...],
                     preferred_element_type=jnp.float32)
             + bo_ref[...] + x_ref[...])
    query_ref[...] = query
    qn = _ln(query, g_ref[...], b_ref[...]).astype(jnp.bfloat16)
    qctx_ref[...] = (jnp.dot(qn, wq_ref[...],
                             preferred_element_type=jnp.float32)
                     + bq_ref[...]).astype(jnp.bfloat16)


def _kv_proj_kernel(m_ref, wkv_ref, bkv_ref, k_ref, v_ref):
    # Fused K/V projection of the encoder memory (computed once per layer).
    kv = (jnp.dot(m_ref[...].astype(jnp.bfloat16), wkv_ref[...],
                  preferred_element_type=jnp.float32) + bkv_ref[...])
    D = k_ref.shape[-1]
    k_ref[...] = kv[:, :D].astype(jnp.bfloat16)
    v_ref[...] = kv[:, D:].astype(jnp.bfloat16)


def _gate_ffn_kernel(cu_ref, ca_ref, q_ref, wo_ref, bo_ref, wgu_ref, wga_ref,
                     g_ref, b_ref, w1_ref, b1_ref, w2_ref, b2_ref,
                     out_ref, gate_ref):
    # cross-attn out-proj (x2) + sigmoid gate (VPU) + gated mix + residual + FFN.
    mid_u = (jnp.dot(cu_ref[...], wo_ref[...],
                     preferred_element_type=jnp.float32) + bo_ref[...])
    mid_a = (jnp.dot(ca_ref[...], wo_ref[...],
                     preferred_element_type=jnp.float32) + bo_ref[...])
    logits = jnp.sum(mid_u * wgu_ref[...] + mid_a * wga_ref[...],
                     axis=-1, keepdims=True)
    gate = 1.0 / (1.0 + jnp.exp(-logits))
    gate_ref[...] = gate
    ffn_in = mid_u * gate + mid_a * (1.0 - gate) + q_ref[...]
    xn = _ln(ffn_in, g_ref[...], b_ref[...]).astype(jnp.bfloat16)
    h = jnp.maximum(jnp.dot(xn, w1_ref[...],
                            preferred_element_type=jnp.float32) + b1_ref[...], 0.0)
    out_ref[...] = (jnp.dot(h.astype(jnp.bfloat16), w2_ref[...],
                            preferred_element_type=jnp.float32)
                    + b2_ref[...] + ffn_in)


def _layernorm_kernel(x_ref, g_ref, b_ref, o_ref):
    o_ref[...] = _ln(x_ref[...], g_ref[...], b_ref[...])


def _row_tiled(kernel, row_args, const_args, outs, tile=None):
    """Run `kernel` over the row (M) axis with tiles of <=`tile` rows.

    row_args : list of (M, Ci) arrays tiled along rows (any dtype).
    const_args: arrays passed whole every step (single-buffered, resident).
    outs     : list of (cols, dtype); outputs are (M, cols) of dtype.
    """
    tile = ROW_TILE if tile is None else tile
    M = row_args[0].shape[0]
    tm = min(tile, _round_up(M, 8))
    Mp = _round_up(M, tm)
    if Mp != M:
        row_args = [jnp.pad(a, ((0, Mp - M), (0, 0))) for a in row_args]
    in_specs = (
        [pl.BlockSpec((tm, a.shape[1]), lambda i: (i, 0)) for a in row_args] +
        [_const_spec(c.shape) for c in const_args])
    out_specs = tuple(pl.BlockSpec((tm, n), lambda i: (i, 0)) for n, _ in outs)
    out_shape = tuple(jax.ShapeDtypeStruct((Mp, n), dt) for n, dt in outs)
    res = pl.pallas_call(
        kernel,
        grid=(Mp // tm,),
        in_specs=in_specs,
        out_specs=out_specs,
        out_shape=out_shape,
        compiler_params=pltpu.CompilerParams(
            dimension_semantics=("parallel",),
            vmem_limit_bytes=VMEM_LIMIT),
    )(*row_args, *const_args)
    return [o[:M] for o in res]


# ----------------------------------------------------------------------------
# Attention kernels: grid=(B, T//tq); K/V blocks constant along the tq axis;
# masks built in-kernel from compact int32 vectors; per-head incremental
# writes into the output refs.
# ----------------------------------------------------------------------------
def _self_attn_kernel(q_ref, k_ref, v_ref, pad_ref, ctx_ref, *,
                      heads, scale, tq):
    T = k_ref.shape[1]
    D = q_ref.shape[2]
    q = q_ref[0]                                            # (tq, D) bf16
    k = k_ref[0]                                            # (T, D)  bf16
    v = v_ref[0]                                            # (T, D)  bf16
    q_off = pl.program_id(1) * tq
    row = jax.lax.broadcasted_iota(jnp.int32, (tq, T), 0) + q_off
    col = jax.lax.broadcasted_iota(jnp.int32, (tq, T), 1)
    dec_mask = jnp.logical_or(col > row, pad_ref[0] > 0)    # causal | key-pad
    bias = jnp.where(dec_mask, NEG_INF, 0.0)                # hoisted (once)
    Dh = D // heads
    for h in range(heads):
        sl = slice(h * Dh, (h + 1) * Dh)
        s = jax.lax.dot_general(q[:, sl], k[:, sl], (((1,), (1,)), ((), ())),
                                preferred_element_type=jnp.float32)
        p = _softmax_rows(s * scale + bias)
        ctx_ref[0, :, sl] = jnp.dot(
            p.astype(jnp.bfloat16), v[:, sl],
            preferred_element_type=jnp.float32).astype(ctx_ref.dtype)


def self_attention(q, k, v, tgt_pad, heads):
    B, T, D = q.shape
    scale = 1.0 / math.sqrt(D // heads)
    tq = _round_up(T if T <= TQ_MAX else TQ_MAX, 8)
    Tp = _round_up(T, tq)
    if Tp != T:
        q = jnp.pad(q, ((0, 0), (0, Tp - T), (0, 0)))
    out = pl.pallas_call(
        functools.partial(_self_attn_kernel, heads=heads, scale=scale, tq=tq),
        grid=(B, Tp // tq),
        in_specs=[pl.BlockSpec((1, tq, D), lambda b, i: (b, i, 0)),
                  pl.BlockSpec((1, T, D), lambda b, i: (b, 0, 0)),
                  pl.BlockSpec((1, T, D), lambda b, i: (b, 0, 0)),
                  pl.BlockSpec((1, 1, T), lambda b, i: (b, 0, 0))],
        out_specs=pl.BlockSpec((1, tq, D), lambda b, i: (b, i, 0)),
        out_shape=jax.ShapeDtypeStruct((B, Tp, D), jnp.bfloat16),
        compiler_params=pltpu.CompilerParams(
            dimension_semantics=("parallel", "parallel"),
            vmem_limit_bytes=VMEM_LIMIT),
    )(q, k, v, tgt_pad)
    return out[:, :T]


def _cross_attn_kernel(q_ref, k_ref, v_ref, spad_ref, role_ref, *rest,
                       heads, scale, with_scores):
    if with_scores:
        stm_ref, cu_ref, ca_ref, pu_ref, pa_ref = rest
    else:
        cu_ref, ca_ref = rest
    D = q_ref.shape[2]
    q = q_ref[0]                                            # (tq, D) bf16
    k = k_ref[0]                                            # (S, D)  bf16
    v = v_ref[0]                                            # (S, D)  bf16
    spm = spad_ref[0] > 0                                   # (1, S)
    role = role_ref[0]                                      # (1, S)
    m_user = jnp.logical_or(spm, role != 1)
    m_agent = jnp.logical_or(spm, role != 2)
    # additive biases built once (hoisted out of the head loop)
    bias_u = jnp.where(m_user, NEG_INF, 0.0)                # (1, S)
    bias_a = jnp.where(m_agent, NEG_INF, 0.0)
    if with_scores:
        stm = stm_ref[0] > 0                                # (tq, S)
        keep_u = jnp.where(jnp.logical_or(stm, m_user), 0.0, 1.0)
        keep_a = jnp.where(jnp.logical_or(stm, m_agent), 0.0, 1.0)
        inv_h = 1.0 / heads
        pu_ref[...] = jnp.zeros_like(pu_ref)
        pa_ref[...] = jnp.zeros_like(pa_ref)
    Dh = D // heads
    for h in range(heads):
        sl = slice(h * Dh, (h + 1) * Dh)
        # scores computed ONCE per head, both role masks applied to the same s.
        s = jax.lax.dot_general(q[:, sl], k[:, sl], (((1,), (1,)), ((), ())),
                                preferred_element_type=jnp.float32) * scale
        pu = _softmax_rows(s + bias_u)
        pa = _softmax_rows(s + bias_a)
        cu_ref[0, :, sl] = jnp.dot(
            pu.astype(jnp.bfloat16), v[:, sl],
            preferred_element_type=jnp.float32).astype(cu_ref.dtype)
        ca_ref[0, :, sl] = jnp.dot(
            pa.astype(jnp.bfloat16), v[:, sl],
            preferred_element_type=jnp.float32).astype(ca_ref.dtype)
        if with_scores:
            # add_mask is a superset of mask -> add-mask softmax == renormalized
            # restriction of pu/pa to the add-mask-allowed set (exact).
            pu_m = pu * keep_u
            pa_m = pa * keep_a
            pu_ref[0] += inv_h * pu_m * pl.reciprocal(
                jnp.maximum(jnp.sum(pu_m, -1, keepdims=True), 1e-20), approx=True)
            pa_ref[0] += inv_h * pa_m * pl.reciprocal(
                jnp.maximum(jnp.sum(pa_m, -1, keepdims=True), 1e-20), approx=True)


def cross_attention(q, k, v, src_pad, role, stm, heads, with_scores):
    B, T, D = q.shape
    S = k.shape[1]
    scale = 1.0 / math.sqrt(D // heads)
    tq = _round_up(T if T <= TQ_MAX else TQ_MAX, 8)
    Tp = _round_up(T, tq)
    if Tp != T:
        q = jnp.pad(q, ((0, 0), (0, Tp - T), (0, 0)))
        if with_scores:
            stm = jnp.pad(stm, ((0, 0), (0, Tp - T), (0, 0)))
    in_specs = [pl.BlockSpec((1, tq, D), lambda b, i: (b, i, 0)),
                pl.BlockSpec((1, S, D), lambda b, i: (b, 0, 0)),
                pl.BlockSpec((1, S, D), lambda b, i: (b, 0, 0)),
                pl.BlockSpec((1, 1, S), lambda b, i: (b, 0, 0)),
                pl.BlockSpec((1, 1, S), lambda b, i: (b, 0, 0))]
    inputs = [q, k, v, src_pad, role]
    out_specs = [pl.BlockSpec((1, tq, D), lambda b, i: (b, i, 0)),
                 pl.BlockSpec((1, tq, D), lambda b, i: (b, i, 0))]
    out_shape = [jax.ShapeDtypeStruct((B, Tp, D), jnp.bfloat16),
                 jax.ShapeDtypeStruct((B, Tp, D), jnp.bfloat16)]
    if with_scores:
        in_specs.append(pl.BlockSpec((1, tq, S), lambda b, i: (b, i, 0)))
        inputs.append(stm)
        out_specs += [pl.BlockSpec((1, tq, S), lambda b, i: (b, i, 0))] * 2
        out_shape += [jax.ShapeDtypeStruct((B, Tp, S), jnp.float32)] * 2
    outs = pl.pallas_call(
        functools.partial(_cross_attn_kernel, heads=heads, scale=scale,
                          with_scores=with_scores),
        grid=(B, Tp // tq),
        in_specs=in_specs,
        out_specs=tuple(out_specs),
        out_shape=tuple(out_shape),
        compiler_params=pltpu.CompilerParams(
            dimension_semantics=("parallel", "parallel"),
            vmem_limit_bytes=VMEM_LIMIT),
    )(*inputs)
    outs = [o[:, :T] for o in outs]
    if with_scores:
        return outs[0], outs[1], outs[2], outs[3]
    return outs[0], outs[1], None, None


# ----------------------------------------------------------------------------
# Decoder layer / decoder forward (orchestration, under jit)
# ----------------------------------------------------------------------------
def decoder_layer(x, mem_k, mem_v, tgt_pad, src_pad, role, stm, p, heads,
                  with_scores):
    B, T, D = x.shape
    M = B * T
    x2 = x.reshape(M, D)

    # LN1 + fused self-attention QKV projection (bf16 outputs).
    xn2, q2, k2, v2 = _row_tiled(
        _ln_qkv_kernel, [x2],
        [p["ln1_g"], p["ln1_b"], p["self_wqkv"], p["self_bqkv"]],
        outs=[(D, jnp.bfloat16)] * 4)

    ctx = self_attention(q2.reshape(B, T, D), k2.reshape(B, T, D),
                         v2.reshape(B, T, D), tgt_pad, heads)

    # self-attn out-proj + residual (f32) + LN2 + cross-attn Q projection (bf16).
    query2, qctx2 = _row_tiled(
        _selfproj_lnq_kernel, [ctx.reshape(M, D), x2],
        [p["self_wo"], p["self_bo"], p["ln2_g"], p["ln2_b"],
         p["ctx_wq"], p["ctx_bq"]],
        outs=[(D, jnp.float32), (D, jnp.bfloat16)])

    # fused dual-mask (user/agent) cross attention; scores only on last layer.
    cu, ca, pu, pa = cross_attention(qctx2.reshape(B, T, D), mem_k, mem_v,
                                     src_pad, role, stm, heads, with_scores)

    # cross out-proj + gate + gated mix + residual + feed-forward.
    out2, gate2 = _row_tiled(
        _gate_ffn_kernel, [cu.reshape(M, D), ca.reshape(M, D), query2],
        [p["ctx_wo"], p["ctx_bo"], p["wg_u"], p["wg_a"],
         p["ffn_ln_g"], p["ffn_ln_b"],
         p["ffn_w1"], p["ffn_b1"], p["ffn_w2"], p["ffn_b2"]],
        outs=[(D, jnp.float32), (1, jnp.float32)])

    out = out2.reshape(B, T, D)
    all_input = xn2.reshape(B, T, D)           # bf16 (saved layer input)
    tog = None
    if with_scores:
        g = gate2.reshape(B, T, 1)
        tog = pu * g + pa * (1.0 - g)          # (B,T,S), already head-averaged
    return out, all_input, tog


@functools.partial(jax.jit, static_argnames=("heads", "padding_idx"))
def transformer_decoder_forward(params, tgt, memory_bank, src, role_mask,
                                src_tgt_mask_tog, heads, padding_idx=0):
    B, T = tgt.shape
    S = src.shape[1]
    D = params["embedding"].shape[1]

    # Embeddings + positional encoding (dropouts = identity).
    emb = params["embedding"][tgt]
    output = emb * math.sqrt(D) + params["pe"][:T][None]

    # Compact int32 mask ingredients; full masks are built inside the kernels.
    tgt_pad = (tgt == padding_idx).astype(jnp.int32)[:, None, :]     # (B,1,T)
    src_pad = (src == padding_idx).astype(jnp.int32)[:, None, :]     # (B,1,S)
    role = role_mask.astype(jnp.int32)[:, None, :]                   # (B,1,S)
    stm = (src_tgt_mask_tog == padding_idx)
    if stm.ndim == 3:
        stm = stm[:, 1:]
    else:
        stm = stm[:, None, :]
    stm = jnp.broadcast_to(stm, (B, T, S)).astype(jnp.int32)         # (B,T,S)

    num_layers = len(params["layers"])
    saved_inputs = []
    tog_score = None
    mem2 = memory_bank.reshape(B * S, D)
    for i, lp in enumerate(params["layers"]):
        # memory K/V projected once per layer (bf16).
        mk2, mv2 = _row_tiled(_kv_proj_kernel, [mem2],
                              [lp["ctx_wkv"], lp["ctx_bkv"]],
                              outs=[(D, jnp.bfloat16), (D, jnp.bfloat16)])
        output, all_input, tog = decoder_layer(
            output, mk2.reshape(B, S, D), mv2.reshape(B, S, D),
            tgt_pad, src_pad, role, stm, lp, heads,
            with_scores=(i == num_layers - 1))
        saved_inputs.append(all_input)
        if tog is not None:
            tog_score = tog

    out2 = _row_tiled(_layernorm_kernel, [output.reshape(B * T, D)],
                      [params["ln_f_g"], params["ln_f_b"]],
                      outs=[(D, jnp.float32)])[0]
    output = out2.reshape(B, T, D)
    saved_inputs = jnp.stack(saved_inputs)       # state.previous_layer_inputs
    # tog_score is already the head-mean (== torch.mean(tog_score, dim=1)).
    return output, saved_inputs, tog_score


# ----------------------------------------------------------------------------
# Deterministic parameter init (matmul weights stored in bf16 for the MXU)
# ----------------------------------------------------------------------------
def init_params(key, num_layers, d_model, heads, d_ff, vocab_size, max_len=512):
    keys = iter(jax.random.split(key, 1024))

    def nrm(shape, scale=0.02, dtype=jnp.float32):
        return (scale * jax.random.normal(next(keys), shape,
                                          dtype=jnp.float32)).astype(dtype)

    def w(shape):                      # MXU weight -> bf16
        return nrm(shape, dtype=jnp.bfloat16)

    def zrow(n):
        return jnp.zeros((1, n), jnp.float32)

    def orow(n):
        return jnp.ones((1, n), jnp.float32)

    layers = []
    for _ in range(num_layers):
        layers.append(dict(
            ln1_g=orow(d_model), ln1_b=zrow(d_model),
            self_wqkv=w((d_model, 3 * d_model)), self_bqkv=zrow(3 * d_model),
            self_wo=w((d_model, d_model)), self_bo=zrow(d_model),
            ln2_g=orow(d_model), ln2_b=zrow(d_model),
            ctx_wq=w((d_model, d_model)), ctx_bq=zrow(d_model),
            ctx_wkv=w((d_model, 2 * d_model)), ctx_bkv=zrow(2 * d_model),
            ctx_wo=w((d_model, d_model)), ctx_bo=zrow(d_model),
            wg_u=nrm((1, d_model)), wg_a=nrm((1, d_model)),   # split mid_gate
            ffn_ln_g=orow(d_model), ffn_ln_b=zrow(d_model),
            ffn_w1=w((d_model, d_ff)), ffn_b1=zrow(d_ff),
            ffn_w2=w((d_ff, d_model)), ffn_b2=zrow(d_model)))

    embedding = nrm((vocab_size, d_model))
    embedding = embedding.at[0].set(0.0)          # padding_idx = 0

    pos = jnp.arange(max_len, dtype=jnp.float32)[:, None]
    div = jnp.exp(jnp.arange(0, d_model, 2, dtype=jnp.float32) *
                  (-math.log(10000.0) / d_model))
    pe = jnp.zeros((max_len, d_model), jnp.float32)
    pe = pe.at[:, 0::2].set(jnp.sin(pos * div))
    pe = pe.at[:, 1::2].set(jnp.cos(pos * div))

    return dict(embedding=embedding, pe=pe, layers=layers,
                ln_f_g=orow(d_model), ln_f_b=zrow(d_model))


# ----------------------------------------------------------------------------
if __name__ == "__main__":
    B, T, S = 2, 8, 16
    D_MODEL, HEADS, D_FF, NUM_LAYERS, VOCAB = 32, 4, 64, 2, 50

    root = jax.random.PRNGKey(0)
    kp, k1, k2, k3, k4, k5 = jax.random.split(root, 6)

    params = init_params(kp, NUM_LAYERS, D_MODEL, HEADS, D_FF, VOCAB)

    tgt = jax.random.randint(k1, (B, T), 1, VOCAB, dtype=jnp.int32)
    tgt = tgt.at[:, -1].set(0)                       # some target padding
    src = jax.random.randint(k2, (B, S), 1, VOCAB, dtype=jnp.int32)
    src = src.at[:, -2:].set(0)                      # some source padding
    memory_bank = jax.random.normal(k3, (B, S, D_MODEL), dtype=jnp.float32)
    role_mask = jax.random.randint(k4, (B, S), 1, 3, dtype=jnp.int32)  # 1=user, 2=agent
    src_tgt_mask_tog = jax.random.randint(k5, (B, T + 1, S), 0, 2, dtype=jnp.int32)

    output, saved_inputs, last_layer_score = transformer_decoder_forward(
        params, tgt, memory_bank, src, role_mask, src_tgt_mask_tog, heads=HEADS)

    jax.block_until_ready(output)
    jax.block_until_ready(saved_inputs)
    jax.block_until_ready(last_layer_score)

    assert output.shape == (B, T, D_MODEL)
    assert saved_inputs.shape == (NUM_LAYERS, B, T, D_MODEL)
    assert last_layer_score.shape == (B, T, S)
    assert bool(jnp.all(jnp.isfinite(output)))
    assert bool(jnp.all(jnp.isfinite(last_layer_score)))
    print("KERNEL_OK")
</pallas_src>

<mosaic_0001>
module attributes {stable_mosaic.version = 11 : i64} {
  func.func @k(%arg0: i32, %arg1: memref<8x128xf32, #tpu.memory_space<vmem>>, %arg2: memref<8x128xf32, #tpu.memory_space<vmem>>) attributes {dimension_semantics = [#tpu.dimension_semantics<arbitrary>], iteration_bounds = array<i64: 1>, scalar_prefetch = 0 : i64, scratch_operands = 0 : i64, tpu.core_type = #tpu.core_type<tc>, window_params = [{pipeline_mode = #tpu.pipeline_mode<synchronous>, transform_indices = @transform_0, window_bounds = array<i64: 8, 128>}, {pipeline_mode = #tpu.pipeline_mode<synchronous>, transform_indices = @transform_1, window_bounds = array<i64: 8, 128>}]} {
    %c0 = arith.constant 0 : index
    %c0_0 = arith.constant 0 : index
    %0 = vector.load %arg1[%c0, %c0_0] : memref<8x128xf32, #tpu.memory_space<vmem>>, vector<8x128xf32>
    %cst = arith.constant 1.000000e+00 : f32
    %1 = vector.broadcast %cst : f32 to vector<8x128xf32>
    %2 = arith.addf %0, %1 : vector<8x128xf32>
    %c0_1 = arith.constant 0 : index
    %c0_2 = arith.constant 0 : index
    %3 = vector.load %arg2[%c0_1, %c0_2] : memref<8x128xf32, #tpu.memory_space<vmem>>, vector<8x128xf32>
    tpu.vector_store %arg2[%c0_1, %c0_2], %2 {strides = array<i32>} : memref<8x128xf32, #tpu.memory_space<vmem>>, vector<8x128xf32>,
    return
  }
  func.func @transform_0(%arg0: i32) -> (i32, i32) {
    %c0_i32 = arith.constant 0 : i32
    %c0_i32_0 = arith.constant 0 : i32
    %c0_i32_1 = arith.constant 0 : i32
    return %c0_i32, %c0_i32_0 : i32, i32
  }
  func.func @transform_1(%arg0: i32) -> (i32, i32) {
    %c0_i32 = arith.constant 0 : i32
    %c0_i32_0 = arith.constant 0 : i32
    %c0_i32_1 = arith.constant 0 : i32
    return %c0_i32, %c0_i32_0 : i32, i32
  }
}

module attributes {stable_mosaic.version = 11 : i64} {
  func.func @_self_attn_kernel(%arg0: i32, %arg1: i32, %arg2: memref<1x8x32xbf16, #tpu.memory_space<vmem>>, %arg3: memref<1x8x32xbf16, #tpu.memory_space<vmem>>, %arg4: memref<1x8x32xbf16, #tpu.memory_space<vmem>>, %arg5: memref<1x1x8xi32, #tpu.memory_space<vmem>>, %arg6: memref<1x8x32xbf16, #tpu.memory_space<vmem>>) attributes {dimension_semantics = [#tpu.dimension_semantics<parallel>, #tpu.dimension_semantics<parallel>], iteration_bounds = array<i64: 2, 1>, scalar_prefetch = 0 : i64, scratch_operands = 0 : i64, tpu.core_type = #tpu.core_type<tc>, window_params = [{transform_indices = @transform_0, window_bounds = array<i64: 1, 8, 32>}, {transform_indices = @transform_1, window_bounds = array<i64: 1, 8, 32>}, {transform_indices = @transform_2, window_bounds = array<i64: 1, 8, 32>}, {transform_indices = @transform_3, window_bounds = array<i64: 1, 1, 8>}, {transform_indices = @transform_4, window_bounds = array<i64: 1, 8, 32>}]} {
    %c0 = arith.constant 0 : index
    %c0_0 = arith.constant 0 : index
    %c0_1 = arith.constant 0 : index
    %0 = vector.load %arg2[%c0, %c0_0, %c0_1] : memref<1x8x32xbf16, #tpu.memory_space<vmem>>, vector<1x8x32xbf16>
    %1 = vector.shape_cast %0 : vector<1x8x32xbf16> to vector<8x32xbf16>
    %c0_2 = arith.constant 0 : index
    %c0_3 = arith.constant 0 : index
    %c0_4 = arith.constant 0 : index
    %2 = vector.load %arg3[%c0_2, %c0_3, %c0_4] : memref<1x8x32xbf16, #tpu.memory_space<vmem>>, vector<1x8x32xbf16>
    %3 = vector.shape_cast %2 : vector<1x8x32xbf16> to vector<8x32xbf16>
    %c0_5 = arith.constant 0 : index
    %c0_6 = arith.constant 0 : index
    %c0_7 = arith.constant 0 : index
    %4 = vector.load %arg4[%c0_5, %c0_6, %c0_7] : memref<1x8x32xbf16, #tpu.memory_space<vmem>>, vector<1x8x32xbf16>
    %5 = vector.shape_cast %4 : vector<1x8x32xbf16> to vector<8x32xbf16>
    %c8_i32 = arith.constant 8 : i32
    %6 = arith.muli %arg1, %c8_i32 : i32
    %7 = tpu.iota {dimensions = array<i32: 0>} : vector<8x8xi32>
    %8 = vector.broadcast %6 : i32 to vector<8x8xi32>
    %9 = arith.addi %7, %8 : vector<8x8xi32>
    %10 = tpu.iota {dimensions = array<i32: 1>} : vector<8x8xi32>
    %11 = arith.cmpi sgt, %10, %9 : vector<8x8xi32>
    %c0_8 = arith.constant 0 : index
    %c0_9 = arith.constant 0 : index
    %c0_10 = arith.constant 0 : index
    %12 = vector.load %arg5[%c0_8, %c0_9, %c0_10] : memref<1x1x8xi32, #tpu.memory_space<vmem>>, vector<1x1x8xi32>
    %13 = vector.shape_cast %12 : vector<1x1x8xi32> to vector<1x8xi32>
    %c0_i32 = arith.constant 0 : i32
    %14 = vector.broadcast %c0_i32 : i32 to vector<1x8xi32>
    %15 = arith.cmpi sgt, %13, %14 : vector<1x8xi32>
    %16 = vector.broadcast %15 : vector<1x8xi1> to vector<8x8xi1>
    %17 = arith.ori %11, %16 : vector<8x8xi1>
    %cst = arith.constant -9.99999984E+17 : f32
    %cst_11 = arith.constant 0.000000e+00 : f32
    %18 = vector.broadcast %cst : f32 to vector<8x8xf32>
    %19 = vector.broadcast %cst_11 : f32 to vector<8x8xf32>
    %20 = arith.select %17, %18, %19 : vector<8x8xi1>, vector<8x8xf32>
    %21 = vector.extract_strided_slice %1 {offsets = [0, 0], sizes = [8, 8], strides = [1, 1]} : vector<8x32xbf16> to vector<8x8xbf16>
    %22 = vector.extract_strided_slice %3 {offsets = [0, 0], sizes = [8, 8], strides = [1, 1]} : vector<8x32xbf16> to vector<8x8xbf16>
    %cst_12 = arith.constant dense<0.000000e+00> : vector<8x8xf32>
    %23 = tpu.matmul %21, %22, %cst_12 {dimension_numbers = #tpu.dot_dimension_numbers<[1], [1], [0], [0], [0, 0, 1, 0], [], []>} : vector<8x8xbf16>, vector<8x8xbf16>, vector<8x8xf32> -> vector<8x8xf32>
    %cst_13 = arith.constant 0.353553385 : f32
    %24 = vector.broadcast %cst_13 : f32 to vector<8x8xf32>
    %25 = arith.mulf %23, %24 : vector<8x8xf32>
    %26 = arith.addf %25, %20 : vector<8x8xf32>
    %cst_14 = arith.constant dense<0xFF800000> : vector<8xf32>
    %27 = vector.multi_reduction <maximumf>, %26, %cst_14 [1] : vector<8x8xf32> to vector<8xf32>
    %28 = vector.shape_cast %27 : vector<8xf32> to vector<8x1xf32>
    %29 = vector.broadcast %28 : vector<8x1xf32> to vector<8x8xf32>
    %30 = arith.subf %26, %29 : vector<8x8xf32>
    %31 = math.exp %30 : vector<8x8xf32>
    %cst_15 = arith.constant dense<0.000000e+00> : vector<8xf32>
    %32 = vector.multi_reduction <add>, %31, %cst_15 [1] : vector<8x8xf32> to vector<8xf32>
    %33 = vector.shape_cast %32 : vector<8xf32> to vector<8x1xf32>
    %34 = tpu.reciprocal %33 {approx = true} : vector<8x1xf32> -> vector<8x1xf32>
    %35 = vector.broadcast %34 : vector<8x1xf32> to vector<8x8xf32>
    %36 = arith.mulf %31, %35 : vector<8x8xf32>
    %37 = arith.truncf %36 : vector<8x8xf32> to vector<8x8xbf16>
    %38 = vector.extract_strided_slice %5 {offsets = [0, 0], sizes = [8, 8], strides = [1, 1]} : vector<8x32xbf16> to vector<8x8xbf16>
    %cst_16 = arith.constant dense<0.000000e+00> : vector<8x8xf32>
    %39 = tpu.matmul %37, %38, %cst_16 {dimension_numbers = #tpu.dot_dimension_numbers<[1], [0], [0], [1], [0, 0, 1, 1], [], []>} : vector<8x8xbf16>, vector<8x8xbf16>, vector<8x8xf32> -> vector<8x8xf32>
    %40 = arith.truncf %39 : vector<8x8xf32> to vector<8x8xbf16>
    %c0_17 = arith.constant 0 : index
    %c0_18 = arith.constant 0 : index
    %c0_19 = arith.constant 0 : index
    %41 = vector.load %arg6[%c0_17, %c0_18, %c0_19] : memref<1x8x32xbf16, #tpu.memory_space<vmem>>, vector<1x8x8xbf16>
    %42 = vector.shape_cast %41 : vector<1x8x8xbf16> to vector<8x8xbf16>
    %43 = vector.shape_cast %40 : vector<8x8xbf16> to vector<1x8x8xbf16>
    tpu.vector_store %arg6[%c0_17, %c0_18, %c0_19], %43 {strides = array<i32>} : memref<1x8x32xbf16, #tpu.memory_space<vmem>>, vector<1x8x8xbf16>,
    %44 = vector.extract_strided_slice %1 {offsets = [0, 8], sizes = [8, 8], strides = [1, 1]} : vector<8x32xbf16> to vector<8x8xbf16>
    %45 = vector.extract_strided_slice %3 {offsets = [0, 8], sizes = [8, 8], strides = [1, 1]} : vector<8x32xbf16> to vector<8x8xbf16>
    %cst_20 = arith.constant dense<0.000000e+00> : vector<8x8xf32>
    %46 = tpu.matmul %44, %45, %cst_20 {dimension_numbers = #tpu.dot_dimension_numbers<[1], [1], [0], [0], [0, 0, 1, 0], [], []>} : vector<8x8xbf16>, vector<8x8xbf16>, vector<8x8xf32> -> vector<8x8xf32>
    %cst_21 = arith.constant 0.353553385 : f32
    %47 = vector.broadcast %cst_21 : f32 to vector<8x8xf32>
    %48 = arith.mulf %46, %47 : vector<8x8xf32>
    %49 = arith.addf %48, %20 : vector<8x8xf32>
    %cst_22 = arith.constant dense<0xFF800000> : vector<8xf32>
    %50 = vector.multi_reduction <maximumf>, %49, %cst_22 [1] : vector<8x8xf32> to vector<8xf32>
    %51 = vector.shape_cast %50 : vector<8xf32> to vector<8x1xf32>
    %52 = vector.broadcast %51 : vector<8x1xf32> to vector<8x8xf32>
    %53 = arith.subf %49, %52 : vector<8x8xf32>
    %54 = math.exp %53 : vector<8x8xf32>
    %cst_23 = arith.constant dense<0.000000e+00> : vector<8xf32>
    %55 = vector.multi_reduction <add>, %54, %cst_23 [1] : vector<8x8xf32> to vector<8xf32>
    %56 = vector.shape_cast %55 : vector<8xf32> to vector<8x1xf32>
    %57 = tpu.reciprocal %56 {approx = true} : vector<8x1xf32> -> vector<8x1xf32>
    %58 = vector.broadcast %57 : vector<8x1xf32> to vector<8x8xf32>
    %59 = arith.mulf %54, %58 : vector<8x8xf32>
    %60 = arith.truncf %59 : vector<8x8xf32> to vector<8x8xbf16>
    %61 = vector.extract_strided_slice %5 {offsets = [0, 8], sizes = [8, 8], strides = [1, 1]} : vector<8x32xbf16> to vector<8x8xbf16>
    %cst_24 = arith.constant dense<0.000000e+00> : vector<8x8xf32>
    %62 = tpu.matmul %60, %61, %cst_24 {dimension_numbers = #tpu.dot_dimension_numbers<[1], [0], [0], [1], [0, 0, 1, 1], [], []>} : vector<8x8xbf16>, vector<8x8xbf16>, vector<8x8xf32> -> vector<8x8xf32>
    %63 = arith.truncf %62 : vector<8x8xf32> to vector<8x8xbf16>
    %c0_25 = arith.constant 0 : index
    %c0_26 = arith.constant 0 : index
    %c8 = arith.constant 8 : index
    %64 = vector.load %arg6[%c0_25, %c0_26, %c8] : memref<1x8x32xbf16, #tpu.memory_space<vmem>>, vector<1x8x8xbf16>
    %65 = vector.shape_cast %64 : vector<1x8x8xbf16> to vector<8x8xbf16>
    %66 = vector.shape_cast %63 : vector<8x8xbf16> to vector<1x8x8xbf16>
    tpu.vector_store %arg6[%c0_25, %c0_26, %c8], %66 {strides = array<i32>} : memref<1x8x32xbf16, #tpu.memory_space<vmem>>, vector<1x8x8xbf16>,
    %67 = vector.extract_strided_slice %1 {offsets = [0, 16], sizes = [8, 8], strides = [1, 1]} : vector<8x32xbf16> to vector<8x8xbf16>
    %68 = vector.extract_strided_slice %3 {offsets = [0, 16], sizes = [8, 8], strides = [1, 1]} : vector<8x32xbf16> to vector<8x8xbf16>
    %cst_27 = arith.constant dense<0.000000e+00> : vector<8x8xf32>
    %69 = tpu.matmul %67, %68, %cst_27 {dimension_numbers = #tpu.dot_dimension_numbers<[1], [1], [0], [0], [0, 0, 1, 0], [], []>} : vector<8x8xbf16>, vector<8x8xbf16>, vector<8x8xf32> -> vector<8x8xf32>
    %cst_28 = arith.constant 0.353553385 : f32
    %70 = vector.broadcast %cst_28 : f32 to vector<8x8xf32>
    %71 = arith.mulf %69, %70 : vector<8x8xf32>
    %72 = arith.addf %71, %20 : vector<8x8xf32>
    %cst_29 = arith.constant dense<0xFF800000> : vector<8xf32>
    %73 = vector.multi_reduction <maximumf>, %72, %cst_29 [1] : vector<8x8xf32> to vector<8xf32>
    %74 = vector.shape_cast %73 : vector<8xf32> to vector<8x1xf32>
    %75 = vector.broadcast %74 : vector<8x1xf32> to vector<8x8xf32>
    %76 = arith.subf %72, %75 : vector<8x8xf32>
    %77 = math.exp %76 : vector<8x8xf32>
    %cst_30 = arith.constant dense<0.000000e+00> : vector<8xf32>
    %78 = vector.multi_reduction <add>, %77, %cst_30 [1] : vector<8x8xf32> to vector<8xf32>
    %79 = vector.shape_cast %78 : vector<8xf32> to vector<8x1xf32>
    %80 = tpu.reciprocal %79 {approx = true} : vector<8x1xf32> -> vector<8x1xf32>
    %81 = vector.broadcast %80 : vector<8x1xf32> to vector<8x8xf32>
    %82 = arith.mulf %77, %81 : vector<8x8xf32>
    %83 = arith.truncf %82 : vector<8x8xf32> to vector<8x8xbf16>
    %84 = vector.extract_strided_slice %5 {offsets = [0, 16], sizes = [8, 8], strides = [1, 1]} : vector<8x32xbf16> to vector<8x8xbf16>
    %cst_31 = arith.constant dense<0.000000e+00> : vector<8x8xf32>
    %85 = tpu.matmul %83, %84, %cst_31 {dimension_numbers = #tpu.dot_dimension_numbers<[1], [0], [0], [1], [0, 0, 1, 1], [], []>} : vector<8x8xbf16>, vector<8x8xbf16>, vector<8x8xf32> -> vector<8x8xf32>
    %86 = arith.truncf %85 : vector<8x8xf32> to vector<8x8xbf16>
    %c0_32 = arith.constant 0 : index
    %c0_33 = arith.constant 0 : index
    %c16 = arith.constant 16 : index
    %87 = vector.load %arg6[%c0_32, %c0_33, %c16] : memref<1x8x32xbf16, #tpu.memory_space<vmem>>, vector<1x8x8xbf16>
    %88 = vector.shape_cast %87 : vector<1x8x8xbf16> to vector<8x8xbf16>
    %89 = vector.shape_cast %86 : vector<8x8xbf16> to vector<1x8x8xbf16>
    tpu.vector_store %arg6[%c0_32, %c0_33, %c16], %89 {strides = array<i32>} : memref<1x8x32xbf16, #tpu.memory_space<vmem>>, vector<1x8x8xbf16>,
    %90 = vector.extract_strided_slice %1 {offsets = [0, 24], sizes = [8, 8], strides = [1, 1]} : vector<8x32xbf16> to vector<8x8xbf16>
    %91 = vector.extract_strided_slice %3 {offsets = [0, 24], sizes = [8, 8], strides = [1, 1]} : vector<8x32xbf16> to vector<8x8xbf16>
    %cst_34 = arith.constant dense<0.000000e+00> : vector<8x8xf32>
    %92 = tpu.matmul %90, %91, %cst_34 {dimension_numbers = #tpu.dot_dimension_numbers<[1], [1], [0], [0], [0, 0, 1, 0], [], []>} : vector<8x8xbf16>, vector<8x8xbf16>, vector<8x8xf32> -> vector<8x8xf32>
    %cst_35 = arith.constant 0.353553385 : f32
    %93 = vector.broadcast %cst_35 : f32 to vector<8x8xf32>
    %94 = arith.mulf %92, %93 : vector<8x8xf32>
    %95 = arith.addf %94, %20 : vector<8x8xf32>
    %cst_36 = arith.constant dense<0xFF800000> : vector<8xf32>
    %96 = vector.multi_reduction <maximumf>, %95, %cst_36 [1] : vector<8x8xf32> to vector<8xf32>
    %97 = vector.shape_cast %96 : vector<8xf32> to vector<8x1xf32>
    %98 = vector.broadcast %97 : vector<8x1xf32> to vector<8x8xf32>
    %99 = arith.subf %95, %98 : vector<8x8xf32>
    %100 = math.exp %99 : vector<8x8xf32>
    %cst_37 = arith.constant dense<0.000000e+00> : vector<8xf32>
    %101 = vector.multi_reduction <add>, %100, %cst_37 [1] : vector<8x8xf32> to vector<8xf32>
    %102 = vector.shape_cast %101 : vector<8xf32> to vector<8x1xf32>
    %103 = tpu.reciprocal %102 {approx = true} : vector<8x1xf32> -> vector<8x1xf32>
    %104 = vector.broadcast %103 : vector<8x1xf32> to vector<8x8xf32>
    %105 = arith.mulf %100, %104 : vector<8x8xf32>
    %106 = arith.truncf %105 : vector<8x8xf32> to vector<8x8xbf16>
    %107 = vector.extract_strided_slice %5 {offsets = [0, 24], sizes = [8, 8], strides = [1, 1]} : vector<8x32xbf16> to vector<8x8xbf16>
    %cst_38 = arith.constant dense<0.000000e+00> : vector<8x8xf32>
    %108 = tpu.matmul %106, %107, %cst_38 {dimension_numbers = #tpu.dot_dimension_numbers<[1], [0], [0], [1], [0, 0, 1, 1], [], []>} : vector<8x8xbf16>, vector<8x8xbf16>, vector<8x8xf32> -> vector<8x8xf32>
    %109 = arith.truncf %108 : vector<8x8xf32> to vector<8x8xbf16>
    %c0_39 = arith.constant 0 : index
    %c0_40 = arith.constant 0 : index
    %c24 = arith.constant 24 : index
    %110 = vector.load %arg6[%c0_39, %c0_40, %c24] : memref<1x8x32xbf16, #tpu.memory_space<vmem>>, vector<1x8x8xbf16>
    %111 = vector.shape_cast %110 : vector<1x8x8xbf16> to vector<8x8xbf16>
    %112 = vector.shape_cast %109 : vector<8x8xbf16> to vector<1x8x8xbf16>
    tpu.vector_store %arg6[%c0_39, %c0_40, %c24], %112 {strides = array<i32>} : memref<1x8x32xbf16, #tpu.memory_space<vmem>>, vector<1x8x8xbf16>,
    return
  }
  func.func @transform_0(%arg0: i32, %arg1: i32) -> (i32, i32, i32) {
    %c0_i32 = arith.constant 0 : i32
    %c0_i32_0 = arith.constant 0 : i32
    return %arg0, %arg1, %c0_i32 : i32, i32, i32
  }
  func.func @transform_1(%arg0: i32, %arg1: i32) -> (i32, i32, i32) {
    %c0_i32 = arith.constant 0 : i32
    %c0_i32_0 = arith.constant 0 : i32
    %c0_i32_1 = arith.constant 0 : i32
    return %arg0, %c0_i32, %c0_i32_0 : i32, i32, i32
  }
  func.func @transform_2(%arg0: i32, %arg1: i32) -> (i32, i32, i32) {
    %c0_i32 = arith.constant 0 : i32
    %c0_i32_0 = arith.constant 0 : i32
    %c0_i32_1 = arith.constant 0 : i32
    return %arg0, %c0_i32, %c0_i32_0 : i32, i32, i32
  }
  func.func @transform_3(%arg0: i32, %arg1: i32) -> (i32, i32, i32) {
    %c0_i32 = arith.constant 0 : i32
    %c0_i32_0 = arith.constant 0 : i32
    %c0_i32_1 = arith.constant 0 : i32
    return %arg0, %c0_i32, %c0_i32_0 : i32, i32, i32
  }
  func.func @transform_4(%arg0: i32, %arg1: i32) -> (i32, i32, i32) {
    %c0_i32 = arith.constant 0 : i32
    %c0_i32_0 = arith.constant 0 : i32
    return %arg0, %arg1, %c0_i32 : i32, i32, i32
  }
}

module attributes {stable_mosaic.version = 11 : i64} {
  func.func @_ln_qkv_kernel(%arg0: i32, %arg1: memref<16x32xf32, #tpu.memory_space<vmem>>, %arg2: memref<1x32xf32, #tpu.memory_space<vmem>>, %arg3: memref<1x32xf32, #tpu.memory_space<vmem>>, %arg4: memref<32x96xbf16, #tpu.memory_space<vmem>>, %arg5: memref<1x96xf32, #tpu.memory_space<vmem>>, %arg6: memref<16x32xbf16, #tpu.memory_space<vmem>>, %arg7: memref<16x32xbf16, #tpu.memory_space<vmem>>, %arg8: memref<16x32xbf16, #tpu.memory_space<vmem>>, %arg9: memref<16x32xbf16, #tpu.memory_space<vmem>>) attributes {dimension_semantics = [#tpu.dimension_semantics<parallel>], iteration_bounds = array<i64: 1>, scalar_prefetch = 0 : i64, scratch_operands = 0 : i64, tpu.core_type = #tpu.core_type<tc>, window_params = [{transform_indices = @transform_0, window_bounds = array<i64: 16, 32>}, {pipeline_mode = #tpu.pipeline_mode<synchronous>, transform_indices = @transform_1, window_bounds = array<i64: 1, 32>}, {pipeline_mode = #tpu.pipeline_mode<synchronous>, transform_indices = @transform_2, window_bounds = array<i64: 1, 32>}, {pipeline_mode = #tpu.pipeline_mode<synchronous>, transform_indices = @transform_3, window_bounds = array<i64: 32, 96>}, {pipeline_mode = #tpu.pipeline_mode<synchronous>, transform_indices = @transform_4, window_bounds = array<i64: 1, 96>}, {transform_indices = @transform_5, window_bounds = array<i64: 16, 32>}, {transform_indices = @transform_6, window_bounds = array<i64: 16, 32>}, {transform_indices = @transform_7, window_bounds = array<i64: 16, 32>}, {transform_indices = @transform_8, window_bounds = array<i64: 16, 32>}]} {
    %c0 = arith.constant 0 : index
    %c0_0 = arith.constant 0 : index
    %0 = vector.load %arg1[%c0, %c0_0] : memref<16x32xf32, #tpu.memory_space<vmem>>, vector<16x32xf32>
    %c0_1 = arith.constant 0 : index
    %c0_2 = arith.constant 0 : index
    %1 = vector.load %arg2[%c0_1, %c0_2] : memref<1x32xf32, #tpu.memory_space<vmem>>, vector<1x32xf32>
    %c0_3 = arith.constant 0 : index
    %c0_4 = arith.constant 0 : index
    %2 = vector.load %arg3[%c0_3, %c0_4] : memref<1x32xf32, #tpu.memory_space<vmem>>, vector<1x32xf32>
    %cst = arith.constant dense<0.000000e+00> : vector<16xf32>
    %3 = vector.multi_reduction <add>, %0, %cst [1] : vector<16x32xf32> to vector<16xf32>
    %4 = vector.shape_cast %3 : vector<16xf32> to vector<16x1xf32>
    %cst_5 = arith.constant 3.200000e+01 : f32
    %5 = vector.broadcast %cst_5 : f32 to vector<16x1xf32>
    %6 = arith.divf %4, %5 : vector<16x1xf32>
    %7 = vector.broadcast %6 : vector<16x1xf32> to vector<16x32xf32>
    %8 = arith.subf %0, %7 : vector<16x32xf32>
    %9 = arith.mulf %8, %8 : vector<16x32xf32>
    %cst_6 = arith.constant dense<0.000000e+00> : vector<16xf32>
    %10 = vector.multi_reduction <add>, %9, %cst_6 [1] : vector<16x32xf32> to vector<16xf32>
    %11 = vector.shape_cast %10 : vector<16xf32> to vector<16x1xf32>
    %cst_7 = arith.constant 3.200000e+01 : f32
    %12 = vector.broadcast %cst_7 : f32 to vector<16x1xf32>
    %13 = arith.divf %11, %12 : vector<16x1xf32>
    %14 = vector.broadcast %6 : vector<16x1xf32> to vector<16x32xf32>
    %15 = arith.subf %0, %14 : vector<16x32xf32>
    %cst_8 = arith.constant 9.99999997E-7 : f32
    %16 = vector.broadcast %cst_8 : f32 to vector<16x1xf32>
    %17 = arith.addf %13, %16 : vector<16x1xf32>
    %18 = math.rsqrt %17 : vector<16x1xf32>
    %19 = vector.broadcast %18 : vector<16x1xf32> to vector<16x32xf32>
    %20 = arith.mulf %15, %19 : vector<16x32xf32>
    %21 = vector.broadcast %1 : vector<1x32xf32> to vector<16x32xf32>
    %22 = arith.mulf %20, %21 : vector<16x32xf32>
    %23 = vector.broadcast %2 : vector<1x32xf32> to vector<16x32xf32>
    %24 = arith.addf %22, %23 : vector<16x32xf32>
    %25 = arith.truncf %24 : vector<16x32xf32> to vector<16x32xbf16>
    %c0_9 = arith.constant 0 : index
    %c0_10 = arith.constant 0 : index
    %26 = vector.load %arg6[%c0_9, %c0_10] : memref<16x32xbf16, #tpu.memory_space<vmem>>, vector<16x32xbf16>
    tpu.vector_store %arg6[%c0_9, %c0_10], %25 {strides = array<i32>} : memref<16x32xbf16, #tpu.memory_space<vmem>>, vector<16x32xbf16>,
    %c0_11 = arith.constant 0 : index
    %c0_12 = arith.constant 0 : index
    %27 = vector.load %arg4[%c0_11, %c0_12] : memref<32x96xbf16, #tpu.memory_space<vmem>>, vector<32x96xbf16>
    %cst_13 = arith.constant dense<0.000000e+00> : vector<16x96xf32>
    %28 = tpu.matmul %25, %27, %cst_13 {dimension_numbers = #tpu.dot_dimension_numbers<[1], [0], [0], [1], [0, 0, 1, 1], [], []>} : vector<16x32xbf16>, vector<32x96xbf16>, vector<16x96xf32> -> vector<16x96xf32>
    %c0_14 = arith.constant 0 : index
    %c0_15 = arith.constant 0 : index
    %29 = vector.load %arg5[%c0_14, %c0_15] : memref<1x96xf32, #tpu.memory_space<vmem>>, vector<1x96xf32>
    %30 = vector.broadcast %29 : vector<1x96xf32> to vector<16x96xf32>
    %31 = arith.addf %28, %30 : vector<16x96xf32>
    %32 = vector.extract_strided_slice %31 {offsets = [0, 0], sizes = [16, 32], strides = [1, 1]} : vector<16x96xf32> to vector<16x32xf32>
    %33 = arith.truncf %32 : vector<16x32xf32> to vector<16x32xbf16>
    %c0_16 = arith.constant 0 : index
    %c0_17 = arith.constant 0 : index
    %34 = vector.load %arg7[%c0_16, %c0_17] : memref<16x32xbf16, #tpu.memory_space<vmem>>, vector<16x32xbf16>
    tpu.vector_store %arg7[%c0_16, %c0_17], %33 {strides = array<i32>} : memref<16x32xbf16, #tpu.memory_space<vmem>>, vector<16x32xbf16>,
    %35 = vector.extract_strided_slice %31 {offsets = [0, 32], sizes = [16, 32], strides = [1, 1]} : vector<16x96xf32> to vector<16x32xf32>
    %36 = arith.truncf %35 : vector<16x32xf32> to vector<16x32xbf16>
    %c0_18 = arith.constant 0 : index
    %c0_19 = arith.constant 0 : index
    %37 = vector.load %arg8[%c0_18, %c0_19] : memref<16x32xbf16, #tpu.memory_space<vmem>>, vector<16x32xbf16>
    tpu.vector_store %arg8[%c0_18, %c0_19], %36 {strides = array<i32>} : memref<16x32xbf16, #tpu.memory_space<vmem>>, vector<16x32xbf16>,
    %38 = vector.extract_strided_slice %31 {offsets = [0, 64], sizes = [16, 32], strides = [1, 1]} : vector<16x96xf32> to vector<16x32xf32>
    %39 = arith.truncf %38 : vector<16x32xf32> to vector<16x32xbf16>
    %c0_20 = arith.constant 0 : index
    %c0_21 = arith.constant 0 : index
    %40 = vector.load %arg9[%c0_20, %c0_21] : memref<16x32xbf16, #tpu.memory_space<vmem>>, vector<16x32xbf16>
    tpu.vector_store %arg9[%c0_20, %c0_21], %39 {strides = array<i32>} : memref<16x32xbf16, #tpu.memory_space<vmem>>, vector<16x32xbf16>,
    return
  }
  func.func @transform_0(%arg0: i32) -> (i32, i32) {
    %c0_i32 = arith.constant 0 : i32
    %c0_i32_0 = arith.constant 0 : i32
    return %arg0, %c0_i32 : i32, i32
  }
  func.func @transform_1(%arg0: i32) -> (i32, i32) {
    %c0_i32 = arith.constant 0 : i32
    %c0_i32_0 = arith.constant 0 : i32
    %c0_i32_1 = arith.constant 0 : i32
    return %c0_i32, %c0_i32_0 : i32, i32
  }
  func.func @transform_2(%arg0: i32) -> (i32, i32) {
    %c0_i32 = arith.constant 0 : i32
    %c0_i32_0 = arith.constant 0 : i32
    %c0_i32_1 = arith.constant 0 : i32
    return %c0_i32, %c0_i32_0 : i32, i32
  }
  func.func @transform_3(%arg0: i32) -> (i32, i32) {
    %c0_i32 = arith.constant 0 : i32
    %c0_i32_0 = arith.constant 0 : i32
    %c0_i32_1 = arith.constant 0 : i32
    return %c0_i32, %c0_i32_0 : i32, i32
  }
  func.func @transform_4(%arg0: i32) -> (i32, i32) {
    %c0_i32 = arith.constant 0 : i32
    %c0_i32_0 = arith.constant 0 : i32
    %c0_i32_1 = arith.constant 0 : i32
    return %c0_i32, %c0_i32_0 : i32, i32
  }
  func.func @transform_5(%arg0: i32) -> (i32, i32) {
    %c0_i32 = arith.constant 0 : i32
    %c0_i32_0 = arith.constant 0 : i32
    return %arg0, %c0_i32 : i32, i32
  }
  func.func @transform_6(%arg0: i32) -> (i32, i32) {
    %c0_i32 = arith.constant 0 : i32
    %c0_i32_0 = arith.constant 0 : i32
    return %arg0, %c0_i32 : i32, i32
  }
  func.func @transform_7(%arg0: i32) -> (i32, i32) {
    %c0_i32 = arith.constant 0 : i32
    %c0_i32_0 = arith.constant 0 : i32
    return %arg0, %c0_i32 : i32, i32
  }
  func.func @transform_8(%arg0: i32) -> (i32, i32) {
    %c0_i32 = arith.constant 0 : i32
    %c0_i32_0 = arith.constant 0 : i32
    return %arg0, %c0_i32 : i32, i32
  }
}

module attributes {stable_mosaic.version = 11 : i64} {
  func.func @_selfproj_lnq_kernel(%arg0: i32, %arg1: memref<16x32xbf16, #tpu.memory_space<vmem>>, %arg2: memref<16x32xf32, #tpu.memory_space<vmem>>, %arg3: memref<32x32xbf16, #tpu.memory_space<vmem>>, %arg4: memref<1x32xf32, #tpu.memory_space<vmem>>, %arg5: memref<1x32xf32, #tpu.memory_space<vmem>>, %arg6: memref<1x32xf32, #tpu.memory_space<vmem>>, %arg7: memref<32x32xbf16, #tpu.memory_space<vmem>>, %arg8: memref<1x32xf32, #tpu.memory_space<vmem>>, %arg9: memref<16x32xf32, #tpu.memory_space<vmem>>, %arg10: memref<16x32xbf16, #tpu.memory_space<vmem>>) attributes {dimension_semantics = [#tpu.dimension_semantics<parallel>], iteration_bounds = array<i64: 1>, scalar_prefetch = 0 : i64, scratch_operands = 0 : i64, tpu.core_type = #tpu.core_type<tc>, window_params = [{transform_indices = @transform_0, window_bounds = array<i64: 16, 32>}, {transform_indices = @transform_1, window_bounds = array<i64: 16, 32>}, {pipeline_mode = #tpu.pipeline_mode<synchronous>, transform_indices = @transform_2, window_bounds = array<i64: 32, 32>}, {pipeline_mode = #tpu.pipeline_mode<synchronous>, transform_indices = @transform_3, window_bounds = array<i64: 1, 32>}, {pipeline_mode = #tpu.pipeline_mode<synchronous>, transform_indices = @transform_4, window_bounds = array<i64: 1, 32>}, {pipeline_mode = #tpu.pipeline_mode<synchronous>, transform_indices = @transform_5, window_bounds = array<i64: 1, 32>}, {pipeline_mode = #tpu.pipeline_mode<synchronous>, transform_indices = @transform_6, window_bounds = array<i64: 32, 32>}, {pipeline_mode = #tpu.pipeline_mode<synchronous>, transform_indices = @transform_7, window_bounds = array<i64: 1, 32>}, {transform_indices = @transform_8, window_bounds = array<i64: 16, 32>}, {transform_indices = @transform_9, window_bounds = array<i64: 16, 32>}]} {
    %c0 = arith.constant 0 : index
    %c0_0 = arith.constant 0 : index
    %0 = vector.load %arg1[%c0, %c0_0] : memref<16x32xbf16, #tpu.memory_space<vmem>>, vector<16x32xbf16>
    %c0_1 = arith.constant 0 : index
    %c0_2 = arith.constant 0 : index
    %1 = vector.load %arg3[%c0_1, %c0_2] : memref<32x32xbf16, #tpu.memory_space<vmem>>, vector<32x32xbf16>
    %cst = arith.constant dense<0.000000e+00> : vector<16x32xf32>
    %2 = tpu.matmul %0, %1, %cst {dimension_numbers = #tpu.dot_dimension_numbers<[1], [0], [0], [1], [0, 0, 1, 1], [], []>} : vector<16x32xbf16>, vector<32x32xbf16>, vector<16x32xf32> -> vector<16x32xf32>
    %c0_3 = arith.constant 0 : index
    %c0_4 = arith.constant 0 : index
    %3 = vector.load %arg4[%c0_3, %c0_4] : memref<1x32xf32, #tpu.memory_space<vmem>>, vector<1x32xf32>
    %4 = vector.broadcast %3 : vector<1x32xf32> to vector<16x32xf32>
    %5 = arith.addf %2, %4 : vector<16x32xf32>
    %c0_5 = arith.constant 0 : index
    %c0_6 = arith.constant 0 : index
    %6 = vector.load %arg2[%c0_5, %c0_6] : memref<16x32xf32, #tpu.memory_space<vmem>>, vector<16x32xf32>
    %7 = arith.addf %5, %6 : vector<16x32xf32>
    %c0_7 = arith.constant 0 : index
    %c0_8 = arith.constant 0 : index
    %8 = vector.load %arg9[%c0_7, %c0_8] : memref<16x32xf32, #tpu.memory_space<vmem>>, vector<16x32xf32>
    tpu.vector_store %arg9[%c0_7, %c0_8], %7 {strides = array<i32>} : memref<16x32xf32, #tpu.memory_space<vmem>>, vector<16x32xf32>,
    %c0_9 = arith.constant 0 : index
    %c0_10 = arith.constant 0 : index
    %9 = vector.load %arg5[%c0_9, %c0_10] : memref<1x32xf32, #tpu.memory_space<vmem>>, vector<1x32xf32>
    %c0_11 = arith.constant 0 : index
    %c0_12 = arith.constant 0 : index
    %10 = vector.load %arg6[%c0_11, %c0_12] : memref<1x32xf32, #tpu.memory_space<vmem>>, vector<1x32xf32>
    %cst_13 = arith.constant dense<0.000000e+00> : vector<16xf32>
    %11 = vector.multi_reduction <add>, %7, %cst_13 [1] : vector<16x32xf32> to vector<16xf32>
    %12 = vector.shape_cast %11 : vector<16xf32> to vector<16x1xf32>
    %cst_14 = arith.constant 3.200000e+01 : f32
    %13 = vector.broadcast %cst_14 : f32 to vector<16x1xf32>
    %14 = arith.divf %12, %13 : vector<16x1xf32>
    %15 = vector.broadcast %14 : vector<16x1xf32> to vector<16x32xf32>
    %16 = arith.subf %7, %15 : vector<16x32xf32>
    %17 = arith.mulf %16, %16 : vector<16x32xf32>
    %cst_15 = arith.constant dense<0.000000e+00> : vector<16xf32>
    %18 = vector.multi_reduction <add>, %17, %cst_15 [1] : vector<16x32xf32> to vector<16xf32>
    %19 = vector.shape_cast %18 : vector<16xf32> to vector<16x1xf32>
    %cst_16 = arith.constant 3.200000e+01 : f32
    %20 = vector.broadcast %cst_16 : f32 to vector<16x1xf32>
    %21 = arith.divf %19, %20 : vector<16x1xf32>
    %22 = vector.broadcast %14 : vector<16x1xf32> to vector<16x32xf32>
    %23 = arith.subf %7, %22 : vector<16x32xf32>
    %cst_17 = arith.constant 9.99999997E-7 : f32
    %24 = vector.broadcast %cst_17 : f32 to vector<16x1xf32>
    %25 = arith.addf %21, %24 : vector<16x1xf32>
    %26 = math.rsqrt %25 : vector<16x1xf32>
    %27 = vector.broadcast %26 : vector<16x1xf32> to vector<16x32xf32>
    %28 = arith.mulf %23, %27 : vector<16x32xf32>
    %29 = vector.broadcast %9 : vector<1x32xf32> to vector<16x32xf32>
    %30 = arith.mulf %28, %29 : vector<16x32xf32>
    %31 = vector.broadcast %10 : vector<1x32xf32> to vector<16x32xf32>
    %32 = arith.addf %30, %31 : vector<16x32xf32>
    %33 = arith.truncf %32 : vector<16x32xf32> to vector<16x32xbf16>
    %c0_18 = arith.constant 0 : index
    %c0_19 = arith.constant 0 : index
    %34 = vector.load %arg7[%c0_18, %c0_19] : memref<32x32xbf16, #tpu.memory_space<vmem>>, vector<32x32xbf16>
    %cst_20 = arith.constant dense<0.000000e+00> : vector<16x32xf32>
    %35 = tpu.matmul %33, %34, %cst_20 {dimension_numbers = #tpu.dot_dimension_numbers<[1], [0], [0], [1], [0, 0, 1, 1], [], []>} : vector<16x32xbf16>, vector<32x32xbf16>, vector<16x32xf32> -> vector<16x32xf32>
    %c0_21 = arith.constant 0 : index
    %c0_22 = arith.constant 0 : index
    %36 = vector.load %arg8[%c0_21, %c0_22] : memref<1x32xf32, #tpu.memory_space<vmem>>, vector<1x32xf32>
    %37 = vector.broadcast %36 : vector<1x32xf32> to vector<16x32xf32>
    %38 = arith.addf %35, %37 : vector<16x32xf32>
    %39 = arith.truncf %38 : vector<16x32xf32> to vector<16x32xbf16>
    %c0_23 = arith.constant 0 : index
    %c0_24 = arith.constant 0 : index
    %40 = vector.load %arg10[%c0_23, %c0_24] : memref<16x32xbf16, #tpu.memory_space<vmem>>, vector<16x32xbf16>
    tpu.vector_store %arg10[%c0_23, %c0_24], %39 {strides = array<i32>} : memref<16x32xbf16, #tpu.memory_space<vmem>>, vector<16x32xbf16>,
    return
  }
  func.func @transform_0(%arg0: i32) -> (i32, i32) {
    %c0_i32 = arith.constant 0 : i32
    %c0_i32_0 = arith.constant 0 : i32
    return %arg0, %c0_i32 : i32, i32
  }
  func.func @transform_1(%arg0: i32) -> (i32, i32) {
    %c0_i32 = arith.constant 0 : i32
    %c0_i32_0 = arith.constant 0 : i32
    return %arg0, %c0_i32 : i32, i32
  }
  func.func @transform_2(%arg0: i32) -> (i32, i32) {
    %c0_i32 = arith.constant 0 : i32
    %c0_i32_0 = arith.constant 0 : i32
    %c0_i32_1 = arith.constant 0 : i32
    return %c0_i32, %c0_i32_0 : i32, i32
  }
  func.func @transform_3(%arg0: i32) -> (i32, i32) {
    %c0_i32 = arith.constant 0 : i32
    %c0_i32_0 = arith.constant 0 : i32
    %c0_i32_1 = arith.constant 0 : i32
    return %c0_i32, %c0_i32_0 : i32, i32
  }
  func.func @transform_4(%arg0: i32) -> (i32, i32) {
    %c0_i32 = arith.constant 0 : i32
    %c0_i32_0 = arith.constant 0 : i32
    %c0_i32_1 = arith.constant 0 : i32
    return %c0_i32, %c0_i32_0 : i32, i32
  }
  func.func @transform_5(%arg0: i32) -> (i32, i32) {
    %c0_i32 = arith.constant 0 : i32
    %c0_i32_0 = arith.constant 0 : i32
    %c0_i32_1 = arith.constant 0 : i32
    return %c0_i32, %c0_i32_0 : i32, i32
  }
  func.func @transform_6(%arg0: i32) -> (i32, i32) {
    %c0_i32 = arith.constant 0 : i32
    %c0_i32_0 = arith.constant 0 : i32
    %c0_i32_1 = arith.constant 0 : i32
    return %c0_i32, %c0_i32_0 : i32, i32
  }
  func.func @transform_7(%arg0: i32) -> (i32, i32) {
    %c0_i32 = arith.constant 0 : i32
    %c0_i32_0 = arith.constant 0 : i32
    %c0_i32_1 = arith.constant 0 : i32
    return %c0_i32, %c0_i32_0 : i32, i32
  }
  func.func @transform_8(%arg0: i32) -> (i32, i32) {
    %c0_i32 = arith.constant 0 : i32
    %c0_i32_0 = arith.constant 0 : i32
    return %arg0, %c0_i32 : i32, i32
  }
  func.func @transform_9(%arg0: i32) -> (i32, i32) {
    %c0_i32 = arith.constant 0 : i32
    %c0_i32_0 = arith.constant 0 : i32
    return %arg0, %c0_i32 : i32, i32
  }
}

module attributes {stable_mosaic.version = 11 : i64} {
  func.func @_kv_proj_kernel(%arg0: i32, %arg1: memref<32x32xf32, #tpu.memory_space<vmem>>, %arg2: memref<32x64xbf16, #tpu.memory_space<vmem>>, %arg3: memref<1x64xf32, #tpu.memory_space<vmem>>, %arg4: memref<32x32xbf16, #tpu.memory_space<vmem>>, %arg5: memref<32x32xbf16, #tpu.memory_space<vmem>>) attributes {dimension_semantics = [#tpu.dimension_semantics<parallel>], iteration_bounds = array<i64: 1>, scalar_prefetch = 0 : i64, scratch_operands = 0 : i64, tpu.core_type = #tpu.core_type<tc>, window_params = [{transform_indices = @transform_0, window_bounds = array<i64: 32, 32>}, {pipeline_mode = #tpu.pipeline_mode<synchronous>, transform_indices = @transform_1, window_bounds = array<i64: 32, 64>}, {pipeline_mode = #tpu.pipeline_mode<synchronous>, transform_indices = @transform_2, window_bounds = array<i64: 1, 64>}, {transform_indices = @transform_3, window_bounds = array<i64: 32, 32>}, {transform_indices = @transform_4, window_bounds = array<i64: 32, 32>}]} {
    %c0 = arith.constant 0 : index
    %c0_0 = arith.constant 0 : index
    %0 = vector.load %arg1[%c0, %c0_0] : memref<32x32xf32, #tpu.memory_space<vmem>>, vector<32x32xf32>
    %1 = arith.truncf %0 : vector<32x32xf32> to vector<32x32xbf16>
    %c0_1 = arith.constant 0 : index
    %c0_2 = arith.constant 0 : index
    %2 = vector.load %arg2[%c0_1, %c0_2] : memref<32x64xbf16, #tpu.memory_space<vmem>>, vector<32x64xbf16>
    %cst = arith.constant dense<0.000000e+00> : vector<32x64xf32>
    %3 = tpu.matmul %1, %2, %cst {dimension_numbers = #tpu.dot_dimension_numbers<[1], [0], [0], [1], [0, 0, 1, 1], [], []>} : vector<32x32xbf16>, vector<32x64xbf16>, vector<32x64xf32> -> vector<32x64xf32>
    %c0_3 = arith.constant 0 : index
    %c0_4 = arith.constant 0 : index
    %4 = vector.load %arg3[%c0_3, %c0_4] : memref<1x64xf32, #tpu.memory_space<vmem>>, vector<1x64xf32>
    %5 = vector.broadcast %4 : vector<1x64xf32> to vector<32x64xf32>
    %6 = arith.addf %3, %5 : vector<32x64xf32>
    %7 = vector.extract_strided_slice %6 {offsets = [0, 0], sizes = [32, 32], strides = [1, 1]} : vector<32x64xf32> to vector<32x32xf32>
    %8 = arith.truncf %7 : vector<32x32xf32> to vector<32x32xbf16>
    %c0_5 = arith.constant 0 : index
    %c0_6 = arith.constant 0 : index
    %9 = vector.load %arg4[%c0_5, %c0_6] : memref<32x32xbf16, #tpu.memory_space<vmem>>, vector<32x32xbf16>
    tpu.vector_store %arg4[%c0_5, %c0_6], %8 {strides = array<i32>} : memref<32x32xbf16, #tpu.memory_space<vmem>>, vector<32x32xbf16>,
    %10 = vector.extract_strided_slice %6 {offsets = [0, 32], sizes = [32, 32], strides = [1, 1]} : vector<32x64xf32> to vector<32x32xf32>
    %11 = arith.truncf %10 : vector<32x32xf32> to vector<32x32xbf16>
    %c0_7 = arith.constant 0 : index
    %c0_8 = arith.constant 0 : index
    %12 = vector.load %arg5[%c0_7, %c0_8] : memref<32x32xbf16, #tpu.memory_space<vmem>>, vector<32x32xbf16>
    tpu.vector_store %arg5[%c0_7, %c0_8], %11 {strides = array<i32>} : memref<32x32xbf16, #tpu.memory_space<vmem>>, vector<32x32xbf16>,
    return
  }
  func.func @transform_0(%arg0: i32) -> (i32, i32) {
    %c0_i32 = arith.constant 0 : i32
    %c0_i32_0 = arith.constant 0 : i32
    return %arg0, %c0_i32 : i32, i32
  }
  func.func @transform_1(%arg0: i32) -> (i32, i32) {
    %c0_i32 = arith.constant 0 : i32
    %c0_i32_0 = arith.constant 0 : i32
    %c0_i32_1 = arith.constant 0 : i32
    return %c0_i32, %c0_i32_0 : i32, i32
  }
  func.func @transform_2(%arg0: i32) -> (i32, i32) {
    %c0_i32 = arith.constant 0 : i32
    %c0_i32_0 = arith.constant 0 : i32
    %c0_i32_1 = arith.constant 0 : i32
    return %c0_i32, %c0_i32_0 : i32, i32
  }
  func.func @transform_3(%arg0: i32) -> (i32, i32) {
    %c0_i32 = arith.constant 0 : i32
    %c0_i32_0 = arith.constant 0 : i32
    return %arg0, %c0_i32 : i32, i32
  }
  func.func @transform_4(%arg0: i32) -> (i32, i32) {
    %c0_i32 = arith.constant 0 : i32
    %c0_i32_0 = arith.constant 0 : i32
    return %arg0, %c0_i32 : i32, i32
  }
}

module attributes {stable_mosaic.version = 11 : i64} {
  func.func @_cross_attn_kernel(%arg0: i32, %arg1: i32, %arg2: memref<1x8x32xbf16, #tpu.memory_space<vmem>>, %arg3: memref<1x16x32xbf16, #tpu.memory_space<vmem>>, %arg4: memref<1x16x32xbf16, #tpu.memory_space<vmem>>, %arg5: memref<1x1x16xi32, #tpu.memory_space<vmem>>, %arg6: memref<1x1x16xi32, #tpu.memory_space<vmem>>, %arg7: memref<1x8x32xbf16, #tpu.memory_space<vmem>>, %arg8: memref<1x8x32xbf16, #tpu.memory_space<vmem>>) attributes {dimension_semantics = [#tpu.dimension_semantics<parallel>, #tpu.dimension_semantics<parallel>], iteration_bounds = array<i64: 2, 1>, scalar_prefetch = 0 : i64, scratch_operands = 0 : i64, tpu.core_type = #tpu.core_type<tc>, window_params = [{transform_indices = @transform_0, window_bounds = array<i64: 1, 8, 32>}, {transform_indices = @transform_1, window_bounds = array<i64: 1, 16, 32>}, {transform_indices = @transform_2, window_bounds = array<i64: 1, 16, 32>}, {transform_indices = @transform_3, window_bounds = array<i64: 1, 1, 16>}, {transform_indices = @transform_4, window_bounds = array<i64: 1, 1, 16>}, {transform_indices = @transform_5, window_bounds = array<i64: 1, 8, 32>}, {transform_indices = @transform_6, window_bounds = array<i64: 1, 8, 32>}]} {
    %c0 = arith.constant 0 : index
    %c0_0 = arith.constant 0 : index
    %c0_1 = arith.constant 0 : index
    %0 = vector.load %arg2[%c0, %c0_0, %c0_1] : memref<1x8x32xbf16, #tpu.memory_space<vmem>>, vector<1x8x32xbf16>
    %1 = vector.shape_cast %0 : vector<1x8x32xbf16> to vector<8x32xbf16>
    %c0_2 = arith.constant 0 : index
    %c0_3 = arith.constant 0 : index
    %c0_4 = arith.constant 0 : index
    %2 = vector.load %arg3[%c0_2, %c0_3, %c0_4] : memref<1x16x32xbf16, #tpu.memory_space<vmem>>, vector<1x16x32xbf16>
    %3 = vector.shape_cast %2 : vector<1x16x32xbf16> to vector<16x32xbf16>
    %c0_5 = arith.constant 0 : index
    %c0_6 = arith.constant 0 : index
    %c0_7 = arith.constant 0 : index
    %4 = vector.load %arg4[%c0_5, %c0_6, %c0_7] : memref<1x16x32xbf16, #tpu.memory_space<vmem>>, vector<1x16x32xbf16>
    %5 = vector.shape_cast %4 : vector<1x16x32xbf16> to vector<16x32xbf16>
    %c0_8 = arith.constant 0 : index
    %c0_9 = arith.constant 0 : index
    %c0_10 = arith.constant 0 : index
    %6 = vector.load %arg5[%c0_8, %c0_9, %c0_10] : memref<1x1x16xi32, #tpu.memory_space<vmem>>, vector<1x1x16xi32>
    %7 = vector.shape_cast %6 : vector<1x1x16xi32> to vector<1x16xi32>
    %c0_i32 = arith.constant 0 : i32
    %8 = vector.broadcast %c0_i32 : i32 to vector<1x16xi32>
    %9 = arith.cmpi sgt, %7, %8 : vector<1x16xi32>
    %c0_11 = arith.constant 0 : index
    %c0_12 = arith.constant 0 : index
    %c0_13 = arith.constant 0 : index
    %10 = vector.load %arg6[%c0_11, %c0_12, %c0_13] : memref<1x1x16xi32, #tpu.memory_space<vmem>>, vector<1x1x16xi32>
    %11 = vector.shape_cast %10 : vector<1x1x16xi32> to vector<1x16xi32>
    %c1_i32 = arith.constant 1 : i32
    %12 = vector.broadcast %c1_i32 : i32 to vector<1x16xi32>
    %13 = arith.cmpi ne, %11, %12 : vector<1x16xi32>
    %14 = arith.ori %9, %13 : vector<1x16xi1>
    %c2_i32 = arith.constant 2 : i32
    %15 = vector.broadcast %c2_i32 : i32 to vector<1x16xi32>
    %16 = arith.cmpi ne, %11, %15 : vector<1x16xi32>
    %17 = arith.ori %9, %16 : vector<1x16xi1>
    %cst = arith.constant -9.99999984E+17 : f32
    %cst_14 = arith.constant 0.000000e+00 : f32
    %18 = vector.broadcast %cst : f32 to vector<1x16xf32>
    %19 = vector.broadcast %cst_14 : f32 to vector<1x16xf32>
    %20 = arith.select %14, %18, %19 : vector<1x16xi1>, vector<1x16xf32>
    %cst_15 = arith.constant -9.99999984E+17 : f32
    %cst_16 = arith.constant 0.000000e+00 : f32
    %21 = vector.broadcast %cst_15 : f32 to vector<1x16xf32>
    %22 = vector.broadcast %cst_16 : f32 to vector<1x16xf32>
    %23 = arith.select %17, %21, %22 : vector<1x16xi1>, vector<1x16xf32>
    %24 = vector.extract_strided_slice %1 {offsets = [0, 0], sizes = [8, 8], strides = [1, 1]} : vector<8x32xbf16> to vector<8x8xbf16>
    %25 = vector.extract_strided_slice %3 {offsets = [0, 0], sizes = [16, 8], strides = [1, 1]} : vector<16x32xbf16> to vector<16x8xbf16>
    %cst_17 = arith.constant dense<0.000000e+00> : vector<8x16xf32>
    %26 = tpu.matmul %24, %25, %cst_17 {dimension_numbers = #tpu.dot_dimension_numbers<[1], [1], [0], [0], [0, 0, 1, 0], [], []>} : vector<8x8xbf16>, vector<16x8xbf16>, vector<8x16xf32> -> vector<8x16xf32>
    %cst_18 = arith.constant 0.353553385 : f32
    %27 = vector.broadcast %cst_18 : f32 to vector<8x16xf32>
    %28 = arith.mulf %26, %27 : vector<8x16xf32>
    %29 = vector.broadcast %20 : vector<1x16xf32> to vector<8x16xf32>
    %30 = arith.addf %28, %29 : vector<8x16xf32>
    %cst_19 = arith.constant dense<0xFF800000> : vector<8xf32>
    %31 = vector.multi_reduction <maximumf>, %30, %cst_19 [1] : vector<8x16xf32> to vector<8xf32>
    %32 = vector.shape_cast %31 : vector<8xf32> to vector<8x1xf32>
    %33 = vector.broadcast %32 : vector<8x1xf32> to vector<8x16xf32>
    %34 = arith.subf %30, %33 : vector<8x16xf32>
    %35 = math.exp %34 : vector<8x16xf32>
    %cst_20 = arith.constant dense<0.000000e+00> : vector<8xf32>
    %36 = vector.multi_reduction <add>, %35, %cst_20 [1] : vector<8x16xf32> to vector<8xf32>
    %37 = vector.shape_cast %36 : vector<8xf32> to vector<8x1xf32>
    %38 = tpu.reciprocal %37 {approx = true} : vector<8x1xf32> -> vector<8x1xf32>
    %39 = vector.broadcast %38 : vector<8x1xf32> to vector<8x16xf32>
    %40 = arith.mulf %35, %39 : vector<8x16xf32>
    %41 = vector.broadcast %23 : vector<1x16xf32> to vector<8x16xf32>
    %42 = arith.addf %28, %41 : vector<8x16xf32>
    %cst_21 = arith.constant dense<0xFF800000> : vector<8xf32>
    %43 = vector.multi_reduction <maximumf>, %42, %cst_21 [1] : vector<8x16xf32> to vector<8xf32>
    %44 = vector.shape_cast %43 : vector<8xf32> to vector<8x1xf32>
    %45 = vector.broadcast %44 : vector<8x1xf32> to vector<8x16xf32>
    %46 = arith.subf %42, %45 : vector<8x16xf32>
    %47 = math.exp %46 : vector<8x16xf32>
    %cst_22 = arith.constant dense<0.000000e+00> : vector<8xf32>
    %48 = vector.multi_reduction <add>, %47, %cst_22 [1] : vector<8x16xf32> to vector<8xf32>
    %49 = vector.shape_cast %48 : vector<8xf32> to vector<8x1xf32>
    %50 = tpu.reciprocal %49 {approx = true} : vector<8x1xf32> -> vector<8x1xf32>
    %51 = vector.broadcast %50 : vector<8x1xf32> to vector<8x16xf32>
    %52 = arith.mulf %47, %51 : vector<8x16xf32>
    %53 = arith.truncf %40 : vector<8x16xf32> to vector<8x16xbf16>
    %54 = vector.extract_strided_slice %5 {offsets = [0, 0], sizes = [16, 8], strides = [1, 1]} : vector<16x32xbf16> to vector<16x8xbf16>
    %cst_23 = arith.constant dense<0.000000e+00> : vector<8x8xf32>
    %55 = tpu.matmul %53, %54, %cst_23 {dimension_numbers = #tpu.dot_dimension_numbers<[1], [0], [0], [1], [0, 0, 1, 1], [], []>} : vector<8x16xbf16>, vector<16x8xbf16>, vector<8x8xf32> -> vector<8x8xf32>
    %56 = arith.truncf %55 : vector<8x8xf32> to vector<8x8xbf16>
    %c0_24 = arith.constant 0 : index
    %c0_25 = arith.constant 0 : index
    %c0_26 = arith.constant 0 : index
    %57 = vector.load %arg7[%c0_24, %c0_25, %c0_26] : memref<1x8x32xbf16, #tpu.memory_space<vmem>>, vector<1x8x8xbf16>
    %58 = vector.shape_cast %57 : vector<1x8x8xbf16> to vector<8x8xbf16>
    %59 = vector.shape_cast %56 : vector<8x8xbf16> to vector<1x8x8xbf16>
    tpu.vector_store %arg7[%c0_24, %c0_25, %c0_26], %59 {strides = array<i32>} : memref<1x8x32xbf16, #tpu.memory_space<vmem>>, vector<1x8x8xbf16>,
    %60 = arith.truncf %52 : vector<8x16xf32> to vector<8x16xbf16>
    %61 = vector.extract_strided_slice %5 {offsets = [0, 0], sizes = [16, 8], strides = [1, 1]} : vector<16x32xbf16> to vector<16x8xbf16>
    %cst_27 = arith.constant dense<0.000000e+00> : vector<8x8xf32>
    %62 = tpu.matmul %60, %61, %cst_27 {dimension_numbers = #tpu.dot_dimension_numbers<[1], [0], [0], [1], [0, 0, 1, 1], [], []>} : vector<8x16xbf16>, vector<16x8xbf16>, vector<8x8xf32> -> vector<8x8xf32>
    %63 = arith.truncf %62 : vector<8x8xf32> to vector<8x8xbf16>
    %c0_28 = arith.constant 0 : index
    %c0_29 = arith.constant 0 : index
    %c0_30 = arith.constant 0 : index
    %64 = vector.load %arg8[%c0_28, %c0_29, %c0_30] : memref<1x8x32xbf16, #tpu.memory_space<vmem>>, vector<1x8x8xbf16>
    %65 = vector.shape_cast %64 : vector<1x8x8xbf16> to vector<8x8xbf16>
    %66 = vector.shape_cast %63 : vector<8x8xbf16> to vector<1x8x8xbf16>
    tpu.vector_store %arg8[%c0_28, %c0_29, %c0_30], %66 {strides = array<i32>} : memref<1x8x32xbf16, #tpu.memory_space<vmem>>, vector<1x8x8xbf16>,
    %67 = vector.extract_strided_slice %1 {offsets = [0, 8], sizes = [8, 8], strides = [1, 1]} : vector<8x32xbf16> to vector<8x8xbf16>
    %68 = vector.extract_strided_slice %3 {offsets = [0, 8], sizes = [16, 8], strides = [1, 1]} : vector<16x32xbf16> to vector<16x8xbf16>
    %cst_31 = arith.constant dense<0.000000e+00> : vector<8x16xf32>
    %69 = tpu.matmul %67, %68, %cst_31 {dimension_numbers = #tpu.dot_dimension_numbers<[1], [1], [0], [0], [0, 0, 1, 0], [], []>} : vector<8x8xbf16>, vector<16x8xbf16>, vector<8x16xf32> -> vector<8x16xf32>
    %cst_32 = arith.constant 0.353553385 : f32
    %70 = vector.broadcast %cst_32 : f32 to vector<8x16xf32>
    %71 = arith.mulf %69, %70 : vector<8x16xf32>
    %72 = vector.broadcast %20 : vector<1x16xf32> to vector<8x16xf32>
    %73 = arith.addf %71, %72 : vector<8x16xf32>
    %cst_33 = arith.constant dense<0xFF800000> : vector<8xf32>
    %74 = vector.multi_reduction <maximumf>, %73, %cst_33 [1] : vector<8x16xf32> to vector<8xf32>
    %75 = vector.shape_cast %74 : vector<8xf32> to vector<8x1xf32>
    %76 = vector.broadcast %75 : vector<8x1xf32> to vector<8x16xf32>
    %77 = arith.subf %73, %76 : vector<8x16xf32>
    %78 = math.exp %77 : vector<8x16xf32>
    %cst_34 = arith.constant dense<0.000000e+00> : vector<8xf32>
    %79 = vector.multi_reduction <add>, %78, %cst_34 [1] : vector<8x16xf32> to vector<8xf32>
    %80 = vector.shape_cast %79 : vector<8xf32> to vector<8x1xf32>
    %81 = tpu.reciprocal %80 {approx = true} : vector<8x1xf32> -> vector<8x1xf32>
    %82 = vector.broadcast %81 : vector<8x1xf32> to vector<8x16xf32>
    %83 = arith.mulf %78, %82 : vector<8x16xf32>
    %84 = vector.broadcast %23 : vector<1x16xf32> to vector<8x16xf32>
    %85 = arith.addf %71, %84 : vector<8x16xf32>
    %cst_35 = arith.constant dense<0xFF800000> : vector<8xf32>
    %86 = vector.multi_reduction <maximumf>, %85, %cst_35 [1] : vector<8x16xf32> to vector<8xf32>
    %87 = vector.shape_cast %86 : vector<8xf32> to vector<8x1xf32>
    %88 = vector.broadcast %87 : vector<8x1xf32> to vector<8x16xf32>
    %89 = arith.subf %85, %88 : vector<8x16xf32>
    %90 = math.exp %89 : vector<8x16xf32>
    %cst_36 = arith.constant dense<0.000000e+00> : vector<8xf32>
    %91 = vector.multi_reduction <add>, %90, %cst_36 [1] : vector<8x16xf32> to vector<8xf32>
    %92 = vector.shape_cast %91 : vector<8xf32> to vector<8x1xf32>
    %93 = tpu.reciprocal %92 {approx = true} : vector<8x1xf32> -> vector<8x1xf32>
    %94 = vector.broadcast %93 : vector<8x1xf32> to vector<8x16xf32>
    %95 = arith.mulf %90, %94 : vector<8x16xf32>
    %96 = arith.truncf %83 : vector<8x16xf32> to vector<8x16xbf16>
    %97 = vector.extract_strided_slice %5 {offsets = [0, 8], sizes = [16, 8], strides = [1, 1]} : vector<16x32xbf16> to vector<16x8xbf16>
    %cst_37 = arith.constant dense<0.000000e+00> : vector<8x8xf32>
    %98 = tpu.matmul %96, %97, %cst_37 {dimension_numbers = #tpu.dot_dimension_numbers<[1], [0], [0], [1], [0, 0, 1, 1], [], []>} : vector<8x16xbf16>, vector<16x8xbf16>, vector<8x8xf32> -> vector<8x8xf32>
    %99 = arith.truncf %98 : vector<8x8xf32> to vector<8x8xbf16>
    %c0_38 = arith.constant 0 : index
    %c0_39 = arith.constant 0 : index
    %c8 = arith.constant 8 : index
    %100 = vector.load %arg7[%c0_38, %c0_39, %c8] : memref<1x8x32xbf16, #tpu.memory_space<vmem>>, vector<1x8x8xbf16>
    %101 = vector.shape_cast %100 : vector<1x8x8xbf16> to vector<8x8xbf16>
    %102 = vector.shape_cast %99 : vector<8x8xbf16> to vector<1x8x8xbf16>
    tpu.vector_store %arg7[%c0_38, %c0_39, %c8], %102 {strides = array<i32>} : memref<1x8x32xbf16, #tpu.memory_space<vmem>>, vector<1x8x8xbf16>,
    %103 = arith.truncf %95 : vector<8x16xf32> to vector<8x16xbf16>
    %104 = vector.extract_strided_slice %5 {offsets = [0, 8], sizes = [16, 8], strides = [1, 1]} : vector<16x32xbf16> to vector<16x8xbf16>
    %cst_40 = arith.constant dense<0.000000e+00> : vector<8x8xf32>
    %105 = tpu.matmul %103, %104, %cst_40 {dimension_numbers = #tpu.dot_dimension_numbers<[1], [0], [0], [1], [0, 0, 1, 1], [], []>} : vector<8x16xbf16>, vector<16x8xbf16>, vector<8x8xf32> -> vector<8x8xf32>
    %106 = arith.truncf %105 : vector<8x8xf32> to vector<8x8xbf16>
    %c0_41 = arith.constant 0 : index
    %c0_42 = arith.constant 0 : index
    %c8_43 = arith.constant 8 : index
    %107 = vector.load %arg8[%c0_41, %c0_42, %c8_43] : memref<1x8x32xbf16, #tpu.memory_space<vmem>>, vector<1x8x8xbf16>
    %108 = vector.shape_cast %107 : vector<1x8x8xbf16> to vector<8x8xbf16>
    %109 = vector.shape_cast %106 : vector<8x8xbf16> to vector<1x8x8xbf16>
    tpu.vector_store %arg8[%c0_41, %c0_42, %c8_43], %109 {strides = array<i32>} : memref<1x8x32xbf16, #tpu.memory_space<vmem>>, vector<1x8x8xbf16>,
    %110 = vector.extract_strided_slice %1 {offsets = [0, 16], sizes = [8, 8], strides = [1, 1]} : vector<8x32xbf16> to vector<8x8xbf16>
    %111 = vector.extract_strided_slice %3 {offsets = [0, 16], sizes = [16, 8], strides = [1, 1]} : vector<16x32xbf16> to vector<16x8xbf16>
    %cst_44 = arith.constant dense<0.000000e+00> : vector<8x16xf32>
    %112 = tpu.matmul %110, %111, %cst_44 {dimension_numbers = #tpu.dot_dimension_numbers<[1], [1], [0], [0], [0, 0, 1, 0], [], []>} : vector<8x8xbf16>, vector<16x8xbf16>, vector<8x16xf32> -> vector<8x16xf32>
    %cst_45 = arith.constant 0.353553385 : f32
    %113 = vector.broadcast %cst_45 : f32 to vector<8x16xf32>
    %114 = arith.mulf %112, %113 : vector<8x16xf32>
    %115 = vector.broadcast %20 : vector<1x16xf32> to vector<8x16xf32>
    %116 = arith.addf %114, %115 : vector<8x16xf32>
    %cst_46 = arith.constant dense<0xFF800000> : vector<8xf32>
    %117 = vector.multi_reduction <maximumf>, %116, %cst_46 [1] : vector<8x16xf32> to vector<8xf32>
    %118 = vector.shape_cast %117 : vector<8xf32> to vector<8x1xf32>
    %119 = vector.broadcast %118 : vector<8x1xf32> to vector<8x16xf32>
    %120 = arith.subf %116, %119 : vector<8x16xf32>
    %121 = math.exp %120 : vector<8x16xf32>
    %cst_47 = arith.constant dense<0.000000e+00> : vector<8xf32>
    %122 = vector.multi_reduction <add>, %121, %cst_47 [1] : vector<8x16xf32> to vector<8xf32>
    %123 = vector.shape_cast %122 : vector<8xf32> to vector<8x1xf32>
    %124 = tpu.reciprocal %123 {approx = true} : vector<8x1xf32> -> vector<8x1xf32>
    %125 = vector.broadcast %124 : vector<8x1xf32> to vector<8x16xf32>
    %126 = arith.mulf %121, %125 : vector<8x16xf32>
    %127 = vector.broadcast %23 : vector<1x16xf32> to vector<8x16xf32>
    %128 = arith.addf %114, %127 : vector<8x16xf32>
    %cst_48 = arith.constant dense<0xFF800000> : vector<8xf32>
    %129 = vector.multi_reduction <maximumf>, %128, %cst_48 [1] : vector<8x16xf32> to vector<8xf32>
    %130 = vector.shape_cast %129 : vector<8xf32> to vector<8x1xf32>
    %131 = vector.broadcast %130 : vector<8x1xf32> to vector<8x16xf32>
    %132 = arith.subf %128, %131 : vector<8x16xf32>
    %133 = math.exp %132 : vector<8x16xf32>
    %cst_49 = arith.constant dense<0.000000e+00> : vector<8xf32>
    %134 = vector.multi_reduction <add>, %133, %cst_49 [1] : vector<8x16xf32> to vector<8xf32>
    %135 = vector.shape_cast %134 : vector<8xf32> to vector<8x1xf32>
    %136 = tpu.reciprocal %135 {approx = true} : vector<8x1xf32> -> vector<8x1xf32>
    %137 = vector.broadcast %136 : vector<8x1xf32> to vector<8x16xf32>
    %138 = arith.mulf %133, %137 : vector<8x16xf32>
    %139 = arith.truncf %126 : vector<8x16xf32> to vector<8x16xbf16>
    %140 = vector.extract_strided_slice %5 {offsets = [0, 16], sizes = [16, 8], strides = [1, 1]} : vector<16x32xbf16> to vector<16x8xbf16>
    %cst_50 = arith.constant dense<0.000000e+00> : vector<8x8xf32>
    %141 = tpu.matmul %139, %140, %cst_50 {dimension_numbers = #tpu.dot_dimension_numbers<[1], [0], [0], [1], [0, 0, 1, 1], [], []>} : vector<8x16xbf16>, vector<16x8xbf16>, vector<8x8xf32> -> vector<8x8xf32>
    %142 = arith.truncf %141 : vector<8x8xf32> to vector<8x8xbf16>
    %c0_51 = arith.constant 0 : index
    %c0_52 = arith.constant 0 : index
    %c16 = arith.constant 16 : index
    %143 = vector.load %arg7[%c0_51, %c0_52, %c16] : memref<1x8x32xbf16, #tpu.memory_space<vmem>>, vector<1x8x8xbf16>
    %144 = vector.shape_cast %143 : vector<1x8x8xbf16> to vector<8x8xbf16>
    %145 = vector.shape_cast %142 : vector<8x8xbf16> to vector<1x8x8xbf16>
    tpu.vector_store %arg7[%c0_51, %c0_52, %c16], %145 {strides = array<i32>} : memref<1x8x32xbf16, #tpu.memory_space<vmem>>, vector<1x8x8xbf16>,
    %146 = arith.truncf %138 : vector<8x16xf32> to vector<8x16xbf16>
    %147 = vector.extract_strided_slice %5 {offsets = [0, 16], sizes = [16, 8], strides = [1, 1]} : vector<16x32xbf16> to vector<16x8xbf16>
    %cst_53 = arith.constant dense<0.000000e+00> : vector<8x8xf32>
    %148 = tpu.matmul %146, %147, %cst_53 {dimension_numbers = #tpu.dot_dimension_numbers<[1], [0], [0], [1], [0, 0, 1, 1], [], []>} : vector<8x16xbf16>, vector<16x8xbf16>, vector<8x8xf32> -> vector<8x8xf32>
    %149 = arith.truncf %148 : vector<8x8xf32> to vector<8x8xbf16>
    %c0_54 = arith.constant 0 : index
    %c0_55 = arith.constant 0 : index
    %c16_56 = arith.constant 16 : index
    %150 = vector.load %arg8[%c0_54, %c0_55, %c16_56] : memref<1x8x32xbf16, #tpu.memory_space<vmem>>, vector<1x8x8xbf16>
    %151 = vector.shape_cast %150 : vector<1x8x8xbf16> to vector<8x8xbf16>
    %152 = vector.shape_cast %149 : vector<8x8xbf16> to vector<1x8x8xbf16>
    tpu.vector_store %arg8[%c0_54, %c0_55, %c16_56], %152 {strides = array<i32>} : memref<1x8x32xbf16, #tpu.memory_space<vmem>>, vector<1x8x8xbf16>,
    %153 = vector.extract_strided_slice %1 {offsets = [0, 24], sizes = [8, 8], strides = [1, 1]} : vector<8x32xbf16> to vector<8x8xbf16>
    %154 = vector.extract_strided_slice %3 {offsets = [0, 24], sizes = [16, 8], strides = [1, 1]} : vector<16x32xbf16> to vector<16x8xbf16>
    %cst_57 = arith.constant dense<0.000000e+00> : vector<8x16xf32>
    %155 = tpu.matmul %153, %154, %cst_57 {dimension_numbers = #tpu.dot_dimension_numbers<[1], [1], [0], [0], [0, 0, 1, 0], [], []>} : vector<8x8xbf16>, vector<16x8xbf16>, vector<8x16xf32> -> vector<8x16xf32>
    %cst_58 = arith.constant 0.353553385 : f32
    %156 = vector.broadcast %cst_58 : f32 to vector<8x16xf32>
    %157 = arith.mulf %155, %156 : vector<8x16xf32>
    %158 = vector.broadcast %20 : vector<1x16xf32> to vector<8x16xf32>
    %159 = arith.addf %157, %158 : vector<8x16xf32>
    %cst_59 = arith.constant dense<0xFF800000> : vector<8xf32>
    %160 = vector.multi_reduction <maximumf>, %159, %cst_59 [1] : vector<8x16xf32> to vector<8xf32>
    %161 = vector.shape_cast %160 : vector<8xf32> to vector<8x1xf32>
    %162 = vector.broadcast %161 : vector<8x1xf32> to vector<8x16xf32>
    %163 = arith.subf %159, %162 : vector<8x16xf32>
    %164 = math.exp %163 : vector<8x16xf32>
    %cst_60 = arith.constant dense<0.000000e+00> : vector<8xf32>
    %165 = vector.multi_reduction <add>, %164, %cst_60 [1] : vector<8x16xf32> to vector<8xf32>
    %166 = vector.shape_cast %165 : vector<8xf32> to vector<8x1xf32>
    %167 = tpu.reciprocal %166 {approx = true} : vector<8x1xf32> -> vector<8x1xf32>
    %168 = vector.broadcast %167 : vector<8x1xf32> to vector<8x16xf32>
    %169 = arith.mulf %164, %168 : vector<8x16xf32>
    %170 = vector.broadcast %23 : vector<1x16xf32> to vector<8x16xf32>
    %171 = arith.addf %157, %170 : vector<8x16xf32>
    %cst_61 = arith.constant dense<0xFF800000> : vector<8xf32>
    %172 = vector.multi_reduction <maximumf>, %171, %cst_61 [1] : vector<8x16xf32> to vector<8xf32>
    %173 = vector.shape_cast %172 : vector<8xf32> to vector<8x1xf32>
    %174 = vector.broadcast %173 : vector<8x1xf32> to vector<8x16xf32>
    %175 = arith.subf %171, %174 : vector<8x16xf32>
    %176 = math.exp %175 : vector<8x16xf32>
    %cst_62 = arith.constant dense<0.000000e+00> : vector<8xf32>
    %177 = vector.multi_reduction <add>, %176, %cst_62 [1] : vector<8x16xf32> to vector<8xf32>
    %178 = vector.shape_cast %177 : vector<8xf32> to vector<8x1xf32>
    %179 = tpu.reciprocal %178 {approx = true} : vector<8x1xf32> -> vector<8x1xf32>
    %180 = vector.broadcast %179 : vector<8x1xf32> to vector<8x16xf32>
    %181 = arith.mulf %176, %180 : vector<8x16xf32>
    %182 = arith.truncf %169 : vector<8x16xf32> to vector<8x16xbf16>
    %183 = vector.extract_strided_slice %5 {offsets = [0, 24], sizes = [16, 8], strides = [1, 1]} : vector<16x32xbf16> to vector<16x8xbf16>
    %cst_63 = arith.constant dense<0.000000e+00> : vector<8x8xf32>
    %184 = tpu.matmul %182, %183, %cst_63 {dimension_numbers = #tpu.dot_dimension_numbers<[1], [0], [0], [1], [0, 0, 1, 1], [], []>} : vector<8x16xbf16>, vector<16x8xbf16>, vector<8x8xf32> -> vector<8x8xf32>
    %185 = arith.truncf %184 : vector<8x8xf32> to vector<8x8xbf16>
    %c0_64 = arith.constant 0 : index
    %c0_65 = arith.constant 0 : index
    %c24 = arith.constant 24 : index
    %186 = vector.load %arg7[%c0_64, %c0_65, %c24] : memref<1x8x32xbf16, #tpu.memory_space<vmem>>, vector<1x8x8xbf16>
    %187 = vector.shape_cast %186 : vector<1x8x8xbf16> to vector<8x8xbf16>
    %188 = vector.shape_cast %185 : vector<8x8xbf16> to vector<1x8x8xbf16>
    tpu.vector_store %arg7[%c0_64, %c0_65, %c24], %188 {strides = array<i32>} : memref<1x8x32xbf16, #tpu.memory_space<vmem>>, vector<1x8x8xbf16>,
    %189 = arith.truncf %181 : vector<8x16xf32> to vector<8x16xbf16>
    %190 = vector.extract_strided_slice %5 {offsets = [0, 24], sizes = [16, 8], strides = [1, 1]} : vector<16x32xbf16> to vector<16x8xbf16>
    %cst_66 = arith.constant dense<0.000000e+00> : vector<8x8xf32>
    %191 = tpu.matmul %189, %190, %cst_66 {dimension_numbers = #tpu.dot_dimension_numbers<[1], [0], [0], [1], [0, 0, 1, 1], [], []>} : vector<8x16xbf16>, vector<16x8xbf16>, vector<8x8xf32> -> vector<8x8xf32>
    %192 = arith.truncf %191 : vector<8x8xf32> to vector<8x8xbf16>
    %c0_67 = arith.constant 0 : index
    %c0_68 = arith.constant 0 : index
    %c24_69 = arith.constant 24 : index
    %193 = vector.load %arg8[%c0_67, %c0_68, %c24_69] : memref<1x8x32xbf16, #tpu.memory_space<vmem>>, vector<1x8x8xbf16>
    %194 = vector.shape_cast %193 : vector<1x8x8xbf16> to vector<8x8xbf16>
    %195 = vector.shape_cast %192 : vector<8x8xbf16> to vector<1x8x8xbf16>
    tpu.vector_store %arg8[%c0_67, %c0_68, %c24_69], %195 {strides = array<i32>} : memref<1x8x32xbf16, #tpu.memory_space<vmem>>, vector<1x8x8xbf16>,
    return
  }
  func.func @transform_0(%arg0: i32, %arg1: i32) -> (i32, i32, i32) {
    %c0_i32 = arith.constant 0 : i32
    %c0_i32_0 = arith.constant 0 : i32
    return %arg0, %arg1, %c0_i32 : i32, i32, i32
  }
  func.func @transform_1(%arg0: i32, %arg1: i32) -> (i32, i32, i32) {
    %c0_i32 = arith.constant 0 : i32
    %c0_i32_0 = arith.constant 0 : i32
    %c0_i32_1 = arith.constant 0 : i32
    return %arg0, %c0_i32, %c0_i32_0 : i32, i32, i32
  }
  func.func @transform_2(%arg0: i32, %arg1: i32) -> (i32, i32, i32) {
    %c0_i32 = arith.constant 0 : i32
    %c0_i32_0 = arith.constant 0 : i32
    %c0_i32_1 = arith.constant 0 : i32
    return %arg0, %c0_i32, %c0_i32_0 : i32, i32, i32
  }
  func.func @transform_3(%arg0: i32, %arg1: i32) -> (i32, i32, i32) {
    %c0_i32 = arith.constant 0 : i32
    %c0_i32_0 = arith.constant 0 : i32
    %c0_i32_1 = arith.constant 0 : i32
    return %arg0, %c0_i32, %c0_i32_0 : i32, i32, i32
  }
  func.func @transform_4(%arg0: i32, %arg1: i32) -> (i32, i32, i32) {
    %c0_i32 = arith.constant 0 : i32
    %c0_i32_0 = arith.constant 0 : i32
    %c0_i32_1 = arith.constant 0 : i32
    return %arg0, %c0_i32, %c0_i32_0 : i32, i32, i32
  }
  func.func @transform_5(%arg0: i32, %arg1: i32) -> (i32, i32, i32) {
    %c0_i32 = arith.constant 0 : i32
    %c0_i32_0 = arith.constant 0 : i32
    return %arg0, %arg1, %c0_i32 : i32, i32, i32
  }
  func.func @transform_6(%arg0: i32, %arg1: i32) -> (i32, i32, i32) {
    %c0_i32 = arith.constant 0 : i32
    %c0_i32_0 = arith.constant 0 : i32
    return %arg0, %arg1, %c0_i32 : i32, i32, i32
  }
}

module attributes {stable_mosaic.version = 11 : i64} {
  func.func @_gate_ffn_kernel(%arg0: i32, %arg1: memref<16x32xbf16, #tpu.memory_space<vmem>>, %arg2: memref<16x32xbf16, #tpu.memory_space<vmem>>, %arg3: memref<16x32xf32, #tpu.memory_space<vmem>>, %arg4: memref<32x32xbf16, #tpu.memory_space<vmem>>, %arg5: memref<1x32xf32, #tpu.memory_space<vmem>>, %arg6: memref<1x32xf32, #tpu.memory_space<vmem>>, %arg7: memref<1x32xf32, #tpu.memory_space<vmem>>, %arg8: memref<1x32xf32, #tpu.memory_space<vmem>>, %arg9: memref<1x32xf32, #tpu.memory_space<vmem>>, %arg10: memref<32x64xbf16, #tpu.memory_space<vmem>>, %arg11: memref<1x64xf32, #tpu.memory_space<vmem>>, %arg12: memref<64x32xbf16, #tpu.memory_space<vmem>>, %arg13: memref<1x32xf32, #tpu.memory_space<vmem>>, %arg14: memref<16x32xf32, #tpu.memory_space<vmem>>, %arg15: memref<16x1xf32, #tpu.memory_space<vmem>>) attributes {dimension_semantics = [#tpu.dimension_semantics<parallel>], iteration_bounds = array<i64: 1>, scalar_prefetch = 0 : i64, scratch_operands = 0 : i64, tpu.core_type = #tpu.core_type<tc>, window_params = [{transform_indices = @transform_0, window_bounds = array<i64: 16, 32>}, {transform_indices = @transform_1, window_bounds = array<i64: 16, 32>}, {transform_indices = @transform_2, window_bounds = array<i64: 16, 32>}, {pipeline_mode = #tpu.pipeline_mode<synchronous>, transform_indices = @transform_3, window_bounds = array<i64: 32, 32>}, {pipeline_mode = #tpu.pipeline_mode<synchronous>, transform_indices = @transform_4, window_bounds = array<i64: 1, 32>}, {pipeline_mode = #tpu.pipeline_mode<synchronous>, transform_indices = @transform_5, window_bounds = array<i64: 1, 32>}, {pipeline_mode = #tpu.pipeline_mode<synchronous>, transform_indices = @transform_6, window_bounds = array<i64: 1, 32>}, {pipeline_mode = #tpu.pipeline_mode<synchronous>, transform_indices = @transform_7, window_bounds = array<i64: 1, 32>}, {pipeline_mode = #tpu.pipeline_mode<synchronous>, transform_indices = @transform_8, window_bounds = array<i64: 1, 32>}, {pipeline_mode = #tpu.pipeline_mode<synchronous>, transform_indices = @transform_9, window_bounds = array<i64: 32, 64>}, {pipeline_mode = #tpu.pipeline_mode<synchronous>, transform_indices = @transform_10, window_bounds = array<i64: 1, 64>}, {pipeline_mode = #tpu.pipeline_mode<synchronous>, transform_indices = @transform_11, window_bounds = array<i64: 64, 32>}, {pipeline_mode = #tpu.pipeline_mode<synchronous>, transform_indices = @transform_12, window_bounds = array<i64: 1, 32>}, {transform_indices = @transform_13, window_bounds = array<i64: 16, 32>}, {transform_indices = @transform_14, window_bounds = array<i64: 16, 1>}]} {
    %c0 = arith.constant 0 : index
    %c0_0 = arith.constant 0 : index
    %0 = vector.load %arg1[%c0, %c0_0] : memref<16x32xbf16, #tpu.memory_space<vmem>>, vector<16x32xbf16>
    %c0_1 = arith.constant 0 : index
    %c0_2 = arith.constant 0 : index
    %1 = vector.load %arg4[%c0_1, %c0_2] : memref<32x32xbf16, #tpu.memory_space<vmem>>, vector<32x32xbf16>
    %cst = arith.constant dense<0.000000e+00> : vector<16x32xf32>
    %2 = tpu.matmul %0, %1, %cst {dimension_numbers = #tpu.dot_dimension_numbers<[1], [0], [0], [1], [0, 0, 1, 1], [], []>} : vector<16x32xbf16>, vector<32x32xbf16>, vector<16x32xf32> -> vector<16x32xf32>
    %c0_3 = arith.constant 0 : index
    %c0_4 = arith.constant 0 : index
    %3 = vector.load %arg5[%c0_3, %c0_4] : memref<1x32xf32, #tpu.memory_space<vmem>>, vector<1x32xf32>
    %4 = vector.broadcast %3 : vector<1x32xf32> to vector<16x32xf32>
    %5 = arith.addf %2, %4 : vector<16x32xf32>
    %c0_5 = arith.constant 0 : index
    %c0_6 = arith.constant 0 : index
    %6 = vector.load %arg2[%c0_5, %c0_6] : memref<16x32xbf16, #tpu.memory_space<vmem>>, vector<16x32xbf16>
    %c0_7 = arith.constant 0 : index
    %c0_8 = arith.constant 0 : index
    %7 = vector.load %arg4[%c0_7, %c0_8] : memref<32x32xbf16, #tpu.memory_space<vmem>>, vector<32x32xbf16>
    %cst_9 = arith.constant dense<0.000000e+00> : vector<16x32xf32>
    %8 = tpu.matmul %6, %7, %cst_9 {dimension_numbers = #tpu.dot_dimension_numbers<[1], [0], [0], [1], [0, 0, 1, 1], [], []>} : vector<16x32xbf16>, vector<32x32xbf16>, vector<16x32xf32> -> vector<16x32xf32>
    %c0_10 = arith.constant 0 : index
    %c0_11 = arith.constant 0 : index
    %9 = vector.load %arg5[%c0_10, %c0_11] : memref<1x32xf32, #tpu.memory_space<vmem>>, vector<1x32xf32>
    %10 = vector.broadcast %9 : vector<1x32xf32> to vector<16x32xf32>
    %11 = arith.addf %8, %10 : vector<16x32xf32>
    %c0_12 = arith.constant 0 : index
    %c0_13 = arith.constant 0 : index
    %12 = vector.load %arg6[%c0_12, %c0_13] : memref<1x32xf32, #tpu.memory_space<vmem>>, vector<1x32xf32>
    %13 = vector.broadcast %12 : vector<1x32xf32> to vector<16x32xf32>
    %14 = arith.mulf %5, %13 : vector<16x32xf32>
    %c0_14 = arith.constant 0 : index
    %c0_15 = arith.constant 0 : index
    %15 = vector.load %arg7[%c0_14, %c0_15] : memref<1x32xf32, #tpu.memory_space<vmem>>, vector<1x32xf32>
    %16 = vector.broadcast %15 : vector<1x32xf32> to vector<16x32xf32>
    %17 = arith.mulf %11, %16 : vector<16x32xf32>
    %18 = arith.addf %14, %17 : vector<16x32xf32>
    %cst_16 = arith.constant dense<0.000000e+00> : vector<16xf32>
    %19 = vector.multi_reduction <add>, %18, %cst_16 [1] : vector<16x32xf32> to vector<16xf32>
    %20 = vector.shape_cast %19 : vector<16xf32> to vector<16x1xf32>
    %cst_17 = arith.constant 0.000000e+00 : f32
    %21 = vector.broadcast %cst_17 : f32 to vector<16x1xf32>
    %22 = arith.subf %21, %20 : vector<16x1xf32>
    %23 = math.exp %22 : vector<16x1xf32>
    %cst_18 = arith.constant 1.000000e+00 : f32
    %24 = vector.broadcast %cst_18 : f32 to vector<16x1xf32>
    %25 = arith.addf %24, %23 : vector<16x1xf32>
    %cst_19 = arith.constant 1.000000e+00 : f32
    %26 = vector.broadcast %cst_19 : f32 to vector<16x1xf32>
    %27 = arith.divf %26, %25 : vector<16x1xf32>
    %c0_20 = arith.constant 0 : index
    %c0_21 = arith.constant 0 : index
    %28 = vector.load %arg15[%c0_20, %c0_21] : memref<16x1xf32, #tpu.memory_space<vmem>>, vector<16x1xf32>
    tpu.vector_store %arg15[%c0_20, %c0_21], %27 {strides = array<i32>} : memref<16x1xf32, #tpu.memory_space<vmem>>, vector<16x1xf32>,
    %29 = vector.broadcast %27 : vector<16x1xf32> to vector<16x32xf32>
    %30 = arith.mulf %5, %29 : vector<16x32xf32>
    %cst_22 = arith.constant 1.000000e+00 : f32
    %31 = vector.broadcast %cst_22 : f32 to vector<16x1xf32>
    %32 = arith.subf %31, %27 : vector<16x1xf32>
    %33 = vector.broadcast %32 : vector<16x1xf32> to vector<16x32xf32>
    %34 = arith.mulf %11, %33 : vector<16x32xf32>
    %35 = arith.addf %30, %34 : vector<16x32xf32>
    %c0_23 = arith.constant 0 : index
    %c0_24 = arith.constant 0 : index
    %36 = vector.load %arg3[%c0_23, %c0_24] : memref<16x32xf32, #tpu.memory_space<vmem>>, vector<16x32xf32>
    %37 = arith.addf %35, %36 : vector<16x32xf32>
    %c0_25 = arith.constant 0 : index
    %c0_26 = arith.constant 0 : index
    %38 = vector.load %arg8[%c0_25, %c0_26] : memref<1x32xf32, #tpu.memory_space<vmem>>, vector<1x32xf32>
    %c0_27 = arith.constant 0 : index
    %c0_28 = arith.constant 0 : index
    %39 = vector.load %arg9[%c0_27, %c0_28] : memref<1x32xf32, #tpu.memory_space<vmem>>, vector<1x32xf32>
    %cst_29 = arith.constant dense<0.000000e+00> : vector<16xf32>
    %40 = vector.multi_reduction <add>, %37, %cst_29 [1] : vector<16x32xf32> to vector<16xf32>
    %41 = vector.shape_cast %40 : vector<16xf32> to vector<16x1xf32>
    %cst_30 = arith.constant 3.200000e+01 : f32
    %42 = vector.broadcast %cst_30 : f32 to vector<16x1xf32>
    %43 = arith.divf %41, %42 : vector<16x1xf32>
    %44 = vector.broadcast %43 : vector<16x1xf32> to vector<16x32xf32>
    %45 = arith.subf %37, %44 : vector<16x32xf32>
    %46 = arith.mulf %45, %45 : vector<16x32xf32>
    %cst_31 = arith.constant dense<0.000000e+00> : vector<16xf32>
    %47 = vector.multi_reduction <add>, %46, %cst_31 [1] : vector<16x32xf32> to vector<16xf32>
    %48 = vector.shape_cast %47 : vector<16xf32> to vector<16x1xf32>
    %cst_32 = arith.constant 3.200000e+01 : f32
    %49 = vector.broadcast %cst_32 : f32 to vector<16x1xf32>
    %50 = arith.divf %48, %49 : vector<16x1xf32>
    %51 = vector.broadcast %43 : vector<16x1xf32> to vector<16x32xf32>
    %52 = arith.subf %37, %51 : vector<16x32xf32>
    %cst_33 = arith.constant 9.99999997E-7 : f32
    %53 = vector.broadcast %cst_33 : f32 to vector<16x1xf32>
    %54 = arith.addf %50, %53 : vector<16x1xf32>
    %55 = math.rsqrt %54 : vector<16x1xf32>
    %56 = vector.broadcast %55 : vector<16x1xf32> to vector<16x32xf32>
    %57 = arith.mulf %52, %56 : vector<16x32xf32>
    %58 = vector.broadcast %38 : vector<1x32xf32> to vector<16x32xf32>
    %59 = arith.mulf %57, %58 : vector<16x32xf32>
    %60 = vector.broadcast %39 : vector<1x32xf32> to vector<16x32xf32>
    %61 = arith.addf %59, %60 : vector<16x32xf32>
    %62 = arith.truncf %61 : vector<16x32xf32> to vector<16x32xbf16>
    %c0_34 = arith.constant 0 : index
    %c0_35 = arith.constant 0 : index
    %63 = vector.load %arg10[%c0_34, %c0_35] : memref<32x64xbf16, #tpu.memory_space<vmem>>, vector<32x64xbf16>
    %cst_36 = arith.constant dense<0.000000e+00> : vector<16x64xf32>
    %64 = tpu.matmul %62, %63, %cst_36 {dimension_numbers = #tpu.dot_dimension_numbers<[1], [0], [0], [1], [0, 0, 1, 1], [], []>} : vector<16x32xbf16>, vector<32x64xbf16>, vector<16x64xf32> -> vector<16x64xf32>
    %c0_37 = arith.constant 0 : index
    %c0_38 = arith.constant 0 : index
    %65 = vector.load %arg11[%c0_37, %c0_38] : memref<1x64xf32, #tpu.memory_space<vmem>>, vector<1x64xf32>
    %66 = vector.broadcast %65 : vector<1x64xf32> to vector<16x64xf32>
    %67 = arith.addf %64, %66 : vector<16x64xf32>
    %cst_39 = arith.constant 0.000000e+00 : f32
    %68 = vector.broadcast %cst_39 : f32 to vector<16x64xf32>
    %69 = arith.maximumf %67, %68 : vector<16x64xf32>
    %70 = arith.truncf %69 : vector<16x64xf32> to vector<16x64xbf16>
    %c0_40 = arith.constant 0 : index
    %c0_41 = arith.constant 0 : index
    %71 = vector.load %arg12[%c0_40, %c0_41] : memref<64x32xbf16, #tpu.memory_space<vmem>>, vector<64x32xbf16>
    %cst_42 = arith.constant dense<0.000000e+00> : vector<16x32xf32>
    %72 = tpu.matmul %70, %71, %cst_42 {dimension_numbers = #tpu.dot_dimension_numbers<[1], [0], [0], [1], [0, 0, 1, 1], [], []>} : vector<16x64xbf16>, vector<64x32xbf16>, vector<16x32xf32> -> vector<16x32xf32>
    %c0_43 = arith.constant 0 : index
    %c0_44 = arith.constant 0 : index
    %73 = vector.load %arg13[%c0_43, %c0_44] : memref<1x32xf32, #tpu.memory_space<vmem>>, vector<1x32xf32>
    %74 = vector.broadcast %73 : vector<1x32xf32> to vector<16x32xf32>
    %75 = arith.addf %72, %74 : vector<16x32xf32>
    %76 = arith.addf %75, %37 : vector<16x32xf32>
    %c0_45 = arith.constant 0 : index
    %c0_46 = arith.constant 0 : index
    %77 = vector.load %arg14[%c0_45, %c0_46] : memref<16x32xf32, #tpu.memory_space<vmem>>, vector<16x32xf32>
    tpu.vector_store %arg14[%c0_45, %c0_46], %76 {strides = array<i32>} : memref<16x32xf32, #tpu.memory_space<vmem>>, vector<16x32xf32>,
    return
  }
  func.func @transform_0(%arg0: i32) -> (i32, i32) {
    %c0_i32 = arith.constant 0 : i32
    %c0_i32_0 = arith.constant 0 : i32
    return %arg0, %c0_i32 : i32, i32
  }
  func.func @transform_1(%arg0: i32) -> (i32, i32) {
    %c0_i32 = arith.constant 0 : i32
    %c0_i32_0 = arith.constant 0 : i32
    return %arg0, %c0_i32 : i32, i32
  }
  func.func @transform_2(%arg0: i32) -> (i32, i32) {
    %c0_i32 = arith.constant 0 : i32
    %c0_i32_0 = arith.constant 0 : i32
    return %arg0, %c0_i32 : i32, i32
  }
  func.func @transform_3(%arg0: i32) -> (i32, i32) {
    %c0_i32 = arith.constant 0 : i32
    %c0_i32_0 = arith.constant 0 : i32
    %c0_i32_1 = arith.constant 0 : i32
    return %c0_i32, %c0_i32_0 : i32, i32
  }
  func.func @transform_4(%arg0: i32) -> (i32, i32) {
    %c0_i32 = arith.constant 0 : i32
    %c0_i32_0 = arith.constant 0 : i32
    %c0_i32_1 = arith.constant 0 : i32
    return %c0_i32, %c0_i32_0 : i32, i32
  }
  func.func @transform_5(%arg0: i32) -> (i32, i32) {
    %c0_i32 = arith.constant 0 : i32
    %c0_i32_0 = arith.constant 0 : i32
    %c0_i32_1 = arith.constant 0 : i32
    return %c0_i32, %c0_i32_0 : i32, i32
  }
  func.func @transform_6(%arg0: i32) -> (i32, i32) {
    %c0_i32 = arith.constant 0 : i32
    %c0_i32_0 = arith.constant 0 : i32
    %c0_i32_1 = arith.constant 0 : i32
    return %c0_i32, %c0_i32_0 : i32, i32
  }
  func.func @transform_7(%arg0: i32) -> (i32, i32) {
    %c0_i32 = arith.constant 0 : i32
    %c0_i32_0 = arith.constant 0 : i32
    %c0_i32_1 = arith.constant 0 : i32
    return %c0_i32, %c0_i32_0 : i32, i32
  }
  func.func @transform_8(%arg0: i32) -> (i32, i32) {
    %c0_i32 = arith.constant 0 : i32
    %c0_i32_0 = arith.constant 0 : i32
    %c0_i32_1 = arith.constant 0 : i32
    return %c0_i32, %c0_i32_0 : i32, i32
  }
  func.func @transform_9(%arg0: i32) -> (i32, i32) {
    %c0_i32 = arith.constant 0 : i32
    %c0_i32_0 = arith.constant 0 : i32
    %c0_i32_1 = arith.constant 0 : i32
    return %c0_i32, %c0_i32_0 : i32, i32
  }
  func.func @transform_10(%arg0: i32) -> (i32, i32) {
    %c0_i32 = arith.constant 0 : i32
    %c0_i32_0 = arith.constant 0 : i32
    %c0_i32_1 = arith.constant 0 : i32
    return %c0_i32, %c0_i32_0 : i32, i32
  }
  func.func @transform_11(%arg0: i32) -> (i32, i32) {
    %c0_i32 = arith.constant 0 : i32
    %c0_i32_0 = arith.constant 0 : i32
    %c0_i32_1 = arith.constant 0 : i32
    return %c0_i32, %c0_i32_0 : i32, i32
  }
  func.func @transform_12(%arg0: i32) -> (i32, i32) {
    %c0_i32 = arith.constant 0 : i32
    %c0_i32_0 = arith.constant 0 : i32
    %c0_i32_1 = arith.constant 0 : i32
    return %c0_i32, %c0_i32_0 : i32, i32
  }
  func.func @transform_13(%arg0: i32) -> (i32, i32) {
    %c0_i32 = arith.constant 0 : i32
    %c0_i32_0 = arith.constant 0 : i32
    return %arg0, %c0_i32 : i32, i32
  }
  func.func @transform_14(%arg0: i32) -> (i32, i32) {
    %c0_i32 = arith.constant 0 : i32
    %c0_i32_0 = arith.constant 0 : i32
    return %arg0, %c0_i32 : i32, i32
  }
}

module attributes {stable_mosaic.version = 11 : i64} {
  func.func @_gate_ffn_kernel(%arg0: i32, %arg1: memref<16x32xbf16, #tpu.memory_space<vmem>>, %arg2: memref<16x32xbf16, #tpu.memory_space<vmem>>, %arg3: memref<16x32xf32, #tpu.memory_space<vmem>>, %arg4: memref<32x32xbf16, #tpu.memory_space<vmem>>, %arg5: memref<1x32xf32, #tpu.memory_space<vmem>>, %arg6: memref<1x32xf32, #tpu.memory_space<vmem>>, %arg7: memref<1x32xf32, #tpu.memory_space<vmem>>, %arg8: memref<1x32xf32, #tpu.memory_space<vmem>>, %arg9: memref<1x32xf32, #tpu.memory_space<vmem>>, %arg10: memref<32x64xbf16, #tpu.memory_space<vmem>>, %arg11: memref<1x64xf32, #tpu.memory_space<vmem>>, %arg12: memref<64x32xbf16, #tpu.memory_space<vmem>>, %arg13: memref<1x32xf32, #tpu.memory_space<vmem>>, %arg14: memref<16x32xf32, #tpu.memory_space<vmem>>, %arg15: memref<16x1xf32, #tpu.memory_space<vmem>>) attributes {dimension_semantics = [#tpu.dimension_semantics<parallel>], iteration_bounds = array<i64: 1>, scalar_prefetch = 0 : i64, scratch_operands = 0 : i64, tpu.core_type = #tpu.core_type<tc>, window_params = [{transform_indices = @transform_0, window_bounds = array<i64: 16, 32>}, {transform_indices = @transform_1, window_bounds = array<i64: 16, 32>}, {transform_indices = @transform_2, window_bounds = array<i64: 16, 32>}, {pipeline_mode = #tpu.pipeline_mode<synchronous>, transform_indices = @transform_3, window_bounds = array<i64: 32, 32>}, {pipeline_mode = #tpu.pipeline_mode<synchronous>, transform_indices = @transform_4, window_bounds = array<i64: 1, 32>}, {pipeline_mode = #tpu.pipeline_mode<synchronous>, transform_indices = @transform_5, window_bounds = array<i64: 1, 32>}, {pipeline_mode = #tpu.pipeline_mode<synchronous>, transform_indices = @transform_6, window_bounds = array<i64: 1, 32>}, {pipeline_mode = #tpu.pipeline_mode<synchronous>, transform_indices = @transform_7, window_bounds = array<i64: 1, 32>}, {pipeline_mode = #tpu.pipeline_mode<synchronous>, transform_indices = @transform_8, window_bounds = array<i64: 1, 32>}, {pipeline_mode = #tpu.pipeline_mode<synchronous>, transform_indices = @transform_9, window_bounds = array<i64: 32, 64>}, {pipeline_mode = #tpu.pipeline_mode<synchronous>, transform_indices = @transform_10, window_bounds = array<i64: 1, 64>}, {pipeline_mode = #tpu.pipeline_mode<synchronous>, transform_indices = @transform_11, window_bounds = array<i64: 64, 32>}, {pipeline_mode = #tpu.pipeline_mode<synchronous>, transform_indices = @transform_12, window_bounds = array<i64: 1, 32>}, {transform_indices = @transform_13, window_bounds = array<i64: 16, 32>}, {transform_indices = @transform_14, window_bounds = array<i64: 16, 1>}]} {
    %c0 = arith.constant 0 : index
    %c0_0 = arith.constant 0 : index
    %0 = vector.load %arg1[%c0, %c0_0] : memref<16x32xbf16, #tpu.memory_space<vmem>>, vector<16x32xbf16>
    %c0_1 = arith.constant 0 : index
    %c0_2 = arith.constant 0 : index
    %1 = vector.load %arg4[%c0_1, %c0_2] : memref<32x32xbf16, #tpu.memory_space<vmem>>, vector<32x32xbf16>
    %cst = arith.constant dense<0.000000e+00> : vector<16x32xf32>
    %2 = tpu.matmul %0, %1, %cst {dimension_numbers = #tpu.dot_dimension_numbers<[1], [0], [0], [1], [0, 0, 1, 1], [], []>} : vector<16x32xbf16>, vector<32x32xbf16>, vector<16x32xf32> -> vector<16x32xf32>
    %c0_3 = arith.constant 0 : index
    %c0_4 = arith.constant 0 : index
    %3 = vector.load %arg5[%c0_3, %c0_4] : memref<1x32xf32, #tpu.memory_space<vmem>>, vector<1x32xf32>
    %4 = vector.broadcast %3 : vector<1x32xf32> to vector<16x32xf32>
    %5 = arith.addf %2, %4 : vector<16x32xf32>
    %c0_5 = arith.constant 0 : index
    %c0_6 = arith.constant 0 : index
    %6 = vector.load %arg2[%c0_5, %c0_6] : memref<16x32xbf16, #tpu.memory_space<vmem>>, vector<16x32xbf16>
    %c0_7 = arith.constant 0 : index
    %c0_8 = arith.constant 0 : index
    %7 = vector.load %arg4[%c0_7, %c0_8] : memref<32x32xbf16, #tpu.memory_space<vmem>>, vector<32x32xbf16>
    %cst_9 = arith.constant dense<0.000000e+00> : vector<16x32xf32>
    %8 = tpu.matmul %6, %7, %cst_9 {dimension_numbers = #tpu.dot_dimension_numbers<[1], [0], [0], [1], [0, 0, 1, 1], [], []>} : vector<16x32xbf16>, vector<32x32xbf16>, vector<16x32xf32> -> vector<16x32xf32>
    %c0_10 = arith.constant 0 : index
    %c0_11 = arith.constant 0 : index
    %9 = vector.load %arg5[%c0_10, %c0_11] : memref<1x32xf32, #tpu.memory_space<vmem>>, vector<1x32xf32>
    %10 = vector.broadcast %9 : vector<1x32xf32> to vector<16x32xf32>
    %11 = arith.addf %8, %10 : vector<16x32xf32>
    %c0_12 = arith.constant 0 : index
    %c0_13 = arith.constant 0 : index
    %12 = vector.load %arg6[%c0_12, %c0_13] : memref<1x32xf32, #tpu.memory_space<vmem>>, vector<1x32xf32>
    %13 = vector.broadcast %12 : vector<1x32xf32> to vector<16x32xf32>
    %14 = arith.mulf %5, %13 : vector<16x32xf32>
    %c0_14 = arith.constant 0 : index
    %c0_15 = arith.constant 0 : index
    %15 = vector.load %arg7[%c0_14, %c0_15] : memref<1x32xf32, #tpu.memory_space<vmem>>, vector<1x32xf32>
    %16 = vector.broadcast %15 : vector<1x32xf32> to vector<16x32xf32>
    %17 = arith.mulf %11, %16 : vector<16x32xf32>
    %18 = arith.addf %14, %17 : vector<16x32xf32>
    %cst_16 = arith.constant dense<0.000000e+00> : vector<16xf32>
    %19 = vector.multi_reduction <add>, %18, %cst_16 [1] : vector<16x32xf32> to vector<16xf32>
    %20 = vector.shape_cast %19 : vector<16xf32> to vector<16x1xf32>
    %cst_17 = arith.constant 0.000000e+00 : f32
    %21 = vector.broadcast %cst_17 : f32 to vector<16x1xf32>
    %22 = arith.subf %21, %20 : vector<16x1xf32>
    %23 = math.exp %22 : vector<16x1xf32>
    %cst_18 = arith.constant 1.000000e+00 : f32
    %24 = vector.broadcast %cst_18 : f32 to vector<16x1xf32>
    %25 = arith.addf %24, %23 : vector<16x1xf32>
    %cst_19 = arith.constant 1.000000e+00 : f32
    %26 = vector.broadcast %cst_19 : f32 to vector<16x1xf32>
    %27 = arith.divf %26, %25 : vector<16x1xf32>
    %c0_20 = arith.constant 0 : index
    %c0_21 = arith.constant 0 : index
    %28 = vector.load %arg15[%c0_20, %c0_21] : memref<16x1xf32, #tpu.memory_space<vmem>>, vector<16x1xf32>
    tpu.vector_store %arg15[%c0_20, %c0_21], %27 {strides = array<i32>} : memref<16x1xf32, #tpu.memory_space<vmem>>, vector<16x1xf32>,
    %29 = vector.broadcast %27 : vector<16x1xf32> to vector<16x32xf32>
    %30 = arith.mulf %5, %29 : vector<16x32xf32>
    %cst_22 = arith.constant 1.000000e+00 : f32
    %31 = vector.broadcast %cst_22 : f32 to vector<16x1xf32>
    %32 = arith.subf %31, %27 : vector<16x1xf32>
    %33 = vector.broadcast %32 : vector<16x1xf32> to vector<16x32xf32>
    %34 = arith.mulf %11, %33 : vector<16x32xf32>
    %35 = arith.addf %30, %34 : vector<16x32xf32>
    %c0_23 = arith.constant 0 : index
    %c0_24 = arith.constant 0 : index
    %36 = vector.load %arg3[%c0_23, %c0_24] : memref<16x32xf32, #tpu.memory_space<vmem>>, vector<16x32xf32>
    %37 = arith.addf %35, %36 : vector<16x32xf32>
    %c0_25 = arith.constant 0 : index
    %c0_26 = arith.constant 0 : index
    %38 = vector.load %arg8[%c0_25, %c0_26] : memref<1x32xf32, #tpu.memory_space<vmem>>, vector<1x32xf32>
    %c0_27 = arith.constant 0 : index
    %c0_28 = arith.constant 0 : index
    %39 = vector.load %arg9[%c0_27, %c0_28] : memref<1x32xf32, #tpu.memory_space<vmem>>, vector<1x32xf32>
    %cst_29 = arith.constant dense<0.000000e+00> : vector<16xf32>
    %40 = vector.multi_reduction <add>, %37, %cst_29 [1] : vector<16x32xf32> to vector<16xf32>
    %41 = vector.shape_cast %40 : vector<16xf32> to vector<16x1xf32>
    %cst_30 = arith.constant 3.200000e+01 : f32
    %42 = vector.broadcast %cst_30 : f32 to vector<16x1xf32>
    %43 = arith.divf %41, %42 : vector<16x1xf32>
    %44 = vector.broadcast %43 : vector<16x1xf32> to vector<16x32xf32>
    %45 = arith.subf %37, %44 : vector<16x32xf32>
    %46 = arith.mulf %45, %45 : vector<16x32xf32>
    %cst_31 = arith.constant dense<0.000000e+00> : vector<16xf32>
    %47 = vector.multi_reduction <add>, %46, %cst_31 [1] : vector<16x32xf32> to vector<16xf32>
    %48 = vector.shape_cast %47 : vector<16xf32> to vector<16x1xf32>
    %cst_32 = arith.constant 3.200000e+01 : f32
    %49 = vector.broadcast %cst_32 : f32 to vector<16x1xf32>
    %50 = arith.divf %48, %49 : vector<16x1xf32>
    %51 = vector.broadcast %43 : vector<16x1xf32> to vector<16x32xf32>
    %52 = arith.subf %37, %51 : vector<16x32xf32>
    %cst_33 = arith.constant 9.99999997E-7 : f32
    %53 = vector.broadcast %cst_33 : f32 to vector<16x1xf32>
    %54 = arith.addf %50, %53 : vector<16x1xf32>
    %55 = math.rsqrt %54 : vector<16x1xf32>
    %56 = vector.broadcast %55 : vector<16x1xf32> to vector<16x32xf32>
    %57 = arith.mulf %52, %56 : vector<16x32xf32>
    %58 = vector.broadcast %38 : vector<1x32xf32> to vector<16x32xf32>
    %59 = arith.mulf %57, %58 : vector<16x32xf32>
    %60 = vector.broadcast %39 : vector<1x32xf32> to vector<16x32xf32>
    %61 = arith.addf %59, %60 : vector<16x32xf32>
    %62 = arith.truncf %61 : vector<16x32xf32> to vector<16x32xbf16>
    %c0_34 = arith.constant 0 : index
    %c0_35 = arith.constant 0 : index
    %63 = vector.load %arg10[%c0_34, %c0_35] : memref<32x64xbf16, #tpu.memory_space<vmem>>, vector<32x64xbf16>
    %cst_36 = arith.constant dense<0.000000e+00> : vector<16x64xf32>
    %64 = tpu.matmul %62, %63, %cst_36 {dimension_numbers = #tpu.dot_dimension_numbers<[1], [0], [0], [1], [0, 0, 1, 1], [], []>} : vector<16x32xbf16>, vector<32x64xbf16>, vector<16x64xf32> -> vector<16x64xf32>
    %c0_37 = arith.constant 0 : index
    %c0_38 = arith.constant 0 : index
    %65 = vector.load %arg11[%c0_37, %c0_38] : memref<1x64xf32, #tpu.memory_space<vmem>>, vector<1x64xf32>
    %66 = vector.broadcast %65 : vector<1x64xf32> to vector<16x64xf32>
    %67 = arith.addf %64, %66 : vector<16x64xf32>
    %cst_39 = arith.constant 0.000000e+00 : f32
    %68 = vector.broadcast %cst_39 : f32 to vector<16x64xf32>
    %69 = arith.maximumf %67, %68 : vector<16x64xf32>
    %70 = arith.truncf %69 : vector<16x64xf32> to vector<16x64xbf16>
    %c0_40 = arith.constant 0 : index
    %c0_41 = arith.constant 0 : index
    %71 = vector.load %arg12[%c0_40, %c0_41] : memref<64x32xbf16, #tpu.memory_space<vmem>>, vector<64x32xbf16>
    %cst_42 = arith.constant dense<0.000000e+00> : vector<16x32xf32>
    %72 = tpu.matmul %70, %71, %cst_42 {dimension_numbers = #tpu.dot_dimension_numbers<[1], [0], [0], [1], [0, 0, 1, 1], [], []>} : vector<16x64xbf16>, vector<64x32xbf16>, vector<16x32xf32> -> vector<16x32xf32>
    %c0_43 = arith.constant 0 : index
    %c0_44 = arith.constant 0 : index
    %73 = vector.load %arg13[%c0_43, %c0_44] : memref<1x32xf32, #tpu.memory_space<vmem>>, vector<1x32xf32>
    %74 = vector.broadcast %73 : vector<1x32xf32> to vector<16x32xf32>
    %75 = arith.addf %72, %74 : vector<16x32xf32>
    %76 = arith.addf %75, %37 : vector<16x32xf32>
    %c0_45 = arith.constant 0 : index
    %c0_46 = arith.constant 0 : index
    %77 = vector.load %arg14[%c0_45, %c0_46] : memref<16x32xf32, #tpu.memory_space<vmem>>, vector<16x32xf32>
    tpu.vector_store %arg14[%c0_45, %c0_46], %76 {strides = array<i32>} : memref<16x32xf32, #tpu.memory_space<vmem>>, vector<16x32xf32>,
    return
  }
  func.func @transform_0(%arg0: i32) -> (i32, i32) {
    %c0_i32 = arith.constant 0 : i32
    %c0_i32_0 = arith.constant 0 : i32
    return %arg0, %c0_i32 : i32, i32
  }
  func.func @transform_1(%arg0: i32) -> (i32, i32) {
    %c0_i32 = arith.constant 0 : i32
    %c0_i32_0 = arith.constant 0 : i32
    return %arg0, %c0_i32 : i32, i32
  }
  func.func @transform_2(%arg0: i32) -> (i32, i32) {
    %c0_i32 = arith.constant 0 : i32
    %c0_i32_0 = arith.constant 0 : i32
    return %arg0, %c0_i32 : i32, i32
  }
  func.func @transform_3(%arg0: i32) -> (i32, i32) {
    %c0_i32 = arith.constant 0 : i32
    %c0_i32_0 = arith.constant 0 : i32
    %c0_i32_1 = arith.constant 0 : i32
    return %c0_i32, %c0_i32_0 : i32, i32
  }
  func.func @transform_4(%arg0: i32) -> (i32, i32) {
    %c0_i32 = arith.constant 0 : i32
    %c0_i32_0 = arith.constant 0 : i32
    %c0_i32_1 = arith.constant 0 : i32
    return %c0_i32, %c0_i32_0 : i32, i32
  }
  func.func @transform_5(%arg0: i32) -> (i32, i32) {
    %c0_i32 = arith.constant 0 : i32
    %c0_i32_0 = arith.constant 0 : i32
    %c0_i32_1 = arith.constant 0 : i32
    return %c0_i32, %c0_i32_0 : i32, i32
  }
  func.func @transform_6(%arg0: i32) -> (i32, i32) {
    %c0_i32 = arith.constant 0 : i32
    %c0_i32_0 = arith.constant 0 : i32
    %c0_i32_1 = arith.constant 0 : i32
    return %c0_i32, %c0_i32_0 : i32, i32
  }
  func.func @transform_7(%arg0: i32) -> (i32, i32) {
    %c0_i32 = arith.constant 0 : i32
    %c0_i32_0 = arith.constant 0 : i32
    %c0_i32_1 = arith.constant 0 : i32
    return %c0_i32, %c0_i32_0 : i32, i32
  }
  func.func @transform_8(%arg0: i32) -> (i32, i32) {
    %c0_i32 = arith.constant 0 : i32
    %c0_i32_0 = arith.constant 0 : i32
    %c0_i32_1 = arith.constant 0 : i32
    return %c0_i32, %c0_i32_0 : i32, i32
  }
  func.func @transform_9(%arg0: i32) -> (i32, i32) {
    %c0_i32 = arith.constant 0 : i32
    %c0_i32_0 = arith.constant 0 : i32
    %c0_i32_1 = arith.constant 0 : i32
    return %c0_i32, %c0_i32_0 : i32, i32
  }
  func.func @transform_10(%arg0: i32) -> (i32, i32) {
    %c0_i32 = arith.constant 0 : i32
    %c0_i32_0 = arith.constant 0 : i32
    %c0_i32_1 = arith.constant 0 : i32
    return %c0_i32, %c0_i32_0 : i32, i32
  }
  func.func @transform_11(%arg0: i32) -> (i32, i32) {
    %c0_i32 = arith.constant 0 : i32
    %c0_i32_0 = arith.constant 0 : i32
    %c0_i32_1 = arith.constant 0 : i32
    return %c0_i32, %c0_i32_0 : i32, i32
  }
  func.func @transform_12(%arg0: i32) -> (i32, i32) {
    %c0_i32 = arith.constant 0 : i32
    %c0_i32_0 = arith.constant 0 : i32
    %c0_i32_1 = arith.constant 0 : i32
    return %c0_i32, %c0_i32_0 : i32, i32
  }
  func.func @transform_13(%arg0: i32) -> (i32, i32) {
    %c0_i32 = arith.constant 0 : i32
    %c0_i32_0 = arith.constant 0 : i32
    return %arg0, %c0_i32 : i32, i32
  }
  func.func @transform_14(%arg0: i32) -> (i32, i32) {
    %c0_i32 = arith.constant 0 : i32
    %c0_i32_0 = arith.constant 0 : i32
    return %arg0, %c0_i32 : i32, i32
  }
}

module attributes {stable_mosaic.version = 11 : i64} {
  func.func @_cross_attn_kernel(%arg0: i32, %arg1: i32, %arg2: memref<1x8x32xbf16, #tpu.memory_space<vmem>>, %arg3: memref<1x16x32xbf16, #tpu.memory_space<vmem>>, %arg4: memref<1x16x32xbf16, #tpu.memory_space<vmem>>, %arg5: memref<1x1x16xi32, #tpu.memory_space<vmem>>, %arg6: memref<1x1x16xi32, #tpu.memory_space<vmem>>, %arg7: memref<1x8x16xi32, #tpu.memory_space<vmem>>, %arg8: memref<1x8x32xbf16, #tpu.memory_space<vmem>>, %arg9: memref<1x8x32xbf16, #tpu.memory_space<vmem>>, %arg10: memref<1x8x16xf32, #tpu.memory_space<vmem>>, %arg11: memref<1x8x16xf32, #tpu.memory_space<vmem>>) attributes {dimension_semantics = [#tpu.dimension_semantics<parallel>, #tpu.dimension_semantics<parallel>], iteration_bounds = array<i64: 2, 1>, scalar_prefetch = 0 : i64, scratch_operands = 0 : i64, tpu.core_type = #tpu.core_type<tc>, window_params = [{transform_indices = @transform_0, window_bounds = array<i64: 1, 8, 32>}, {transform_indices = @transform_1, window_bounds = array<i64: 1, 16, 32>}, {transform_indices = @transform_2, window_bounds = array<i64: 1, 16, 32>}, {transform_indices = @transform_3, window_bounds = array<i64: 1, 1, 16>}, {transform_indices = @transform_4, window_bounds = array<i64: 1, 1, 16>}, {transform_indices = @transform_5, window_bounds = array<i64: 1, 8, 16>}, {transform_indices = @transform_6, window_bounds = array<i64: 1, 8, 32>}, {transform_indices = @transform_7, window_bounds = array<i64: 1, 8, 32>}, {transform_indices = @transform_8, window_bounds = array<i64: 1, 8, 16>}, {transform_indices = @transform_9, window_bounds = array<i64: 1, 8, 16>}]} {
    %c0 = arith.constant 0 : index
    %c0_0 = arith.constant 0 : index
    %c0_1 = arith.constant 0 : index
    %0 = vector.load %arg2[%c0, %c0_0, %c0_1] : memref<1x8x32xbf16, #tpu.memory_space<vmem>>, vector<1x8x32xbf16>
    %1 = vector.shape_cast %0 : vector<1x8x32xbf16> to vector<8x32xbf16>
    %c0_2 = arith.constant 0 : index
    %c0_3 = arith.constant 0 : index
    %c0_4 = arith.constant 0 : index
    %2 = vector.load %arg3[%c0_2, %c0_3, %c0_4] : memref<1x16x32xbf16, #tpu.memory_space<vmem>>, vector<1x16x32xbf16>
    %3 = vector.shape_cast %2 : vector<1x16x32xbf16> to vector<16x32xbf16>
    %c0_5 = arith.constant 0 : index
    %c0_6 = arith.constant 0 : index
    %c0_7 = arith.constant 0 : index
    %4 = vector.load %arg4[%c0_5, %c0_6, %c0_7] : memref<1x16x32xbf16, #tpu.memory_space<vmem>>, vector<1x16x32xbf16>
    %5 = vector.shape_cast %4 : vector<1x16x32xbf16> to vector<16x32xbf16>
    %c0_8 = arith.constant 0 : index
    %c0_9 = arith.constant 0 : index
    %c0_10 = arith.constant 0 : index
    %6 = vector.load %arg5[%c0_8, %c0_9, %c0_10] : memref<1x1x16xi32, #tpu.memory_space<vmem>>, vector<1x1x16xi32>
    %7 = vector.shape_cast %6 : vector<1x1x16xi32> to vector<1x16xi32>
    %c0_i32 = arith.constant 0 : i32
    %8 = vector.broadcast %c0_i32 : i32 to vector<1x16xi32>
    %9 = arith.cmpi sgt, %7, %8 : vector<1x16xi32>
    %c0_11 = arith.constant 0 : index
    %c0_12 = arith.constant 0 : index
    %c0_13 = arith.constant 0 : index
    %10 = vector.load %arg6[%c0_11, %c0_12, %c0_13] : memref<1x1x16xi32, #tpu.memory_space<vmem>>, vector<1x1x16xi32>
    %11 = vector.shape_cast %10 : vector<1x1x16xi32> to vector<1x16xi32>
    %c1_i32 = arith.constant 1 : i32
    %12 = vector.broadcast %c1_i32 : i32 to vector<1x16xi32>
    %13 = arith.cmpi ne, %11, %12 : vector<1x16xi32>
    %14 = arith.ori %9, %13 : vector<1x16xi1>
    %c2_i32 = arith.constant 2 : i32
    %15 = vector.broadcast %c2_i32 : i32 to vector<1x16xi32>
    %16 = arith.cmpi ne, %11, %15 : vector<1x16xi32>
    %17 = arith.ori %9, %16 : vector<1x16xi1>
    %cst = arith.constant -9.99999984E+17 : f32
    %cst_14 = arith.constant 0.000000e+00 : f32
    %18 = vector.broadcast %cst : f32 to vector<1x16xf32>
    %19 = vector.broadcast %cst_14 : f32 to vector<1x16xf32>
    %20 = arith.select %14, %18, %19 : vector<1x16xi1>, vector<1x16xf32>
    %cst_15 = arith.constant -9.99999984E+17 : f32
    %cst_16 = arith.constant 0.000000e+00 : f32
    %21 = vector.broadcast %cst_15 : f32 to vector<1x16xf32>
    %22 = vector.broadcast %cst_16 : f32 to vector<1x16xf32>
    %23 = arith.select %17, %21, %22 : vector<1x16xi1>, vector<1x16xf32>
    %c0_17 = arith.constant 0 : index
    %c0_18 = arith.constant 0 : index
    %c0_19 = arith.constant 0 : index
    %24 = vector.load %arg7[%c0_17, %c0_18, %c0_19] : memref<1x8x16xi32, #tpu.memory_space<vmem>>, vector<1x8x16xi32>
    %25 = vector.shape_cast %24 : vector<1x8x16xi32> to vector<8x16xi32>
    %c0_i32_20 = arith.constant 0 : i32
    %26 = vector.broadcast %c0_i32_20 : i32 to vector<8x16xi32>
    %27 = arith.cmpi sgt, %25, %26 : vector<8x16xi32>
    %28 = vector.broadcast %14 : vector<1x16xi1> to vector<8x16xi1>
    %29 = arith.ori %27, %28 : vector<8x16xi1>
    %cst_21 = arith.constant 0.000000e+00 : f32
    %cst_22 = arith.constant 1.000000e+00 : f32
    %30 = vector.broadcast %cst_21 : f32 to vector<8x16xf32>
    %31 = vector.broadcast %cst_22 : f32 to vector<8x16xf32>
    %32 = arith.select %29, %30, %31 : vector<8x16xi1>, vector<8x16xf32>
    %33 = vector.broadcast %17 : vector<1x16xi1> to vector<8x16xi1>
    %34 = arith.ori %27, %33 : vector<8x16xi1>
    %cst_23 = arith.constant 0.000000e+00 : f32
    %cst_24 = arith.constant 1.000000e+00 : f32
    %35 = vector.broadcast %cst_23 : f32 to vector<8x16xf32>
    %36 = vector.broadcast %cst_24 : f32 to vector<8x16xf32>
    %37 = arith.select %34, %35, %36 : vector<8x16xi1>, vector<8x16xf32>
    %cst_25 = arith.constant 0.000000e+00 : f32
    %38 = vector.broadcast %cst_25 : f32 to vector<1x8x16xf32>
    %c0_26 = arith.constant 0 : index
    %c0_27 = arith.constant 0 : index
    %c0_28 = arith.constant 0 : index
    %39 = vector.load %arg10[%c0_26, %c0_27, %c0_28] : memref<1x8x16xf32, #tpu.memory_space<vmem>>, vector<1x8x16xf32>
    tpu.vector_store %arg10[%c0_26, %c0_27, %c0_28], %38 {strides = array<i32>} : memref<1x8x16xf32, #tpu.memory_space<vmem>>, vector<1x8x16xf32>,
    %cst_29 = arith.constant 0.000000e+00 : f32
    %40 = vector.broadcast %cst_29 : f32 to vector<1x8x16xf32>
    %c0_30 = arith.constant 0 : index
    %c0_31 = arith.constant 0 : index
    %c0_32 = arith.constant 0 : index
    %41 = vector.load %arg11[%c0_30, %c0_31, %c0_32] : memref<1x8x16xf32, #tpu.memory_space<vmem>>, vector<1x8x16xf32>
    tpu.vector_store %arg11[%c0_30, %c0_31, %c0_32], %40 {strides = array<i32>} : memref<1x8x16xf32, #tpu.memory_space<vmem>>, vector<1x8x16xf32>,
    %42 = vector.extract_strided_slice %1 {offsets = [0, 0], sizes = [8, 8], strides = [1, 1]} : vector<8x32xbf16> to vector<8x8xbf16>
    %43 = vector.extract_strided_slice %3 {offsets = [0, 0], sizes = [16, 8], strides = [1, 1]} : vector<16x32xbf16> to vector<16x8xbf16>
    %cst_33 = arith.constant dense<0.000000e+00> : vector<8x16xf32>
    %44 = tpu.matmul %42, %43, %cst_33 {dimension_numbers = #tpu.dot_dimension_numbers<[1], [1], [0], [0], [0, 0, 1, 0], [], []>} : vector<8x8xbf16>, vector<16x8xbf16>, vector<8x16xf32> -> vector<8x16xf32>
    %cst_34 = arith.constant 0.353553385 : f32
    %45 = vector.broadcast %cst_34 : f32 to vector<8x16xf32>
    %46 = arith.mulf %44, %45 : vector<8x16xf32>
    %47 = vector.broadcast %20 : vector<1x16xf32> to vector<8x16xf32>
    %48 = arith.addf %46, %47 : vector<8x16xf32>
    %cst_35 = arith.constant dense<0xFF800000> : vector<8xf32>
    %49 = vector.multi_reduction <maximumf>, %48, %cst_35 [1] : vector<8x16xf32> to vector<8xf32>
    %50 = vector.shape_cast %49 : vector<8xf32> to vector<8x1xf32>
    %51 = vector.broadcast %50 : vector<8x1xf32> to vector<8x16xf32>
    %52 = arith.subf %48, %51 : vector<8x16xf32>
    %53 = math.exp %52 : vector<8x16xf32>
    %cst_36 = arith.constant dense<0.000000e+00> : vector<8xf32>
    %54 = vector.multi_reduction <add>, %53, %cst_36 [1] : vector<8x16xf32> to vector<8xf32>
    %55 = vector.shape_cast %54 : vector<8xf32> to vector<8x1xf32>
    %56 = tpu.reciprocal %55 {approx = true} : vector<8x1xf32> -> vector<8x1xf32>
    %57 = vector.broadcast %56 : vector<8x1xf32> to vector<8x16xf32>
    %58 = arith.mulf %53, %57 : vector<8x16xf32>
    %59 = vector.broadcast %23 : vector<1x16xf32> to vector<8x16xf32>
    %60 = arith.addf %46, %59 : vector<8x16xf32>
    %cst_37 = arith.constant dense<0xFF800000> : vector<8xf32>
    %61 = vector.multi_reduction <maximumf>, %60, %cst_37 [1] : vector<8x16xf32> to vector<8xf32>
    %62 = vector.shape_cast %61 : vector<8xf32> to vector<8x1xf32>
    %63 = vector.broadcast %62 : vector<8x1xf32> to vector<8x16xf32>
    %64 = arith.subf %60, %63 : vector<8x16xf32>
    %65 = math.exp %64 : vector<8x16xf32>
    %cst_38 = arith.constant dense<0.000000e+00> : vector<8xf32>
    %66 = vector.multi_reduction <add>, %65, %cst_38 [1] : vector<8x16xf32> to vector<8xf32>
    %67 = vector.shape_cast %66 : vector<8xf32> to vector<8x1xf32>
    %68 = tpu.reciprocal %67 {approx = true} : vector<8x1xf32> -> vector<8x1xf32>
    %69 = vector.broadcast %68 : vector<8x1xf32> to vector<8x16xf32>
    %70 = arith.mulf %65, %69 : vector<8x16xf32>
    %71 = arith.truncf %58 : vector<8x16xf32> to vector<8x16xbf16>
    %72 = vector.extract_strided_slice %5 {offsets = [0, 0], sizes = [16, 8], strides = [1, 1]} : vector<16x32xbf16> to vector<16x8xbf16>
    %cst_39 = arith.constant dense<0.000000e+00> : vector<8x8xf32>
    %73 = tpu.matmul %71, %72, %cst_39 {dimension_numbers = #tpu.dot_dimension_numbers<[1], [0], [0], [1], [0, 0, 1, 1], [], []>} : vector<8x16xbf16>, vector<16x8xbf16>, vector<8x8xf32> -> vector<8x8xf32>
    %74 = arith.truncf %73 : vector<8x8xf32> to vector<8x8xbf16>
    %c0_40 = arith.constant 0 : index
    %c0_41 = arith.constant 0 : index
    %c0_42 = arith.constant 0 : index
    %75 = vector.load %arg8[%c0_40, %c0_41, %c0_42] : memref<1x8x32xbf16, #tpu.memory_space<vmem>>, vector<1x8x8xbf16>
    %76 = vector.shape_cast %75 : vector<1x8x8xbf16> to vector<8x8xbf16>
    %77 = vector.shape_cast %74 : vector<8x8xbf16> to vector<1x8x8xbf16>
    tpu.vector_store %arg8[%c0_40, %c0_41, %c0_42], %77 {strides = array<i32>} : memref<1x8x32xbf16, #tpu.memory_space<vmem>>, vector<1x8x8xbf16>,
    %78 = arith.truncf %70 : vector<8x16xf32> to vector<8x16xbf16>
    %79 = vector.extract_strided_slice %5 {offsets = [0, 0], sizes = [16, 8], strides = [1, 1]} : vector<16x32xbf16> to vector<16x8xbf16>
    %cst_43 = arith.constant dense<0.000000e+00> : vector<8x8xf32>
    %80 = tpu.matmul %78, %79, %cst_43 {dimension_numbers = #tpu.dot_dimension_numbers<[1], [0], [0], [1], [0, 0, 1, 1], [], []>} : vector<8x16xbf16>, vector<16x8xbf16>, vector<8x8xf32> -> vector<8x8xf32>
    %81 = arith.truncf %80 : vector<8x8xf32> to vector<8x8xbf16>
    %c0_44 = arith.constant 0 : index
    %c0_45 = arith.constant 0 : index
    %c0_46 = arith.constant 0 : index
    %82 = vector.load %arg9[%c0_44, %c0_45, %c0_46] : memref<1x8x32xbf16, #tpu.memory_space<vmem>>, vector<1x8x8xbf16>
    %83 = vector.shape_cast %82 : vector<1x8x8xbf16> to vector<8x8xbf16>
    %84 = vector.shape_cast %81 : vector<8x8xbf16> to vector<1x8x8xbf16>
    tpu.vector_store %arg9[%c0_44, %c0_45, %c0_46], %84 {strides = array<i32>} : memref<1x8x32xbf16, #tpu.memory_space<vmem>>, vector<1x8x8xbf16>,
    %85 = arith.mulf %58, %32 : vector<8x16xf32>
    %86 = arith.mulf %70, %37 : vector<8x16xf32>
    %c0_47 = arith.constant 0 : index
    %c0_48 = arith.constant 0 : index
    %c0_49 = arith.constant 0 : index
    %87 = vector.load %arg10[%c0_47, %c0_48, %c0_49] : memref<1x8x16xf32, #tpu.memory_space<vmem>>, vector<1x8x16xf32>
    %88 = vector.shape_cast %87 : vector<1x8x16xf32> to vector<8x16xf32>
    %cst_50 = arith.constant 2.500000e-01 : f32
    %89 = vector.broadcast %cst_50 : f32 to vector<8x16xf32>
    %90 = arith.mulf %89, %85 : vector<8x16xf32>
    %cst_51 = arith.constant dense<0.000000e+00> : vector<8xf32>
    %91 = vector.multi_reduction <add>, %85, %cst_51 [1] : vector<8x16xf32> to vector<8xf32>
    %92 = vector.shape_cast %91 : vector<8xf32> to vector<8x1xf32>
    %cst_52 = arith.constant 9.99999968E-21 : f32
    %93 = vector.broadcast %cst_52 : f32 to vector<8x1xf32>
    %94 = arith.maximumf %92, %93 : vector<8x1xf32>
    %95 = tpu.reciprocal %94 {approx = true} : vector<8x1xf32> -> vector<8x1xf32>
    %96 = vector.broadcast %95 : vector<8x1xf32> to vector<8x16xf32>
    %97 = arith.mulf %90, %96 : vector<8x16xf32>
    %98 = arith.addf %88, %97 : vector<8x16xf32>
    %c0_53 = arith.constant 0 : index
    %c0_54 = arith.constant 0 : index
    %c0_55 = arith.constant 0 : index
    %99 = vector.load %arg10[%c0_53, %c0_54, %c0_55] : memref<1x8x16xf32, #tpu.memory_space<vmem>>, vector<1x8x16xf32>
    %100 = vector.shape_cast %99 : vector<1x8x16xf32> to vector<8x16xf32>
    %101 = vector.shape_cast %98 : vector<8x16xf32> to vector<1x8x16xf32>
    tpu.vector_store %arg10[%c0_53, %c0_54, %c0_55], %101 {strides = array<i32>} : memref<1x8x16xf32, #tpu.memory_space<vmem>>, vector<1x8x16xf32>,
    %c0_56 = arith.constant 0 : index
    %c0_57 = arith.constant 0 : index
    %c0_58 = arith.constant 0 : index
    %102 = vector.load %arg11[%c0_56, %c0_57, %c0_58] : memref<1x8x16xf32, #tpu.memory_space<vmem>>, vector<1x8x16xf32>
    %103 = vector.shape_cast %102 : vector<1x8x16xf32> to vector<8x16xf32>
    %cst_59 = arith.constant 2.500000e-01 : f32
    %104 = vector.broadcast %cst_59 : f32 to vector<8x16xf32>
    %105 = arith.mulf %104, %86 : vector<8x16xf32>
    %cst_60 = arith.constant dense<0.000000e+00> : vector<8xf32>
    %106 = vector.multi_reduction <add>, %86, %cst_60 [1] : vector<8x16xf32> to vector<8xf32>
    %107 = vector.shape_cast %106 : vector<8xf32> to vector<8x1xf32>
    %cst_61 = arith.constant 9.99999968E-21 : f32
    %108 = vector.broadcast %cst_61 : f32 to vector<8x1xf32>
    %109 = arith.maximumf %107, %108 : vector<8x1xf32>
    %110 = tpu.reciprocal %109 {approx = true} : vector<8x1xf32> -> vector<8x1xf32>
    %111 = vector.broadcast %110 : vector<8x1xf32> to vector<8x16xf32>
    %112 = arith.mulf %105, %111 : vector<8x16xf32>
    %113 = arith.addf %103, %112 : vector<8x16xf32>
    %c0_62 = arith.constant 0 : index
    %c0_63 = arith.constant 0 : index
    %c0_64 = arith.constant 0 : index
    %114 = vector.load %arg11[%c0_62, %c0_63, %c0_64] : memref<1x8x16xf32, #tpu.memory_space<vmem>>, vector<1x8x16xf32>
    %115 = vector.shape_cast %114 : vector<1x8x16xf32> to vector<8x16xf32>
    %116 = vector.shape_cast %113 : vector<8x16xf32> to vector<1x8x16xf32>
    tpu.vector_store %arg11[%c0_62, %c0_63, %c0_64], %116 {strides = array<i32>} : memref<1x8x16xf32, #tpu.memory_space<vmem>>, vector<1x8x16xf32>,
    %117 = vector.extract_strided_slice %1 {offsets = [0, 8], sizes = [8, 8], strides = [1, 1]} : vector<8x32xbf16> to vector<8x8xbf16>
    %118 = vector.extract_strided_slice %3 {offsets = [0, 8], sizes = [16, 8], strides = [1, 1]} : vector<16x32xbf16> to vector<16x8xbf16>
    %cst_65 = arith.constant dense<0.000000e+00> : vector<8x16xf32>
    %119 = tpu.matmul %117, %118, %cst_65 {dimension_numbers = #tpu.dot_dimension_numbers<[1], [1], [0], [0], [0, 0, 1, 0], [], []>} : vector<8x8xbf16>, vector<16x8xbf16>, vector<8x16xf32> -> vector<8x16xf32>
    %cst_66 = arith.constant 0.353553385 : f32
    %120 = vector.broadcast %cst_66 : f32 to vector<8x16xf32>
    %121 = arith.mulf %119, %120 : vector<8x16xf32>
    %122 = vector.broadcast %20 : vector<1x16xf32> to vector<8x16xf32>
    %123 = arith.addf %121, %122 : vector<8x16xf32>
    %cst_67 = arith.constant dense<0xFF800000> : vector<8xf32>
    %124 = vector.multi_reduction <maximumf>, %123, %cst_67 [1] : vector<8x16xf32> to vector<8xf32>
    %125 = vector.shape_cast %124 : vector<8xf32> to vector<8x1xf32>
    %126 = vector.broadcast %125 : vector<8x1xf32> to vector<8x16xf32>
    %127 = arith.subf %123, %126 : vector<8x16xf32>
    %128 = math.exp %127 : vector<8x16xf32>
    %cst_68 = arith.constant dense<0.000000e+00> : vector<8xf32>
    %129 = vector.multi_reduction <add>, %128, %cst_68 [1] : vector<8x16xf32> to vector<8xf32>
    %130 = vector.shape_cast %129 : vector<8xf32> to vector<8x1xf32>
    %131 = tpu.reciprocal %130 {approx = true} : vector<8x1xf32> -> vector<8x1xf32>
    %132 = vector.broadcast %131 : vector<8x1xf32> to vector<8x16xf32>
    %133 = arith.mulf %128, %132 : vector<8x16xf32>
    %134 = vector.broadcast %23 : vector<1x16xf32> to vector<8x16xf32>
    %135 = arith.addf %121, %134 : vector<8x16xf32>
    %cst_69 = arith.constant dense<0xFF800000> : vector<8xf32>
    %136 = vector.multi_reduction <maximumf>, %135, %cst_69 [1] : vector<8x16xf32> to vector<8xf32>
    %137 = vector.shape_cast %136 : vector<8xf32> to vector<8x1xf32>
    %138 = vector.broadcast %137 : vector<8x1xf32> to vector<8x16xf32>
    %139 = arith.subf %135, %138 : vector<8x16xf32>
    %140 = math.exp %139 : vector<8x16xf32>
    %cst_70 = arith.constant dense<0.000000e+00> : vector<8xf32>
    %141 = vector.multi_reduction <add>, %140, %cst_70 [1] : vector<8x16xf32> to vector<8xf32>
    %142 = vector.shape_cast %141 : vector<8xf32> to vector<8x1xf32>
    %143 = tpu.reciprocal %142 {approx = true} : vector<8x1xf32> -> vector<8x1xf32>
    %144 = vector.broadcast %143 : vector<8x1xf32> to vector<8x16xf32>
    %145 = arith.mulf %140, %144 : vector<8x16xf32>
    %146 = arith.truncf %133 : vector<8x16xf32> to vector<8x16xbf16>
    %147 = vector.extract_strided_slice %5 {offsets = [0, 8], sizes = [16, 8], strides = [1, 1]} : vector<16x32xbf16> to vector<16x8xbf16>
    %cst_71 = arith.constant dense<0.000000e+00> : vector<8x8xf32>
    %148 = tpu.matmul %146, %147, %cst_71 {dimension_numbers = #tpu.dot_dimension_numbers<[1], [0], [0], [1], [0, 0, 1, 1], [], []>} : vector<8x16xbf16>, vector<16x8xbf16>, vector<8x8xf32> -> vector<8x8xf32>
    %149 = arith.truncf %148 : vector<8x8xf32> to vector<8x8xbf16>
    %c0_72 = arith.constant 0 : index
    %c0_73 = arith.constant 0 : index
    %c8 = arith.constant 8 : index
    %150 = vector.load %arg8[%c0_72, %c0_73, %c8] : memref<1x8x32xbf16, #tpu.memory_space<vmem>>, vector<1x8x8xbf16>
    %151 = vector.shape_cast %150 : vector<1x8x8xbf16> to vector<8x8xbf16>
    %152 = vector.shape_cast %149 : vector<8x8xbf16> to vector<1x8x8xbf16>
    tpu.vector_store %arg8[%c0_72, %c0_73, %c8], %152 {strides = array<i32>} : memref<1x8x32xbf16, #tpu.memory_space<vmem>>, vector<1x8x8xbf16>,
    %153 = arith.truncf %145 : vector<8x16xf32> to vector<8x16xbf16>
    %154 = vector.extract_strided_slice %5 {offsets = [0, 8], sizes = [16, 8], strides = [1, 1]} : vector<16x32xbf16> to vector<16x8xbf16>
    %cst_74 = arith.constant dense<0.000000e+00> : vector<8x8xf32>
    %155 = tpu.matmul %153, %154, %cst_74 {dimension_numbers = #tpu.dot_dimension_numbers<[1], [0], [0], [1], [0, 0, 1, 1], [], []>} : vector<8x16xbf16>, vector<16x8xbf16>, vector<8x8xf32> -> vector<8x8xf32>
    %156 = arith.truncf %155 : vector<8x8xf32> to vector<8x8xbf16>
    %c0_75 = arith.constant 0 : index
    %c0_76 = arith.constant 0 : index
    %c8_77 = arith.constant 8 : index
    %157 = vector.load %arg9[%c0_75, %c0_76, %c8_77] : memref<1x8x32xbf16, #tpu.memory_space<vmem>>, vector<1x8x8xbf16>
    %158 = vector.shape_cast %157 : vector<1x8x8xbf16> to vector<8x8xbf16>
    %159 = vector.shape_cast %156 : vector<8x8xbf16> to vector<1x8x8xbf16>
    tpu.vector_store %arg9[%c0_75, %c0_76, %c8_77], %159 {strides = array<i32>} : memref<1x8x32xbf16, #tpu.memory_space<vmem>>, vector<1x8x8xbf16>,
    %160 = arith.mulf %133, %32 : vector<8x16xf32>
    %161 = arith.mulf %145, %37 : vector<8x16xf32>
    %c0_78 = arith.constant 0 : index
    %c0_79 = arith.constant 0 : index
    %c0_80 = arith.constant 0 : index
    %162 = vector.load %arg10[%c0_78, %c0_79, %c0_80] : memref<1x8x16xf32, #tpu.memory_space<vmem>>, vector<1x8x16xf32>
    %163 = vector.shape_cast %162 : vector<1x8x16xf32> to vector<8x16xf32>
    %cst_81 = arith.constant 2.500000e-01 : f32
    %164 = vector.broadcast %cst_81 : f32 to vector<8x16xf32>
    %165 = arith.mulf %164, %160 : vector<8x16xf32>
    %cst_82 = arith.constant dense<0.000000e+00> : vector<8xf32>
    %166 = vector.multi_reduction <add>, %160, %cst_82 [1] : vector<8x16xf32> to vector<8xf32>
    %167 = vector.shape_cast %166 : vector<8xf32> to vector<8x1xf32>
    %cst_83 = arith.constant 9.99999968E-21 : f32
    %168 = vector.broadcast %cst_83 : f32 to vector<8x1xf32>
    %169 = arith.maximumf %167, %168 : vector<8x1xf32>
    %170 = tpu.reciprocal %169 {approx = true} : vector<8x1xf32> -> vector<8x1xf32>
    %171 = vector.broadcast %170 : vector<8x1xf32> to vector<8x16xf32>
    %172 = arith.mulf %165, %171 : vector<8x16xf32>
    %173 = arith.addf %163, %172 : vector<8x16xf32>
    %c0_84 = arith.constant 0 : index
    %c0_85 = arith.constant 0 : index
    %c0_86 = arith.constant 0 : index
    %174 = vector.load %arg10[%c0_84, %c0_85, %c0_86] : memref<1x8x16xf32, #tpu.memory_space<vmem>>, vector<1x8x16xf32>
    %175 = vector.shape_cast %174 : vector<1x8x16xf32> to vector<8x16xf32>
    %176 = vector.shape_cast %173 : vector<8x16xf32> to vector<1x8x16xf32>
    tpu.vector_store %arg10[%c0_84, %c0_85, %c0_86], %176 {strides = array<i32>} : memref<1x8x16xf32, #tpu.memory_space<vmem>>, vector<1x8x16xf32>,
    %c0_87 = arith.constant 0 : index
    %c0_88 = arith.constant 0 : index
    %c0_89 = arith.constant 0 : index
    %177 = vector.load %arg11[%c0_87, %c0_88, %c0_89] : memref<1x8x16xf32, #tpu.memory_space<vmem>>, vector<1x8x16xf32>
    %178 = vector.shape_cast %177 : vector<1x8x16xf32> to vector<8x16xf32>
    %cst_90 = arith.constant 2.500000e-01 : f32
    %179 = vector.broadcast %cst_90 : f32 to vector<8x16xf32>
    %180 = arith.mulf %179, %161 : vector<8x16xf32>
    %cst_91 = arith.constant dense<0.000000e+00> : vector<8xf32>
    %181 = vector.multi_reduction <add>, %161, %cst_91 [1] : vector<8x16xf32> to vector<8xf32>
    %182 = vector.shape_cast %181 : vector<8xf32> to vector<8x1xf32>
    %cst_92 = arith.constant 9.99999968E-21 : f32
    %183 = vector.broadcast %cst_92 : f32 to vector<8x1xf32>
    %184 = arith.maximumf %182, %183 : vector<8x1xf32>
    %185 = tpu.reciprocal %184 {approx = true} : vector<8x1xf32> -> vector<8x1xf32>
    %186 = vector.broadcast %185 : vector<8x1xf32> to vector<8x16xf32>
    %187 = arith.mulf %180, %186 : vector<8x16xf32>
    %188 = arith.addf %178, %187 : vector<8x16xf32>
    %c0_93 = arith.constant 0 : index
    %c0_94 = arith.constant 0 : index
    %c0_95 = arith.constant 0 : index
    %189 = vector.load %arg11[%c0_93, %c0_94, %c0_95] : memref<1x8x16xf32, #tpu.memory_space<vmem>>, vector<1x8x16xf32>
    %190 = vector.shape_cast %189 : vector<1x8x16xf32> to vector<8x16xf32>
    %191 = vector.shape_cast %188 : vector<8x16xf32> to vector<1x8x16xf32>
    tpu.vector_store %arg11[%c0_93, %c0_94, %c0_95], %191 {strides = array<i32>} : memref<1x8x16xf32, #tpu.memory_space<vmem>>, vector<1x8x16xf32>,
    %192 = vector.extract_strided_slice %1 {offsets = [0, 16], sizes = [8, 8], strides = [1, 1]} : vector<8x32xbf16> to vector<8x8xbf16>
    %193 = vector.extract_strided_slice %3 {offsets = [0, 16], sizes = [16, 8], strides = [1, 1]} : vector<16x32xbf16> to vector<16x8xbf16>
    %cst_96 = arith.constant dense<0.000000e+00> : vector<8x16xf32>
    %194 = tpu.matmul %192, %193, %cst_96 {dimension_numbers = #tpu.dot_dimension_numbers<[1], [1], [0], [0], [0, 0, 1, 0], [], []>} : vector<8x8xbf16>, vector<16x8xbf16>, vector<8x16xf32> -> vector<8x16xf32>
    %cst_97 = arith.constant 0.353553385 : f32
    %195 = vector.broadcast %cst_97 : f32 to vector<8x16xf32>
    %196 = arith.mulf %194, %195 : vector<8x16xf32>
    %197 = vector.broadcast %20 : vector<1x16xf32> to vector<8x16xf32>
    %198 = arith.addf %196, %197 : vector<8x16xf32>
    %cst_98 = arith.constant dense<0xFF800000> : vector<8xf32>
    %199 = vector.multi_reduction <maximumf>, %198, %cst_98 [1] : vector<8x16xf32> to vector<8xf32>
    %200 = vector.shape_cast %199 : vector<8xf32> to vector<8x1xf32>
    %201 = vector.broadcast %200 : vector<8x1xf32> to vector<8x16xf32>
    %202 = arith.subf %198, %201 : vector<8x16xf32>
    %203 = math.exp %202 : vector<8x16xf32>
    %cst_99 = arith.constant dense<0.000000e+00> : vector<8xf32>
    %204 = vector.multi_reduction <add>, %203, %cst_99 [1] : vector<8x16xf32> to vector<8xf32>
    %205 = vector.shape_cast %204 : vector<8xf32> to vector<8x1xf32>
    %206 = tpu.reciprocal %205 {approx = true} : vector<8x1xf32> -> vector<8x1xf32>
    %207 = vector.broadcast %206 : vector<8x1xf32> to vector<8x16xf32>
    %208 = arith.mulf %203, %207 : vector<8x16xf32>
    %209 = vector.broadcast %23 : vector<1x16xf32> to vector<8x16xf32>
    %210 = arith.addf %196, %209 : vector<8x16xf32>
    %cst_100 = arith.constant dense<0xFF800000> : vector<8xf32>
    %211 = vector.multi_reduction <maximumf>, %210, %cst_100 [1] : vector<8x16xf32> to vector<8xf32>
    %212 = vector.shape_cast %211 : vector<8xf32> to vector<8x1xf32>
    %213 = vector.broadcast %212 : vector<8x1xf32> to vector<8x16xf32>
    %214 = arith.subf %210, %213 : vector<8x16xf32>
    %215 = math.exp %214 : vector<8x16xf32>
    %cst_101 = arith.constant dense<0.000000e+00> : vector<8xf32>
    %216 = vector.multi_reduction <add>, %215, %cst_101 [1] : vector<8x16xf32> to vector<8xf32>
    %217 = vector.shape_cast %216 : vector<8xf32> to vector<8x1xf32>
    %218 = tpu.reciprocal %217 {approx = true} : vector<8x1xf32> -> vector<8x1xf32>
    %219 = vector.broadcast %218 : vector<8x1xf32> to vector<8x16xf32>
    %220 = arith.mulf %215, %219 : vector<8x16xf32>
    %221 = arith.truncf %208 : vector<8x16xf32> to vector<8x16xbf16>
    %222 = vector.extract_strided_slice %5 {offsets = [0, 16], sizes = [16, 8], strides = [1, 1]} : vector<16x32xbf16> to vector<16x8xbf16>
    %cst_102 = arith.constant dense<0.000000e+00> : vector<8x8xf32>
    %223 = tpu.matmul %221, %222, %cst_102 {dimension_numbers = #tpu.dot_dimension_numbers<[1], [0], [0], [1], [0, 0, 1, 1], [], []>} : vector<8x16xbf16>, vector<16x8xbf16>, vector<8x8xf32> -> vector<8x8xf32>
    %224 = arith.truncf %223 : vector<8x8xf32> to vector<8x8xbf16>
    %c0_103 = arith.constant 0 : index
    %c0_104 = arith.constant 0 : index
    %c16 = arith.constant 16 : index
    %225 = vector.load %arg8[%c0_103, %c0_104, %c16] : memref<1x8x32xbf16, #tpu.memory_space<vmem>>, vector<1x8x8xbf16>
    %226 = vector.shape_cast %225 : vector<1x8x8xbf16> to vector<8x8xbf16>
    %227 = vector.shape_cast %224 : vector<8x8xbf16> to vector<1x8x8xbf16>
    tpu.vector_store %arg8[%c0_103, %c0_104, %c16], %227 {strides = array<i32>} : memref<1x8x32xbf16, #tpu.memory_space<vmem>>, vector<1x8x8xbf16>,
    %228 = arith.truncf %220 : vector<8x16xf32> to vector<8x16xbf16>
    %229 = vector.extract_strided_slice %5 {offsets = [0, 16], sizes = [16, 8], strides = [1, 1]} : vector<16x32xbf16> to vector<16x8xbf16>
    %cst_105 = arith.constant dense<0.000000e+00> : vector<8x8xf32>
    %230 = tpu.matmul %228, %229, %cst_105 {dimension_numbers = #tpu.dot_dimension_numbers<[1], [0], [0], [1], [0, 0, 1, 1], [], []>} : vector<8x16xbf16>, vector<16x8xbf16>, vector<8x8xf32> -> vector<8x8xf32>
    %231 = arith.truncf %230 : vector<8x8xf32> to vector<8x8xbf16>
    %c0_106 = arith.constant 0 : index
    %c0_107 = arith.constant 0 : index
    %c16_108 = arith.constant 16 : index
    %232 = vector.load %arg9[%c0_106, %c0_107, %c16_108] : memref<1x8x32xbf16, #tpu.memory_space<vmem>>, vector<1x8x8xbf16>
    %233 = vector.shape_cast %232 : vector<1x8x8xbf16> to vector<8x8xbf16>
    %234 = vector.shape_cast %231 : vector<8x8xbf16> to vector<1x8x8xbf16>
    tpu.vector_store %arg9[%c0_106, %c0_107, %c16_108], %234 {strides = array<i32>} : memref<1x8x32xbf16, #tpu.memory_space<vmem>>, vector<1x8x8xbf16>,
    %235 = arith.mulf %208, %32 : vector<8x16xf32>
    %236 = arith.mulf %220, %37 : vector<8x16xf32>
    %c0_109 = arith.constant 0 : index
    %c0_110 = arith.constant 0 : index
    %c0_111 = arith.constant 0 : index
    %237 = vector.load %arg10[%c0_109, %c0_110, %c0_111] : memref<1x8x16xf32, #tpu.memory_space<vmem>>, vector<1x8x16xf32>
    %238 = vector.shape_cast %237 : vector<1x8x16xf32> to vector<8x16xf32>
    %cst_112 = arith.constant 2.500000e-01 : f32
    %239 = vector.broadcast %cst_112 : f32 to vector<8x16xf32>
    %240 = arith.mulf %239, %235 : vector<8x16xf32>
    %cst_113 = arith.constant dense<0.000000e+00> : vector<8xf32>
    %241 = vector.multi_reduction <add>, %235, %cst_113 [1] : vector<8x16xf32> to vector<8xf32>
    %242 = vector.shape_cast %241 : vector<8xf32> to vector<8x1xf32>
    %cst_114 = arith.constant 9.99999968E-21 : f32
    %243 = vector.broadcast %cst_114 : f32 to vector<8x1xf32>
    %244 = arith.maximumf %242, %243 : vector<8x1xf32>
    %245 = tpu.reciprocal %244 {approx = true} : vector<8x1xf32> -> vector<8x1xf32>
    %246 = vector.broadcast %245 : vector<8x1xf32> to vector<8x16xf32>
    %247 = arith.mulf %240, %246 : vector<8x16xf32>
    %248 = arith.addf %238, %247 : vector<8x16xf32>
    %c0_115 = arith.constant 0 : index
    %c0_116 = arith.constant 0 : index
    %c0_117 = arith.constant 0 : index
    %249 = vector.load %arg10[%c0_115, %c0_116, %c0_117] : memref<1x8x16xf32, #tpu.memory_space<vmem>>, vector<1x8x16xf32>
    %250 = vector.shape_cast %249 : vector<1x8x16xf32> to vector<8x16xf32>
    %251 = vector.shape_cast %248 : vector<8x16xf32> to vector<1x8x16xf32>
    tpu.vector_store %arg10[%c0_115, %c0_116, %c0_117], %251 {strides = array<i32>} : memref<1x8x16xf32, #tpu.memory_space<vmem>>, vector<1x8x16xf32>,
    %c0_118 = arith.constant 0 : index
    %c0_119 = arith.constant 0 : index
    %c0_120 = arith.constant 0 : index
    %252 = vector.load %arg11[%c0_118, %c0_119, %c0_120] : memref<1x8x16xf32, #tpu.memory_space<vmem>>, vector<1x8x16xf32>
    %253 = vector.shape_cast %252 : vector<1x8x16xf32> to vector<8x16xf32>
    %cst_121 = arith.constant 2.500000e-01 : f32
    %254 = vector.broadcast %cst_121 : f32 to vector<8x16xf32>
    %255 = arith.mulf %254, %236 : vector<8x16xf32>
    %cst_122 = arith.constant dense<0.000000e+00> : vector<8xf32>
    %256 = vector.multi_reduction <add>, %236, %cst_122 [1] : vector<8x16xf32> to vector<8xf32>
    %257 = vector.shape_cast %256 : vector<8xf32> to vector<8x1xf32>
    %cst_123 = arith.constant 9.99999968E-21 : f32
    %258 = vector.broadcast %cst_123 : f32 to vector<8x1xf32>
    %259 = arith.maximumf %257, %258 : vector<8x1xf32>
    %260 = tpu.reciprocal %259 {approx = true} : vector<8x1xf32> -> vector<8x1xf32>
    %261 = vector.broadcast %260 : vector<8x1xf32> to vector<8x16xf32>
    %262 = arith.mulf %255, %261 : vector<8x16xf32>
    %263 = arith.addf %253, %262 : vector<8x16xf32>
    %c0_124 = arith.constant 0 : index
    %c0_125 = arith.constant 0 : index
    %c0_126 = arith.constant 0 : index
    %264 = vector.load %arg11[%c0_124, %c0_125, %c0_126] : memref<1x8x16xf32, #tpu.memory_space<vmem>>, vector<1x8x16xf32>
    %265 = vector.shape_cast %264 : vector<1x8x16xf32> to vector<8x16xf32>
    %266 = vector.shape_cast %263 : vector<8x16xf32> to vector<1x8x16xf32>
    tpu.vector_store %arg11[%c0_124, %c0_125, %c0_126], %266 {strides = array<i32>} : memref<1x8x16xf32, #tpu.memory_space<vmem>>, vector<1x8x16xf32>,
    %267 = vector.extract_strided_slice %1 {offsets = [0, 24], sizes = [8, 8], strides = [1, 1]} : vector<8x32xbf16> to vector<8x8xbf16>
    %268 = vector.extract_strided_slice %3 {offsets = [0, 24], sizes = [16, 8], strides = [1, 1]} : vector<16x32xbf16> to vector<16x8xbf16>
    %cst_127 = arith.constant dense<0.000000e+00> : vector<8x16xf32>
    %269 = tpu.matmul %267, %268, %cst_127 {dimension_numbers = #tpu.dot_dimension_numbers<[1], [1], [0], [0], [0, 0, 1, 0], [], []>} : vector<8x8xbf16>, vector<16x8xbf16>, vector<8x16xf32> -> vector<8x16xf32>
    %cst_128 = arith.constant 0.353553385 : f32
    %270 = vector.broadcast %cst_128 : f32 to vector<8x16xf32>
    %271 = arith.mulf %269, %270 : vector<8x16xf32>
    %272 = vector.broadcast %20 : vector<1x16xf32> to vector<8x16xf32>
    %273 = arith.addf %271, %272 : vector<8x16xf32>
    %cst_129 = arith.constant dense<0xFF800000> : vector<8xf32>
    %274 = vector.multi_reduction <maximumf>, %273, %cst_129 [1] : vector<8x16xf32> to vector<8xf32>
    %275 = vector.shape_cast %274 : vector<8xf32> to vector<8x1xf32>
    %276 = vector.broadcast %275 : vector<8x1xf32> to vector<8x16xf32>
    %277 = arith.subf %273, %276 : vector<8x16xf32>
    %278 = math.exp %277 : vector<8x16xf32>
    %cst_130 = arith.constant dense<0.000000e+00> : vector<8xf32>
    %279 = vector.multi_reduction <add>, %278, %cst_130 [1] : vector<8x16xf32> to vector<8xf32>
    %280 = vector.shape_cast %279 : vector<8xf32> to vector<8x1xf32>
    %281 = tpu.reciprocal %280 {approx = true} : vector<8x1xf32> -> vector<8x1xf32>
    %282 = vector.broadcast %281 : vector<8x1xf32> to vector<8x16xf32>
    %283 = arith.mulf %278, %282 : vector<8x16xf32>
    %284 = vector.broadcast %23 : vector<1x16xf32> to vector<8x16xf32>
    %285 = arith.addf %271, %284 : vector<8x16xf32>
    %cst_131 = arith.constant dense<0xFF800000> : vector<8xf32>
    %286 = vector.multi_reduction <maximumf>, %285, %cst_131 [1] : vector<8x16xf32> to vector<8xf32>
    %287 = vector.shape_cast %286 : vector<8xf32> to vector<8x1xf32>
    %288 = vector.broadcast %287 : vector<8x1xf32> to vector<8x16xf32>
    %289 = arith.subf %285, %288 : vector<8x16xf32>
    %290 = math.exp %289 : vector<8x16xf32>
    %cst_132 = arith.constant dense<0.000000e+00> : vector<8xf32>
    %291 = vector.multi_reduction <add>, %290, %cst_132 [1] : vector<8x16xf32> to vector<8xf32>
    %292 = vector.shape_cast %291 : vector<8xf32> to vector<8x1xf32>
    %293 = tpu.reciprocal %292 {approx = true} : vector<8x1xf32> -> vector<8x1xf32>
    %294 = vector.broadcast %293 : vector<8x1xf32> to vector<8x16xf32>
    %295 = arith.mulf %290, %294 : vector<8x16xf32>
    %296 = arith.truncf %283 : vector<8x16xf32> to vector<8x16xbf16>
    %297 = vector.extract_strided_slice %5 {offsets = [0, 24], sizes = [16, 8], strides = [1, 1]} : vector<16x32xbf16> to vector<16x8xbf16>
    %cst_133 = arith.constant dense<0.000000e+00> : vector<8x8xf32>
    %298 = tpu.matmul %296, %297, %cst_133 {dimension_numbers = #tpu.dot_dimension_numbers<[1], [0], [0], [1], [0, 0, 1, 1], [], []>} : vector<8x16xbf16>, vector<16x8xbf16>, vector<8x8xf32> -> vector<8x8xf32>
    %299 = arith.truncf %298 : vector<8x8xf32> to vector<8x8xbf16>
    %c0_134 = arith.constant 0 : index
    %c0_135 = arith.constant 0 : index
    %c24 = arith.constant 24 : index
    %300 = vector.load %arg8[%c0_134, %c0_135, %c24] : memref<1x8x32xbf16, #tpu.memory_space<vmem>>, vector<1x8x8xbf16>
    %301 = vector.shape_cast %300 : vector<1x8x8xbf16> to vector<8x8xbf16>
    %302 = vector.shape_cast %299 : vector<8x8xbf16> to vector<1x8x8xbf16>
    tpu.vector_store %arg8[%c0_134, %c0_135, %c24], %302 {strides = array<i32>} : memref<1x8x32xbf16, #tpu.memory_space<vmem>>, vector<1x8x8xbf16>,
    %303 = arith.truncf %295 : vector<8x16xf32> to vector<8x16xbf16>
    %304 = vector.extract_strided_slice %5 {offsets = [0, 24], sizes = [16, 8], strides = [1, 1]} : vector<16x32xbf16> to vector<16x8xbf16>
    %cst_136 = arith.constant dense<0.000000e+00> : vector<8x8xf32>
    %305 = tpu.matmul %303, %304, %cst_136 {dimension_numbers = #tpu.dot_dimension_numbers<[1], [0], [0], [1], [0, 0, 1, 1], [], []>} : vector<8x16xbf16>, vector<16x8xbf16>, vector<8x8xf32> -> vector<8x8xf32>
    %306 = arith.truncf %305 : vector<8x8xf32> to vector<8x8xbf16>
    %c0_137 = arith.constant 0 : index
    %c0_138 = arith.constant 0 : index
    %c24_139 = arith.constant 24 : index
    %307 = vector.load %arg9[%c0_137, %c0_138, %c24_139] : memref<1x8x32xbf16, #tpu.memory_space<vmem>>, vector<1x8x8xbf16>
    %308 = vector.shape_cast %307 : vector<1x8x8xbf16> to vector<8x8xbf16>
    %309 = vector.shape_cast %306 : vector<8x8xbf16> to vector<1x8x8xbf16>
    tpu.vector_store %arg9[%c0_137, %c0_138, %c24_139], %309 {strides = array<i32>} : memref<1x8x32xbf16, #tpu.memory_space<vmem>>, vector<1x8x8xbf16>,
    %310 = arith.mulf %283, %32 : vector<8x16xf32>
    %311 = arith.mulf %295, %37 : vector<8x16xf32>
    %c0_140 = arith.constant 0 : index
    %c0_141 = arith.constant 0 : index
    %c0_142 = arith.constant 0 : index
    %312 = vector.load %arg10[%c0_140, %c0_141, %c0_142] : memref<1x8x16xf32, #tpu.memory_space<vmem>>, vector<1x8x16xf32>
    %313 = vector.shape_cast %312 : vector<1x8x16xf32> to vector<8x16xf32>
    %cst_143 = arith.constant 2.500000e-01 : f32
    %314 = vector.broadcast %cst_143 : f32 to vector<8x16xf32>
    %315 = arith.mulf %314, %310 : vector<8x16xf32>
    %cst_144 = arith.constant dense<0.000000e+00> : vector<8xf32>
    %316 = vector.multi_reduction <add>, %310, %cst_144 [1] : vector<8x16xf32> to vector<8xf32>
    %317 = vector.shape_cast %316 : vector<8xf32> to vector<8x1xf32>
    %cst_145 = arith.constant 9.99999968E-21 : f32
    %318 = vector.broadcast %cst_145 : f32 to vector<8x1xf32>
    %319 = arith.maximumf %317, %318 : vector<8x1xf32>
    %320 = tpu.reciprocal %319 {approx = true} : vector<8x1xf32> -> vector<8x1xf32>
    %321 = vector.broadcast %320 : vector<8x1xf32> to vector<8x16xf32>
    %322 = arith.mulf %315, %321 : vector<8x16xf32>
    %323 = arith.addf %313, %322 : vector<8x16xf32>
    %c0_146 = arith.constant 0 : index
    %c0_147 = arith.constant 0 : index
    %c0_148 = arith.constant 0 : index
    %324 = vector.load %arg10[%c0_146, %c0_147, %c0_148] : memref<1x8x16xf32, #tpu.memory_space<vmem>>, vector<1x8x16xf32>
    %325 = vector.shape_cast %324 : vector<1x8x16xf32> to vector<8x16xf32>
    %326 = vector.shape_cast %323 : vector<8x16xf32> to vector<1x8x16xf32>
    tpu.vector_store %arg10[%c0_146, %c0_147, %c0_148], %326 {strides = array<i32>} : memref<1x8x16xf32, #tpu.memory_space<vmem>>, vector<1x8x16xf32>,
    %c0_149 = arith.constant 0 : index
    %c0_150 = arith.constant 0 : index
    %c0_151 = arith.constant 0 : index
    %327 = vector.load %arg11[%c0_149, %c0_150, %c0_151] : memref<1x8x16xf32, #tpu.memory_space<vmem>>, vector<1x8x16xf32>
    %328 = vector.shape_cast %327 : vector<1x8x16xf32> to vector<8x16xf32>
    %cst_152 = arith.constant 2.500000e-01 : f32
    %329 = vector.broadcast %cst_152 : f32 to vector<8x16xf32>
    %330 = arith.mulf %329, %311 : vector<8x16xf32>
    %cst_153 = arith.constant dense<0.000000e+00> : vector<8xf32>
    %331 = vector.multi_reduction <add>, %311, %cst_153 [1] : vector<8x16xf32> to vector<8xf32>
    %332 = vector.shape_cast %331 : vector<8xf32> to vector<8x1xf32>
    %cst_154 = arith.constant 9.99999968E-21 : f32
    %333 = vector.broadcast %cst_154 : f32 to vector<8x1xf32>
    %334 = arith.maximumf %332, %333 : vector<8x1xf32>
    %335 = tpu.reciprocal %334 {approx = true} : vector<8x1xf32> -> vector<8x1xf32>
    %336 = vector.broadcast %335 : vector<8x1xf32> to vector<8x16xf32>
    %337 = arith.mulf %330, %336 : vector<8x16xf32>
    %338 = arith.addf %328, %337 : vector<8x16xf32>
    %c0_155 = arith.constant 0 : index
    %c0_156 = arith.constant 0 : index
    %c0_157 = arith.constant 0 : index
    %339 = vector.load %arg11[%c0_155, %c0_156, %c0_157] : memref<1x8x16xf32, #tpu.memory_space<vmem>>, vector<1x8x16xf32>
    %340 = vector.shape_cast %339 : vector<1x8x16xf32> to vector<8x16xf32>
    %341 = vector.shape_cast %338 : vector<8x16xf32> to vector<1x8x16xf32>
    tpu.vector_store %arg11[%c0_155, %c0_156, %c0_157], %341 {strides = array<i32>} : memref<1x8x16xf32, #tpu.memory_space<vmem>>, vector<1x8x16xf32>,
    return
  }
  func.func @transform_0(%arg0: i32, %arg1: i32) -> (i32, i32, i32) {
    %c0_i32 = arith.constant 0 : i32
    %c0_i32_0 = arith.constant 0 : i32
    return %arg0, %arg1, %c0_i32 : i32, i32, i32
  }
  func.func @transform_1(%arg0: i32, %arg1: i32) -> (i32, i32, i32) {
    %c0_i32 = arith.constant 0 : i32
    %c0_i32_0 = arith.constant 0 : i32
    %c0_i32_1 = arith.constant 0 : i32
    return %arg0, %c0_i32, %c0_i32_0 : i32, i32, i32
  }
  func.func @transform_2(%arg0: i32, %arg1: i32) -> (i32, i32, i32) {
    %c0_i32 = arith.constant 0 : i32
    %c0_i32_0 = arith.constant 0 : i32
    %c0_i32_1 = arith.constant 0 : i32
    return %arg0, %c0_i32, %c0_i32_0 : i32, i32, i32
  }
  func.func @transform_3(%arg0: i32, %arg1: i32) -> (i32, i32, i32) {
    %c0_i32 = arith.constant 0 : i32
    %c0_i32_0 = arith.constant 0 : i32
    %c0_i32_1 = arith.constant 0 : i32
    return %arg0, %c0_i32, %c0_i32_0 : i32, i32, i32
  }
  func.func @transform_4(%arg0: i32, %arg1: i32) -> (i32, i32, i32) {
    %c0_i32 = arith.constant 0 : i32
    %c0_i32_0 = arith.constant 0 : i32
    %c0_i32_1 = arith.constant 0 : i32
    return %arg0, %c0_i32, %c0_i32_0 : i32, i32, i32
  }
  func.func @transform_5(%arg0: i32, %arg1: i32) -> (i32, i32, i32) {
    %c0_i32 = arith.constant 0 : i32
    %c0_i32_0 = arith.constant 0 : i32
    return %arg0, %arg1, %c0_i32 : i32, i32, i32
  }
  func.func @transform_6(%arg0: i32, %arg1: i32) -> (i32, i32, i32) {
    %c0_i32 = arith.constant 0 : i32
    %c0_i32_0 = arith.constant 0 : i32
    return %arg0, %arg1, %c0_i32 : i32, i32, i32
  }
  func.func @transform_7(%arg0: i32, %arg1: i32) -> (i32, i32, i32) {
    %c0_i32 = arith.constant 0 : i32
    %c0_i32_0 = arith.constant 0 : i32
    return %arg0, %arg1, %c0_i32 : i32, i32, i32
  }
  func.func @transform_8(%arg0: i32, %arg1: i32) -> (i32, i32, i32) {
    %c0_i32 = arith.constant 0 : i32
    %c0_i32_0 = arith.constant 0 : i32
    return %arg0, %arg1, %c0_i32 : i32, i32, i32
  }
  func.func @transform_9(%arg0: i32, %arg1: i32) -> (i32, i32, i32) {
    %c0_i32 = arith.constant 0 : i32
    %c0_i32_0 = arith.constant 0 : i32
    return %arg0, %arg1, %c0_i32 : i32, i32, i32
  }
}

module attributes {stable_mosaic.version = 11 : i64} {
  func.func @_layernorm_kernel(%arg0: i32, %arg1: memref<16x32xf32, #tpu.memory_space<vmem>>, %arg2: memref<1x32xf32, #tpu.memory_space<vmem>>, %arg3: memref<1x32xf32, #tpu.memory_space<vmem>>, %arg4: memref<16x32xf32, #tpu.memory_space<vmem>>) attributes {dimension_semantics = [#tpu.dimension_semantics<parallel>], iteration_bounds = array<i64: 1>, scalar_prefetch = 0 : i64, scratch_operands = 0 : i64, tpu.core_type = #tpu.core_type<tc>, window_params = [{transform_indices = @transform_0, window_bounds = array<i64: 16, 32>}, {pipeline_mode = #tpu.pipeline_mode<synchronous>, transform_indices = @transform_1, window_bounds = array<i64: 1, 32>}, {pipeline_mode = #tpu.pipeline_mode<synchronous>, transform_indices = @transform_2, window_bounds = array<i64: 1, 32>}, {transform_indices = @transform_3, window_bounds = array<i64: 16, 32>}]} {
    %c0 = arith.constant 0 : index
    %c0_0 = arith.constant 0 : index
    %0 = vector.load %arg1[%c0, %c0_0] : memref<16x32xf32, #tpu.memory_space<vmem>>, vector<16x32xf32>
    %c0_1 = arith.constant 0 : index
    %c0_2 = arith.constant 0 : index
    %1 = vector.load %arg2[%c0_1, %c0_2] : memref<1x32xf32, #tpu.memory_space<vmem>>, vector<1x32xf32>
    %c0_3 = arith.constant 0 : index
    %c0_4 = arith.constant 0 : index
    %2 = vector.load %arg3[%c0_3, %c0_4] : memref<1x32xf32, #tpu.memory_space<vmem>>, vector<1x32xf32>
    %cst = arith.constant dense<0.000000e+00> : vector<16xf32>
    %3 = vector.multi_reduction <add>, %0, %cst [1] : vector<16x32xf32> to vector<16xf32>
    %4 = vector.shape_cast %3 : vector<16xf32> to vector<16x1xf32>
    %cst_5 = arith.constant 3.200000e+01 : f32
    %5 = vector.broadcast %cst_5 : f32 to vector<16x1xf32>
    %6 = arith.divf %4, %5 : vector<16x1xf32>
    %7 = vector.broadcast %6 : vector<16x1xf32> to vector<16x32xf32>
    %8 = arith.subf %0, %7 : vector<16x32xf32>
    %9 = arith.mulf %8, %8 : vector<16x32xf32>
    %cst_6 = arith.constant dense<0.000000e+00> : vector<16xf32>
    %10 = vector.multi_reduction <add>, %9, %cst_6 [1] : vector<16x32xf32> to vector<16xf32>
    %11 = vector.shape_cast %10 : vector<16xf32> to vector<16x1xf32>
    %cst_7 = arith.constant 3.200000e+01 : f32
    %12 = vector.broadcast %cst_7 : f32 to vector<16x1xf32>
    %13 = arith.divf %11, %12 : vector<16x1xf32>
    %14 = vector.broadcast %6 : vector<16x1xf32> to vector<16x32xf32>
    %15 = arith.subf %0, %14 : vector<16x32xf32>
    %cst_8 = arith.constant 9.99999997E-7 : f32
    %16 = vector.broadcast %cst_8 : f32 to vector<16x1xf32>
    %17 = arith.addf %13, %16 : vector<16x1xf32>
    %18 = math.rsqrt %17 : vector<16x1xf32>
    %19 = vector.broadcast %18 : vector<16x1xf32> to vector<16x32xf32>
    %20 = arith.mulf %15, %19 : vector<16x32xf32>
    %21 = vector.broadcast %1 : vector<1x32xf32> to vector<16x32xf32>
    %22 = arith.mulf %20, %21 : vector<16x32xf32>
    %23 = vector.broadcast %2 : vector<1x32xf32> to vector<16x32xf32>
    %24 = arith.addf %22, %23 : vector<16x32xf32>
    %c0_9 = arith.constant 0 : index
    %c0_10 = arith.constant 0 : index
    %25 = vector.load %arg4[%c0_9, %c0_10] : memref<16x32xf32, #tpu.memory_space<vmem>>, vector<16x32xf32>
    tpu.vector_store %arg4[%c0_9, %c0_10], %24 {strides = array<i32>} : memref<16x32xf32, #tpu.memory_space<vmem>>, vector<16x32xf32>,
    return
  }
  func.func @transform_0(%arg0: i32) -> (i32, i32) {
    %c0_i32 = arith.constant 0 : i32
    %c0_i32_0 = arith.constant 0 : i32
    return %arg0, %c0_i32 : i32, i32
  }
  func.func @transform_1(%arg0: i32) -> (i32, i32) {
    %c0_i32 = arith.constant 0 : i32
    %c0_i32_0 = arith.constant 0 : i32
    %c0_i32_1 = arith.constant 0 : i32
    return %c0_i32, %c0_i32_0 : i32, i32
  }
  func.func @transform_2(%arg0: i32) -> (i32, i32) {
    %c0_i32 = arith.constant 0 : i32
    %c0_i32_0 = arith.constant 0 : i32
    %c0_i32_1 = arith.constant 0 : i32
    return %c0_i32, %c0_i32_0 : i32, i32
  }
  func.func @transform_3(%arg0: i32) -> (i32, i32) {
    %c0_i32 = arith.constant 0 : i32
    %c0_i32_0 = arith.constant 0 : i32
    return %arg0, %c0_i32 : i32, i32
  }
}

</mosaic_0001>

<bundles_post_ra>
// kernel: tpu_custom_call.1
= control target key start
LH: loop header
LB: loop body
LE: loop exit
PB: predicated region body
PF: predicated region fallthrough
CT: control target
= control target key end

     0   :  { %6 = vsyncpa [#allocation3], 0  ;;  %s125_s0 = inlined_call_operand.hbm [shape: f32[8,128], index: 0, kind: input, shape index: {}]   ;;  %s126_s1 = inlined_call_operand.hbm [shape: f32[8,128], index: 1, kind: output, shape index: {}]  }
   0x1   :  { %7 = vsyncpa [#allocation4], 0  ;;  %s89_s6 = smov [#allocation2]   ;;  %s41_s10 = scalar_lea.hbm %s125_s0, 128 }
   0x2   :  { %s14_s7 = sshll.u32 %s89_s6, 4  ;;  %p42_p0 = scmp.ne.s32.totalorder %s125_s0, %s41_s10  ;;  %s15_s7 = int_to_ptr.vmem [resolvable:$true] %s14_s7 }
   0x3   :  { %p45_p1 = scmp.lt.u32.totalorder %s41_s10, %s125_s0 }
   0x5   :  { %p47_p2 = pnand %p45_p1, %p42_p0 }
   0x7   :  { %50 = shalt.err (!%p47_p2)
}
   0x8   :  { %s51_s15 = scalar_lea.vmem %s15_s7, 128  ;;  %p56_p4 = scmp.lt.s32.totalorder %s15_s7, %s15_s7 }
   0x9   :  { %p52_p3 = scmp.ne.s32.totalorder %s15_s7, %s51_s15  ;;  %p57_p5 = scmp.lt.s32.totalorder %s51_s15, %s51_s15 }
   0xb   :  { %p58_p6 = por %p57_p5, %p56_p4 }
   0xd   :  { %p59_p7 = pnand %p58_p6, %p52_p3 }
   0xf   :  { %62 = shalt.err (!%p59_p7)
}
  0x10   :  { %17 = dma.hbm_to_vmem [thread:$0]  %s125_s0, 128, %s15_s7, [#allocation3]  }
  0x11   :  { %85 = dma.done.wait [#allocation3], 128  }
  0x12   :  { %86 = vsyncadd [#allocation3], 4294967168  ;;  %s90_s18 = smov [#allocation5]   ;;  %v21_v0 = vld [vmem:[#allocation2] sm:$0xff] }
  0x13   :  { %s30_s19 = sshll.u32 %s90_s18, 4  ;;  %v22_v1 = vadd.f32 1.0, %v21_v0  ;;  %s31_s19 = int_to_ptr.vmem [resolvable:$true] %s30_s19 }
  0x14   :  { %s63_s20 = scalar_lea.vmem %s31_s19, 128  ;;  %p68_p9 = scmp.lt.s32.totalorder %s31_s19, %s31_s19 }
  0x15   :  { %23 = vst [vmem:[#allocation5] sm:$0xff] %v22_v1  ;;  %p64_p8 = scmp.ne.s32.totalorder %s31_s19, %s63_s20  ;;  %p69_p10 = scmp.lt.s32.totalorder %s63_s20, %s63_s20 }
  0x17   :  { %p70_p11 = por %p69_p10, %p68_p9 }
  0x19   :  { %p71_p12 = pnand %p70_p11, %p64_p8 }
  0x1b   :  { %74 = shalt.err (!%p71_p12)
}
  0x1c   :  { %s75_s23 = scalar_lea.hbm %s126_s1, 128 }
  0x1d   :  { %p76_p13 = scmp.ne.s32.totalorder %s126_s1, %s75_s23  ;;  %p79_p0 = scmp.lt.u32.totalorder %s75_s23, %s126_s1 }
  0x1f   :  { %p81_p1 = pnand %p79_p0, %p76_p13 }
  0x21   :  { %84 = shalt.err (!%p81_p1)
}
  0x22   :  { %33 = dma.vmem_to_hbm [thread:$0]  %s31_s19, 128, %s126_s1, [#allocation4]  }
  0x23   :  { %87 = dma.done.wait [#allocation4], 128  }
  0x24   :  { %88 = vsyncadd [#allocation4], 4294967168 }
  0x25   :  { %37 = vsyncpa [#allocation3], 1 }
  0x26   :  { %38 = vsyncpa [#allocation4], 1 }

// kernel: transformer_decoder_forward.14
= control target key start
LH: loop header
LB: loop body
LE: loop exit
PB: predicated region body
PF: predicated region fallthrough
CT: control target
= control target key end

     0   :  { %vm29_vm0 = vcmask 261120   ;;  %v228_v15 = vmov 0.0   ;;  %vm229_vm1 = vmmov 0   ;;  %vm81_vm2 = vcmask 257024   ;;  %s231_s21 = smov 96   ;;  %s335_s0 = inlined_call_operand.vmem [shape: f32[16,32], index: 0, kind: input, shape index: {}]   ;;  %s336_s3 = inlined_call_operand.vmem [shape: bf16[32,96], index: 3, kind: input, shape index: {}]   ;;  %s337_s1 = inlined_call_operand.vmem [shape: f32[1,32], index: 1, kind: input, shape index: {}]   ;;  %s338_s2 = inlined_call_operand.vmem [shape: f32[1,32], index: 2, kind: input, shape index: {}]   ;;  %s339_s5 = inlined_call_operand.vmem [shape: bf16[16,32], index: 5, kind: output, shape index: {0}]   ;;  %s340_s4 = inlined_call_operand.vmem [shape: f32[1,96], index: 4, kind: input, shape index: {}]   ;;  %s341_s6 = inlined_call_operand.vmem [shape: bf16[16,32], index: 6, kind: output, shape index: {1}]   ;;  %s342_s8 = inlined_call_operand.vmem [shape: bf16[16,32], index: 8, kind: output, shape index: {3}]   ;;  %s343_s7 = inlined_call_operand.vmem [shape: bf16[16,32], index: 7, kind: output, shape index: {2}]  }
   0x1   :  { %v25_v0 = vld [vmem:[%s335_s0] sm:$0xff]  ;;  %v26_v1 = vld [vmem:[%s335_s0 + $0x8] sm:$0xff]  ;;  %210 = vmatprep.subr.bf16.mxu0 %v228_v15  ;;  %214 = vmatprep.mubr.msk.bf16.mxu0 %vm229_vm1, %v228_v15 }
   0x2   :  { %v30_v2 = vsel %vm29_vm0, %v25_v0, 0.0  ;;  %v33_v3 = vsel %vm29_vm0, %v26_v1, 0.0  ;;  %v222_v14 = vld [vmem:[%s336_s3] sm:$0xff]   ;;  %v223_v16 = vld [vmem:[%s336_s3 + $0x8] sm:$0xff]  }
   0x3   :  { %31 = vadd.xlane.f32.xlu0 %v30_v2  ;;  %211 = vmatpush3.bf16.msra.mxu0 %v222_v14  ;;  %v193_v24 = vld [vmem:[%s337_s1] ss:$0 sm:$0xff] }
   0x4   :  { %212 = vmatprep.subr.bf16.mxu0 %v228_v15  ;;  %v194_v26 = vld [vmem:[%s338_s2] ss:$0 sm:$0xff] }
   0x5   :  { %v197_v36 = vld [vmem:[%s340_s4] ss:$0 sm:$0xff] }
   0x7   :  { %34 = vadd.xlane.f32.xlu0 %v33_v3  ;;  %213 = vmatpush3.bf16.msra.mxu0 %v223_v16 }
  0x90   :  { %v32_v4 = vpop.xlane.xlu0 %31 }
  0x91   :  { %v37_v5 = vmul.f32 0.03125, %v32_v4 }
  0x93   :  { %v39_v6 = vsub.f32 %v25_v0, %v37_v5 }
  0x94   :  { %v35_v7 = vpop.xlane.xlu0 %34 }
  0x95   :  { %v38_v8 = vmul.f32 0.03125, %v35_v7  ;;  %v41_v9 = vmul.f32 %v39_v6, %v39_v6 }
  0x97   :  { %v40_v10 = vsub.f32 %v26_v1, %v38_v8  ;;  %v43_v11 = vsel %vm29_vm0, %v41_v9, 0.0 }
  0x98   :  { %44 = vadd.xlane.f32.xlu1 %v43_v11 }
  0x99   :  { %v42_v12 = vmul.f32 %v40_v10, %v40_v10 }
  0x9b   :  { %v46_v13 = vsel %vm29_vm0, %v42_v12, 0.0 }
  0x9c   :  { %47 = vadd.xlane.f32.xlu1 %v46_v13 }
 0x125   :  { %v45_v17 = vpop.xlane.xlu1 %44 }
 0x126   :  { %v49_v18 = vmul.f32 0.03125, %v45_v17 }
 0x128   :  { %v51_v19 = vadd.f32 1e-06, %v49_v18 }
 0x129   :  { %v48_v20 = vpop.xlane.xlu1 %47 }
 0x12a   :  { %224 = vrsqrt.f32 %v51_v19  ;;  %v50_v21 = vmul.f32 0.03125, %v48_v20 }
 0x12c   :  { %v52_v22 = vadd.f32 1e-06, %v50_v21 }
 0x12e   :  { %226 = vrsqrt.f32 %v52_v22 }
 0x134   :  { %v225_v23 = vpop.eup %224 }
 0x135   :  { %v55_v25 = vmul.f32 %v225_v23, %v39_v6 }
 0x137   :  { %v63_v27 = vmul.f32 %v193_v24, %v55_v25 }
 0x138   :  { %v227_v28 = vpop.eup %226 }
 0x139   :  { %v56_v29 = vmul.f32 %v227_v28, %v40_v10  ;;  %v71_v30 = vadd.f32 %v194_v26, %v63_v27 }
 0x13b   :  { %v64_v31 = vmul.f32 %v193_v24, %v56_v29  ;;  %v203_v32 = vpack.c.bf16 %v71_v30, %v71_v30 }
 0x13d   :  { %v72_v33 = vadd.f32 %v194_v26, %v64_v31  ;;  %82 = vst.msk [vmem:[%s339_s5] sm:$0xf] %vm81_vm2, %v203_v32 }
 0x13f   :  { %v73_v34 = vpack.c.bf16 %v72_v33, %v71_v30  ;;  %v204_v35 = vpack.c.bf16 %v72_v33, %v72_v33 }
 0x141   :  { %83 = vst.msk [vmem:[%s339_s5 + $0x4] sm:$0xf] %vm81_vm2, %v204_v35  ;;  %215 = vmatmul.mubr.msk.bf16.vlgmr.msra.gmra.mrb[0].mxu0 %vm29_vm0, %v73_v34  ;;  %s230_s5 = smov 64  }
 0x214   :  { %v144_v37 = vpop.f32.mrb[0].mxu0 }
 0x215   :  { %v145_v38 = vadd.f32 %v197_v36, %v144_v37  ;;  %v216_v39 = vpop.f32.mrb[1].mxu0 }
 0x216   :  { %v147_v40 = vpop.f32.mrb[2].mxu0 }
 0x217   :  { %v205_v41 = vpack.c.bf16 %v145_v38, %v145_v38  ;;  %v148_v42 = vadd.f32 %v197_v36, %v147_v40  ;;  %v217_v43 = vpop.f32.mrb[3].mxu0 }
 0x219   :  { %159 = vst.msk [vmem:[%s341_s6] sm:$0xf] %vm81_vm2, %v205_v41  ;;  %v206_v44 = vpack.c.bf16 %v148_v42, %v148_v42  ;;  %169 = vrot.lane.b32.xlu1 %v205_v41, %s230_s5  ;;  %161 = vrot.lane.b32.xlu0 %v205_v41, %s231_s21 }
 0x21b   :  { %160 = vst.msk [vmem:[%s341_s6 + $0x4] sm:$0xf] %vm81_vm2, %v206_v44 }
 0x21d   :  { %163 = vrot.lane.b32.xlu1 %v206_v44, %s231_s21 }
 0x221   :  { %171 = vrot.lane.b32.xlu1 %v206_v44, %s230_s5 }
 0x28b   :  { %v170_v45 = vpop.permute.xlu1 %169  ;;  %v162_v46 = vpop.permute.xlu0 %161 }
 0x28c   :  { %175 = vst.msk [vmem:[%s342_s8] sm:$0xf] %vm81_vm2, %v170_v45  ;;  %167 = vst.msk [vmem:[%s343_s7] sm:$0xf] %vm81_vm2, %v162_v46 }
 0x28f   :  { %v164_v47 = vpop.permute.xlu1 %163 }
 0x290   :  { %168 = vst.msk [vmem:[%s343_s7 + $0x4] sm:$0xf] %vm81_vm2, %v164_v47 }
 0x293   :  { %v172_v48 = vpop.permute.xlu1 %171 }
 0x294   :  { %176 = vst.msk [vmem:[%s342_s8 + $0x4] sm:$0xf] %vm81_vm2, %v172_v48 }

// kernel: transformer_decoder_forward.16
= control target key start
LH: loop header
LB: loop body
LE: loop exit
PB: predicated region body
PF: predicated region fallthrough
CT: control target
= control target key end

     0   :  { %v293_v0 = vmov 0.0   ;;  %vm294_vm0 = vmmov 0   ;;  %vm62_vm1 = vcmask 261120   ;;  %vm234_vm2 = vcmask 257024   ;;  %s398_s2 = inlined_call_operand.vmem [shape: bf16[32,32], index: 2, kind: input, shape index: {}]   ;;  %s399_s0 = inlined_call_operand.vmem [shape: bf16[16,32], index: 0, kind: input, shape index: {}]   ;;  %s400_s3 = inlined_call_operand.vmem [shape: f32[1,32], index: 3, kind: input, shape index: {}]   ;;  %s401_s1 = inlined_call_operand.vmem [shape: f32[16,32], index: 1, kind: input, shape index: {}]   ;;  %s402_s8 = inlined_call_operand.vmem [shape: f32[16,32], index: 8, kind: output, shape index: {0}]   ;;  %s403_s6 = inlined_call_operand.vmem [shape: bf16[32,32], index: 6, kind: input, shape index: {}]   ;;  %s404_s4 = inlined_call_operand.vmem [shape: f32[1,32], index: 4, kind: input, shape index: {}]   ;;  %s405_s5 = inlined_call_operand.vmem [shape: f32[1,32], index: 5, kind: input, shape index: {}]   ;;  %s406_s7 = inlined_call_operand.vmem [shape: f32[1,32], index: 7, kind: input, shape index: {}]   ;;  %s407_s9 = inlined_call_operand.vmem [shape: bf16[16,32], index: 9, kind: output, shape index: {1}]  }
   0x1   :  { %266 = vmatprep.subr.bf16.mxu0 %v293_v0  ;;  %v284_v1 = vld [vmem:[%s398_s2] sm:$0xff]   ;;  %270 = vmatprep.mubr.msk.bf16.mxu0 %vm294_vm0, %v293_v0  ;;  %v285_v2 = vld [vmem:[%s398_s2 + $0x8] sm:$0xff]  }
   0x2   :  { %274 = vmatprep.subr.bf16.mxu1 %v293_v0  ;;  %278 = vmatprep.mubr.msk.bf16.mxu1 %vm294_vm0, %v293_v0  ;;  %v286_v3 = vld [vmem:[%s399_s0] sm:$0xff]   ;;  %v108_v10 = vld [vmem:[%s401_s1 + $0x8] sm:$0xff] }
   0x3   :  { %267 = vmatpush3.bf16.msra.mxu0 %v284_v1  ;;  %v245_v4 = vld [vmem:[%s400_s3] ss:$0 sm:$0xff]  ;;  %v288_v28 = vld [vmem:[%s403_s6 + $0x8] sm:$0xff]  }
   0x4   :  { %268 = vmatprep.subr.bf16.mxu0 %v293_v0  ;;  %v107_v6 = vld [vmem:[%s401_s1] sm:$0xff] }
   0x5   :  { %v287_v27 = vld [vmem:[%s403_s6] sm:$0xff]  }
   0x6   :  { %275 = vmatpush3.bf16.msra.mxu1 %v287_v27  ;;  %v250_v37 = vld [vmem:[%s404_s4] ss:$0 sm:$0xff] }
   0x7   :  { %269 = vmatpush3.bf16.msra.mxu0 %v285_v2  ;;  %276 = vmatprep.subr.bf16.mxu1 %v293_v0  ;;  %v251_v41 = vld [vmem:[%s405_s5] ss:$0 sm:$0xff] }
   0x8   :  { %v252_v46 = vld [vmem:[%s406_s7] ss:$0 sm:$0xff] }
   0xa   :  { %271 = vmatmul.mubr.msk.bf16.vlgmr.msra.gmra.mrb[0].mxu0 %vm62_vm1, %v286_v3  ;;  %277 = vmatpush3.bf16.msra.mxu1 %v288_v28 }
  0xdd   :  { %v100_v5 = vpop.f32.mrb[0].mxu0 }
  0xde   :  { %v101_v7 = vadd.f32 %v245_v4, %v100_v5  ;;  %v272_v8 = vpop.f32.mrb[1].mxu0 }
  0xdf   :  { %v103_v9 = vpop.f32.mrb[2].mxu0 }
  0xe0   :  { %v109_v11 = vadd.f32 %v107_v6, %v101_v7  ;;  %v104_v12 = vadd.f32 %v245_v4, %v103_v9  ;;  %v273_v13 = vpop.f32.mrb[3].mxu0 }
  0xe2   :  { %111 = vst.msk [vmem:[%s402_s8] sm:$0xff] %vm62_vm1, %v109_v11  ;;  %v110_v14 = vadd.f32 %v108_v10, %v104_v12  ;;  %v115_v15 = vsel %vm62_vm1, %v109_v11, 0.0 }
  0xe3   :  { %116 = vadd.xlane.f32.xlu0 %v115_v15 }
  0xe4   :  { %112 = vst.msk [vmem:[%s402_s8 + $0x8] sm:$0xff] %vm62_vm1, %v110_v14  ;;  %v118_v16 = vsel %vm62_vm1, %v110_v14, 0.0 }
  0xe7   :  { %119 = vadd.xlane.f32.xlu0 %v118_v16 }
 0x170   :  { %v117_v17 = vpop.xlane.xlu0 %116 }
 0x171   :  { %v122_v18 = vmul.f32 0.03125, %v117_v17 }
 0x173   :  { %v124_v19 = vsub.f32 %v109_v11, %v122_v18 }
 0x174   :  { %v120_v20 = vpop.xlane.xlu0 %119 }
 0x175   :  { %v123_v21 = vmul.f32 0.03125, %v120_v20  ;;  %v126_v22 = vmul.f32 %v124_v19, %v124_v19 }
 0x177   :  { %v125_v23 = vsub.f32 %v110_v14, %v123_v21  ;;  %v128_v24 = vsel %vm62_vm1, %v126_v22, 0.0 }
 0x178   :  { %129 = vadd.xlane.f32.xlu1 %v128_v24 }
 0x179   :  { %v127_v25 = vmul.f32 %v125_v23, %v125_v23 }
 0x17b   :  { %v131_v26 = vsel %vm62_vm1, %v127_v25, 0.0 }
 0x17c   :  { %132 = vadd.xlane.f32.xlu1 %v131_v26 }
 0x205   :  { %v130_v29 = vpop.xlane.xlu1 %129 }
 0x206   :  { %v134_v30 = vmul.f32 0.03125, %v130_v29 }
 0x208   :  { %v136_v31 = vadd.f32 1e-06, %v134_v30 }
 0x209   :  { %v133_v32 = vpop.xlane.xlu1 %132 }
 0x20a   :  { %289 = vrsqrt.f32 %v136_v31  ;;  %v135_v33 = vmul.f32 0.03125, %v133_v32 }
 0x20c   :  { %v137_v34 = vadd.f32 1e-06, %v135_v33 }
 0x20e   :  { %291 = vrsqrt.f32 %v137_v34 }
 0x214   :  { %v290_v35 = vpop.eup %289 }
 0x215   :  { %v140_v36 = vmul.f32 %v290_v35, %v124_v19 }
 0x217   :  { %v148_v40 = vmul.f32 %v250_v37, %v140_v36 }
 0x218   :  { %v292_v38 = vpop.eup %291 }
 0x219   :  { %v141_v39 = vmul.f32 %v292_v38, %v125_v23  ;;  %v156_v43 = vadd.f32 %v251_v41, %v148_v40 }
 0x21b   :  { %v149_v42 = vmul.f32 %v250_v37, %v141_v39 }
 0x21d   :  { %v157_v44 = vadd.f32 %v251_v41, %v149_v42 }
 0x21f   :  { %v158_v45 = vpack.c.bf16 %v157_v44, %v156_v43 }
 0x221   :  { %279 = vmatmul.mubr.msk.bf16.vlgmr.msra.gmra.mrb[0].mxu1 %vm62_vm1, %v158_v45 }
 0x2f4   :  { %v219_v47 = vpop.f32.mrb[0].mxu1 }
 0x2f5   :  { %v220_v48 = vadd.f32 %v252_v46, %v219_v47  ;;  %v280_v49 = vpop.f32.mrb[1].mxu1 }
 0x2f6   :  { %v222_v50 = vpop.f32.mrb[2].mxu1 }
 0x2f7   :  { %v258_v51 = vpack.c.bf16 %v220_v48, %v220_v48  ;;  %v223_v52 = vadd.f32 %v252_v46, %v222_v50  ;;  %v281_v53 = vpop.f32.mrb[3].mxu1 }
 0x2f9   :  { %235 = vst.msk [vmem:[%s407_s9] sm:$0xf] %vm234_vm2, %v258_v51  ;;  %v259_v54 = vpack.c.bf16 %v223_v52, %v223_v52 }
 0x2fb   :  { %236 = vst.msk [vmem:[%s407_s9 + $0x4] sm:$0xf] %vm234_vm2, %v259_v54 }

// kernel: transformer_decoder_forward.13
= control target key start
LH: loop header
LB: loop body
LE: loop exit
PB: predicated region body
PF: predicated region fallthrough
CT: control target
= control target key end

     0   :  { %vm46_vm0 = vcmask 261120   ;;  %vm118_vm1 = vcmask 257024   ;;  %s175_s29 = smov 96   ;;  %s254_s1 = inlined_call_operand.vmem [shape: bf16[32,64], index: 1, kind: input, shape index: {}]   ;;  %s255_s0 = inlined_call_operand.vmem [shape: f32[32,32], index: 0, kind: input, shape index: {}]   ;;  %s256_s2 = inlined_call_operand.vmem [shape: f32[1,64], index: 2, kind: input, shape index: {}]   ;;  %s257_s3 = inlined_call_operand.vmem [shape: bf16[32,32], index: 3, kind: output, shape index: {0}]   ;;  %s258_s4 = inlined_call_operand.vmem [shape: bf16[32,32], index: 4, kind: output, shape index: {1}]  }
   0x1   :  { %v173_v0 = vld [vmem:[%s254_s1] sm:$0xff]   ;;  %v174_v1 = vld [vmem:[%s254_s1 + $0x8] sm:$0xff]   ;;  %v19_v5 = vld [vmem:[%s255_s0 + $0x10] sm:$0xff] }
   0x2   :  { %164 = vmatprep.subr.bf16.mxu0 %v173_v0  ;;  %v17_v2 = vld [vmem:[%s255_s0] sm:$0xff]  ;;  %v18_v3 = vld [vmem:[%s255_s0 + $0x8] sm:$0xff]  ;;  %v20_v6 = vld [vmem:[%s255_s0 + $0x18] sm:$0xff] }
   0x3   :  { %165 = vmatpush3.bf16.msra.mxu0 %v173_v0  ;;  %v21_v4 = vpack.c.bf16 %v18_v3, %v17_v2  ;;  %v22_v7 = vpack.c.bf16 %v20_v6, %v19_v5  ;;  %v147_v8 = vld [vmem:[%s256_s2] ss:$0 sm:$0xff] }
   0x4   :  { %166 = vmatprep.subr.bf16.mxu0 %v174_v1 }
   0x5   :  { %168 = vmatprep.mubr.msk.bf16.mxu0 %vm46_vm0, %v21_v4 }
   0x7   :  { %167 = vmatpush3.bf16.msra.mxu0 %v174_v1 }
   0xa   :  { %169 = vmatmul.mubr.msk.bf16.vlgmr.msra.gmra.mrb[0].mxu0 %vm46_vm0, %v22_v7 }
  0xdd   :  { %v170_v9 = vpop.f32.mrb[0].mxu0 }
  0xde   :  { %v96_v10 = vadd.f32 %v170_v9, %v147_v8  ;;  %v87_v11 = vpop.f32.mrb[1].mxu0 }
  0xdf   :  { %v88_v12 = vadd.f32 %v147_v8, %v87_v11  ;;  %v171_v13 = vpop.f32.mrb[2].mxu0 }
  0xe0   :  { %v158_v14 = vpack.c.bf16 %v96_v10, %v96_v10  ;;  %v99_v15 = vadd.f32 %v171_v13, %v147_v8  ;;  %v90_v16 = vpop.f32.mrb[3].mxu0 }
  0xe1   :  { %v156_v17 = vpack.c.bf16 %v88_v12, %v88_v12  ;;  %v91_v18 = vadd.f32 %v147_v8, %v90_v16 }
  0xe2   :  { %121 = vst.msk [vmem:[%s257_s3 + $0x8] sm:$0xf] %vm118_vm1, %v158_v14  ;;  %v159_v19 = vpack.c.bf16 %v99_v15, %v99_v15  ;;  %127 = vrot.lane.b32.xlu1 %v158_v14, %s175_s29 }
  0xe3   :  { %119 = vst.msk [vmem:[%s257_s3] sm:$0xf] %vm118_vm1, %v156_v17  ;;  %v157_v20 = vpack.c.bf16 %v91_v18, %v91_v18  ;;  %123 = vrot.lane.b32.xlu0 %v156_v17, %s175_s29 }
  0xe4   :  { %122 = vst.msk [vmem:[%s257_s3 + $0xc] sm:$0xf] %vm118_vm1, %v159_v19 }
  0xe5   :  { %120 = vst.msk [vmem:[%s257_s3 + $0x4] sm:$0xf] %vm118_vm1, %v157_v20 }
  0xe6   :  { %129 = vrot.lane.b32.xlu1 %v159_v19, %s175_s29 }
  0xe7   :  { %125 = vrot.lane.b32.xlu0 %v157_v20, %s175_s29 }
 0x154   :  { %v128_v21 = vpop.permute.xlu1 %127 }
 0x155   :  { %137 = vst.msk [vmem:[%s258_s4 + $0x8] sm:$0xf] %vm118_vm1, %v128_v21  ;;  %v124_v22 = vpop.permute.xlu0 %123 }
 0x156   :  { %135 = vst.msk [vmem:[%s258_s4] sm:$0xf] %vm118_vm1, %v124_v22 }
 0x158   :  { %v130_v23 = vpop.permute.xlu1 %129 }
 0x159   :  { %138 = vst.msk [vmem:[%s258_s4 + $0xc] sm:$0xf] %vm118_vm1, %v130_v23  ;;  %v126_v24 = vpop.permute.xlu0 %125 }
 0x15a   :  { %136 = vst.msk [vmem:[%s258_s4 + $0x4] sm:$0xf] %vm118_vm1, %v126_v24 }

// kernel: transformer_decoder_forward.15
= control target key start
LH: loop header
LB: loop body
LE: loop exit
PB: predicated region body
PF: predicated region fallthrough
CT: control target
= control target key end

     0   :  { %s1086_s15 = smov 0   ;;  %s1088_s16 = smov 0   ;;  %s1209_s0 = inlined_call_operand.vmem [shape: bf16[2,8,32], index: 0, kind: input, shape index: {}]   ;;  %s1210_s1 = inlined_call_operand.vmem [shape: bf16[2,8,32], index: 1, kind: input, shape index: {}]   ;;  %s1211_s2 = inlined_call_operand.vmem [shape: bf16[2,8,32], index: 2, kind: input, shape index: {}]   ;;  %s1212_s3 = inlined_call_operand.vmem [shape: s32[2,1,8], index: 3, kind: input, shape index: {}]   ;;  %s1213_s4 = inlined_call_operand.vmem [shape: bf16[2,8,32], index: 4, kind: output, shape index: {}]  }
   0x1   :  { %s1090_s17 = smov 0  }
   0x2 LB: > { %s26_s18 = sadd.s32 1, %s1046_s16  ;;  %p888_p0 = scmp.ge.s32.totalorder %s1050_s17, 1  ;;  %s1050_s17 = sphi %s1090_s17, %s14_s17   ;;  %s1046_s16 = sphi %s1088_s16, %s1215_s16   ;;  %s1042_s15 = sphi %s1086_s15, %s1214_s15  }
   0x3   : > { %p28_p1 = scmp.ge.s32.totalorder %s26_s18, 2  ;;  %p206_p2 = scmp.lt.s32.totalorder %s1050_s17, 3 }
   0x5   : > { %s1217_s18 = smov (%p28_p1, %s26_s18), 0  ;;  %p207_p3 = pnand %p888_p0, %p206_p2 }
   0x6   : > { %p247_p4 = scmp.lt.s32.totalorder (!%p207_p3), %s1042_s15, 1  ;;  %v1052_v0 = vmov (!%p207_p3), 0.0   ;;  %vm1053_vm0 = vmmov (!%p207_p3), 0   ;;  %vm294_vm1 = vcmask (!%p207_p3), 64512   ;;  %v277_v4 = vlaneseq (!%p207_p3)  ;;  %s1055_s29 = smov (!%p207_p3), 120  }
   0x7   : > { %210 = sbr.rel (%p207_p3) target bundleno = 1481 (0x5c9), region = 36  ;;  %928 = vmatprep.subr.bf16.mxu0 (!%p207_p3), %v1052_v0  ;;  %930 = vmatprep.mubr.msk.bf16.mxu0 (!%p207_p3), %vm1053_vm0, %v1052_v0  ;;  %v1054_v8 = vmov (!%p207_p3), 0   ;;  %s1056_s30 = smov (!%p207_p3), 112   ;;  %vm358_vm6 = vcmask (!%p207_p3), 1043456   ;;  %vm403_vm7 = vcmask (!%p207_p3), 60416   ;;  %vm533_vm8 = vcmask (!%p207_p3), 126016  }
   0x8   : > { %934 = vmatprep.subr.bf16.mxu1 (!%p207_p3), %v1052_v0  ;;  %936 = vmatprep.mubr.msk.bf16.mxu1 (!%p207_p3), %vm1053_vm0, %v1052_v0  ;;  %v278_v6 = vshrl.u32 (!%p207_p3), %v277_v4, 7  ;;  %v282_v10 = vand.u32 (!%p207_p3), 127, %v277_v4  ;;  %s1057_s5 = smov (!%p207_p3), 104   ;;  %s1058_s12 = smov (!%p207_p3), 8   ;;  %vm654_vm9 = vcmask (!%p207_p3), 191616   ;;  %vm775_vm10 = vcmask (!%p207_p3), 257216  }
   0x9   : > { %s1059_s13 = smov (!%p207_p3), 16   ;;  %s1060_s14 = smov (!%p207_p3), 24  }
   0xa   : > { %v289_v7 = vsub.s32 (!%p207_p3), 0, %v278_v6  ;;  %vm283_vm3 = vcmp.gt.s32.totalorder (!%p207_p3), %v282_v10, %v278_v6 }
   0xe   : > { %s1219_s15 = smov (!%p247_p4, %s1042_s15), 1 }
   0xf   : > { %s1110_s19 = sshll.u32 %s1219_s15, 2  ;;  %s264_s28 = scalar_lea.vmem %s1212_s3, %s1219_s15 }
  0x10   : > { %s257_s22 = scalar_lea.vmem %s1210_s1, %s1110_s19  ;;  %s253_s25 = scalar_lea.vmem %s1209_s0, %s1110_s19  ;;  %v284_v5 = vld [vmem:[%s264_s28] sm:$0x1] }
  0x11   : > { %v274_v1 = vld [vmem:[%s257_s22] sm:$0xf]  ;;  %vm285_vm2 = vcmp.gt.s32.totalorder %v284_v5, 0  ;;  %s261_s8 = scalar_lea.vmem %s1211_s2, %s1110_s19  ;;  %s1168_s11 = scalar_lea.vmem %s1213_s4, %s1110_s19 }
  0x12   : > { %v299_v2 = vsel %vm294_vm1, %v274_v1, 0  ;;  %v273_v3 = vld [vmem:[%s253_s25] sm:$0xf]  ;;  %v286_v9 = vsel %vm285_vm2, 1, %v1054_v8  ;;  %v896_v20 = vcombine.low %v274_v1, %v274_v1 }
  0x13   : > { %929 = vmatpush3.bf16.xpose.msra.mxu0 %v299_v2  ;;  %v290_v11 = vrot.slane %v286_v9, %v289_v7  ;;  %v895_v21 = vcombine.low %v273_v3, %v273_v3  ;;  %v1143_v27 = vld [vmem:[%s261_s8] sm:$0xf] }
  0x14   : > { %946 = vmatprep.subr.bf16.mxu0 %v1052_v0  ;;  %413 = vrot.lane.b32.xlu1 %v896_v20, %s1055_s29  ;;  %v360_v28 = vsel %vm358_vm6, %v1143_v27, 0 }
  0x15   : > { %vm291_vm4 = vcmp.eq.s32.totalorder %v290_v11, 1  ;;  %935 = vmatpush3.bf16.msra.mxu1 %v360_v28 }
  0x16   : > { %vm292_vm5 = vmor %vm283_vm3, %vm291_vm4  ;;  %940 = vmatprep.subr.bf16.mxu1 %v1052_v0 }
  0x17   : > { %v1129_v13 = vsel %vm292_vm5, -1e+18, %v1052_v0 }
  0x18   : > { %408 = vrot.lane.b32.xlu1 %v895_v21, %s1055_s29 }
  0x1a   : > { %931 = vmatmul.mubr.msk.bf16.vlgmr.msra.gmra.mrb[0].mxu0 %vm294_vm1, %v273_v3 }
  0x1b   : > { %948 = vmatprep.mubr.msk.bf16.mxu0 %vm1053_vm0, %v1052_v0 }
  0x1c   : > { %535 = vrot.lane.b32.xlu1 %v895_v21, %s1056_s30 }
  0x20   : > { %658 = vrot.lane.b32.xlu1 %v896_v20, %s1057_s5 }
  0x24   : > { %656 = vrot.lane.b32.xlu1 %v895_v21, %s1057_s5 }
  0x86   : > { %v414_v31 = vpop.permute.xlu1 %413 }
  0x87   : > { %v419_v33 = vsel %vm294_vm1, %v414_v31, 0 }
  0x8a   : > { %v409_v35 = vpop.permute.xlu1 %408 }
  0x8e   : > { %v536_v37 = vpop.permute.xlu1 %535 }
  0x92   : > { %v659_v39 = vpop.permute.xlu1 %658 }
  0x93   : > { %v664_v40 = vsel %vm294_vm1, %v659_v39, 0 }
  0x96   : > { %v657_v41 = vpop.permute.xlu1 %656 }
  0xed   : > { %v335_v12 = vpop.f32.mrb[0].mxu0 }
  0xee   : > { %v341_v14 = vmul.f32 0.35355338, %v335_v12  ;;  %v932_v15 = vpop.f32.mrb[1].mxu0 }
  0xef   : > { %v338_v16 = vpop.f32.mrb[2].mxu0 }
  0xf0   : > { %v933_v17 = vpop.f32.mrb[3].mxu0  ;;  %v342_v18 = vadd.f32 %v341_v14, %v1129_v13 }
  0xf2   : > { %v343_v19 = vsel %vm294_vm1, %v342_v18, -inf }
  0xf3   : > { %344 = vmax.xlane.f32.xlu0 %v343_v19 }
 0x180   : > { %v345_v22 = vpop.xlane.xlu0 %344 }
 0x181   : > { %v346_v23 = vsub.f32 %v342_v18, %v345_v22 }
 0x183   : > { %v347_v24 = vmul.f32 1.442695, %v346_v23 }
 0x185   : > { %1012 = vpow2.f32 %v347_v24 }
 0x18f   : > { %v1013_v25 = vpop.eup %1012 }
 0x190   : > { %v349_v26 = vsel %vm294_vm1, %v1013_v25, 0.0 }
 0x191   : > { %350 = vadd.xlane.f32.xlu0 %v349_v26 }
 0x1a7   : > { %537 = vrot.lane.b32.xlu0 %v896_v20, %s1056_s30 }
 0x21e   : > { %v351_v29 = vpop.xlane.xlu0 %350 }
 0x21f   : > { %1014 = vrcp.f32 %v351_v29 }
 0x222   : > { %v538_v36 = vpop.permute.xlu0 %537 }
 0x223   : > { %v543_v38 = vsel %vm294_vm1, %v538_v36, 0 }
 0x229   : > { %v1015_v30 = vpop.eup %1014 }
 0x22a   : > { %v353_v32 = vmul.f32 %v1015_v30, %v1013_v25 }
 0x22c   : > { %v354_v34 = vpack.c.bf16 %v353_v32, %v353_v32 }
 0x22e   : > { %937 = vmatmul.mubr.msk.bf16.vlgmr.msra.gmra.mrb[0].mxu1 %vm294_vm1, %v354_v34 }
 0x22f   : > { %941 = vmatpush3.bf16.xpose.msra.mxu1 %v419_v33  ;;  %942 = vmatprep.mubr.msk.bf16.mxu1 %vm1053_vm0, %v1052_v0 }
 0x230   : > { %952 = vmatprep.subr.bf16.mxu1 %v1052_v0 }
 0x236   : > { %943 = vmatmul.mubr.msk.bf16.vlgmr.msra.gmra.mrb[4].mxu1 %vm294_vm1, %v409_v35 }
 0x237   : > { %953 = vmatpush3.bf16.xpose.msra.mxu1 %v543_v38  ;;  %954 = vmatprep.mubr.msk.bf16.mxu1 %vm1053_vm0, %v1052_v0 }
 0x238   : > { %964 = vmatprep.subr.bf16.mxu1 %v1052_v0 }
 0x23e   : > { %955 = vmatmul.mubr.msk.bf16.vlgmr.msra.gmra.mrb[8].mxu1 %vm294_vm1, %v536_v37 }
 0x23f   : > { %965 = vmatpush3.bf16.xpose.msra.mxu1 %v664_v40  ;;  %966 = vmatprep.mubr.msk.bf16.mxu1 %vm1053_vm0, %v1052_v0 }
 0x246   : > { %967 = vmatmul.mubr.msk.bf16.vlgmr.msra.gmra.mrb[12].mxu1 %vm294_vm1, %v657_v41 }
 0x301   : > { %v396_v42 = vpop.f32.mrb[0].mxu1 }
 0x302   : > { %v402_v43 = vpack.c.bf16 %v396_v42, %v396_v42  ;;  %v938_v44 = vpop.f32.mrb[1].mxu1 }
 0x303   : > { %v399_v45 = vpop.f32.mrb[2].mxu1 }
 0x304   : > { %404 = vst.msk [vmem:[%s1168_s11] sm:$0xf] %vm403_vm7, %v402_v43  ;;  %v939_v46 = vpop.f32.mrb[3].mxu1 }
 0x309   : > { %v455_v47 = vpop.f32.mrb[4].mxu1 }
 0x30a   : > { %v461_v48 = vmul.f32 0.35355338, %v455_v47  ;;  %v944_v49 = vpop.f32.mrb[5].mxu1 }
 0x30b   : > { %v458_v50 = vpop.f32.mrb[6].mxu1 }
 0x30c   : > { %v945_v51 = vpop.f32.mrb[7].mxu1  ;;  %v462_v52 = vadd.f32 %v461_v48, %v1129_v13 }
 0x30e   : > { %v463_v53 = vsel %vm294_vm1, %v462_v52, -inf }
 0x30f   : > { %464 = vmax.xlane.f32.xlu1 %v463_v53 }
 0x311   : > { %v579_v54 = vpop.f32.mrb[8].mxu1 }
 0x312   : > { %v585_v55 = vmul.f32 0.35355338, %v579_v54  ;;  %v956_v56 = vpop.f32.mrb[9].mxu1 }
 0x313   : > { %v582_v57 = vpop.f32.mrb[10].mxu1 }
 0x314   : > { %v586_v58 = vadd.f32 %v585_v55, %v1129_v13  ;;  %v957_v59 = vpop.f32.mrb[11].mxu1 }
 0x316   : > { %v587_v60 = vsel %vm294_vm1, %v586_v58, -inf }
 0x317   : > { %588 = vmax.xlane.f32.xlu0 %v587_v60 }
 0x319   : > { %v700_v61 = vpop.f32.mrb[12].mxu1 }
 0x31a   : > { %v706_v62 = vmul.f32 0.35355338, %v700_v61  ;;  %v968_v63 = vpop.f32.mrb[13].mxu1 }
 0x31b   : > { %v703_v1 = vpop.f32.mrb[14].mxu1 }
 0x31c   : > { %v707_v2 = vadd.f32 %v706_v62, %v1129_v13  ;;  %v969_v3 = vpop.f32.mrb[15].mxu1  ;;  %v898_v13 = vcombine.low %v1143_v27, %v1143_v27 }
 0x31e   : > { %v708_v4 = vsel %vm294_vm1, %v707_v2, -inf }
 0x31f   : > { %709 = vmax.xlane.f32.xlu1 %v708_v4 }
 0x39c   : > { %v465_v5 = vpop.xlane.xlu1 %464 }
 0x39d   : > { %v466_v6 = vsub.f32 %v462_v52, %v465_v5 }
 0x39f   : > { %v467_v7 = vmul.f32 1.442695, %v466_v6 }
 0x3a1   : > { %1016 = vpow2.f32 %v467_v7 }
 0x3a4   : > { %v589_v8 = vpop.xlane.xlu0 %588 }
 0x3a5   : > { %v590_v9 = vsub.f32 %v586_v58, %v589_v8 }
 0x3a7   : > { %v591_v10 = vmul.f32 1.442695, %v590_v9 }
 0x3a9   : > { %1018 = vpow2.f32 %v591_v10 }
 0x3ab   : > { %v1017_v11 = vpop.eup %1016 }
 0x3ac   : > { %v469_v12 = vsel %vm294_vm1, %v1017_v11, 0.0  ;;  %v710_v16 = vpop.xlane.xlu1 %709 }
 0x3ad   : > { %470 = vadd.xlane.f32.xlu1 %v469_v12  ;;  %v711_v17 = vsub.f32 %v707_v2, %v710_v16 }
 0x3af   : > { %v712_v18 = vmul.f32 1.442695, %v711_v17 }
 0x3b1   : > { %1020 = vpow2.f32 %v712_v18 }
 0x3b3   : > { %v1019_v14 = vpop.eup %1018 }
 0x3b4   : > { %v593_v15 = vsel %vm294_vm1, %v1019_v14, 0.0 }
 0x3b5   : > { %594 = vadd.xlane.f32.xlu0 %v593_v15 }
 0x3bb   : > { %v1021_v19 = vpop.eup %1020 }
 0x3bc   : > { %v714_v20 = vsel %vm294_vm1, %v1021_v19, 0.0 }
 0x3be   : > { %599 = vrot.lane.b32.xlu1 %v898_v13, %s1056_s30 }
 0x3cb   : > { %478 = vrot.lane.b32.xlu0 %v898_v13, %s1055_s29 }
 0x3e2   : > { %715 = vadd.xlane.f32.xlu1 %v714_v20 }
 0x3f3   : > { %720 = vrot.lane.b32.xlu1 %v898_v13, %s1057_s5 }
 0x43a   : > { %v471_v21 = vpop.xlane.xlu1 %470 }
 0x43b   : > { %1022 = vrcp.f32 %v471_v21 }
 0x43e   : > { %v600_v27 = vpop.permute.xlu1 %599 }
 0x43f   : > { %v605_v29 = vsel %vm358_vm6, %v600_v27, 0 }
 0x442   : > { %v595_v22 = vpop.xlane.xlu0 %594 }
 0x443   : > { %1024 = vrcp.f32 %v595_v22 }
 0x445   : > { %v1023_v23 = vpop.eup %1022 }
 0x446   : > { %v473_v24 = vmul.f32 %v1023_v23, %v1017_v11  ;;  %v479_v25 = vpop.permute.xlu0 %478 }
 0x447   : > { %v484_v26 = vsel %vm358_vm6, %v479_v25, 0 }
 0x448   : > { %947 = vmatpush3.bf16.msra.mxu0 %v484_v26  ;;  %v474_v28 = vpack.c.bf16 %v473_v24, %v473_v24 }
 0x449   : > { %958 = vmatprep.subr.bf16.mxu0 %v1052_v0 }
 0x44b   : > { %949 = vmatmul.mubr.msk.bf16.vlgmr.msra.gmra.mrb[4].mxu0 %vm294_vm1, %v474_v28 }
 0x44c   : > { %959 = vmatpush3.bf16.msra.mxu0 %v605_v29  ;;  %960 = vmatprep.mubr.msk.bf16.mxu0 %vm1053_vm0, %v1052_v0 }
 0x44d   : > { %v1025_v30 = vpop.eup %1024  ;;  %970 = vmatprep.subr.bf16.mxu0 %v1052_v0 }
 0x44e   : > { %v597_v31 = vmul.f32 %v1025_v30, %v1019_v14 }
 0x450   : > { %v598_v32 = vpack.c.bf16 %v597_v31, %v597_v31 }
 0x453   : > { %961 = vmatmul.mubr.msk.bf16.vlgmr.msra.gmra.mrb[8].mxu0 %vm294_vm1, %v598_v32 }
 0x454   : > { %972 = vmatprep.mubr.msk.bf16.mxu0 %vm1053_vm0, %v1052_v0 }
 0x46f   : > { %v716_v33 = vpop.xlane.xlu1 %715 }
 0x470   : > { %1026 = vrcp.f32 %v716_v33 }
 0x473   : > { %v721_v34 = vpop.permute.xlu1 %720 }
 0x474   : > { %v726_v35 = vsel %vm358_vm6, %v721_v34, 0 }
 0x475   : > { %971 = vmatpush3.bf16.msra.mxu0 %v726_v35 }
 0x47a   : > { %v1027_v36 = vpop.eup %1026 }
 0x47b   : > { %v718_v37 = vmul.f32 %v1027_v36, %v1021_v19 }
 0x47d   : > { %v719_v38 = vpack.c.bf16 %v718_v37, %v718_v37 }
 0x47f   : > { %973 = vmatmul.mubr.msk.bf16.vlgmr.msra.gmra.mrb[12].mxu0 %vm294_vm1, %v719_v38 }
 0x51e   : > { %v520_v39 = vpop.f32.mrb[4].mxu0 }
 0x51f   : > { %v909_v40 = vpack.c.bf16 %v520_v39, %v520_v39  ;;  %v950_v41 = vpop.f32.mrb[5].mxu0 }
 0x520   : > { %v523_v42 = vpop.f32.mrb[6].mxu0 }
 0x521   : > { %530 = vrot.lane.b32.xlu0 %v909_v40, %s1058_s12  ;;  %v951_v43 = vpop.f32.mrb[7].mxu0 }
 0x526   : > { %v641_v44 = vpop.f32.mrb[8].mxu0 }
 0x527   : > { %v910_v0 = vpack.c.bf16 %v641_v44, %v641_v44  ;;  %v962_v45 = vpop.f32.mrb[9].mxu0 }
 0x528   : > { %v644_v46 = vpop.f32.mrb[10].mxu0 }
 0x529   : > { %651 = vrot.lane.b32.xlu1 %v910_v0, %s1059_s13  ;;  %v963_v47 = vpop.f32.mrb[11].mxu0 }
 0x552   : > { %v762_v48 = vpop.f32.mrb[12].mxu0 }
 0x553   : > { %v911_v49 = vpack.c.bf16 %v762_v48, %v762_v48  ;;  %v974_v50 = vpop.f32.mrb[13].mxu0 }
 0x554   : > { %v765_v51 = vpop.f32.mrb[14].mxu0 }
 0x555   : > { %772 = vrot.lane.b32.xlu0 %v911_v49, %s1060_s14  ;;  %v975_v52 = vpop.f32.mrb[15].mxu0 }
 0x593   : > { %v531_v53 = vpop.permute.xlu0 %530 }
 0x594   : > { %534 = vst.msk [vmem:[%s1168_s11] sm:$0xf] %vm533_vm8, %v531_v53 }
 0x59b   : > { %v652_v54 = vpop.permute.xlu1 %651 }
 0x59c   : > { %655 = vst.msk [vmem:[%s1168_s11] sm:$0xf] %vm654_vm9, %v652_v54 }
 0x5c7   : > { %v773_v55 = vpop.permute.xlu0 %772 }
 0x5c8   : > { %776 = vst.msk [vmem:[%s1168_s11] sm:$0xf] %vm775_vm10, %v773_v55 }
 0x5c9 PF: > { %s14_s17 = sadd.s32 1, %s1050_s17   ;;  %s1214_s15 = smov %s1046_s16 }
 0x5ca   : > { %p11_p5 = scmp.ge.s32.totalorder %s14_s17, 4   ;;  %s1215_s16 = smov %s1217_s18 }
 0x5cc   :  { %13 = sbr.rel (!%p11_p5) target bundleno = 2 (0x2), region = 75 }

// kernel: transformer_decoder_forward.18
= control target key start
LH: loop header
LB: loop body
LE: loop exit
PB: predicated region body
PF: predicated region fallthrough
CT: control target
= control target key end

     0   :  { %v573_v1 = vmov 0.0   ;;  %vm574_vm0 = vmmov 0   ;;  %vm78_vm1 = vcmask 261120   ;;  %s763_s0 = inlined_call_operand.vmem [shape: bf16[16,32], index: 0, kind: input, shape index: {}]   ;;  %s764_s1 = inlined_call_operand.vmem [shape: bf16[16,32], index: 1, kind: input, shape index: {}]   ;;  %s765_s2 = inlined_call_operand.vmem [shape: f32[16,32], index: 2, kind: input, shape index: {}]   ;;  %s766_s3 = inlined_call_operand.vmem [shape: bf16[32,32], index: 3, kind: input, shape index: {}]   ;;  %s767_s4 = inlined_call_operand.vmem [shape: f32[1,32], index: 4, kind: input, shape index: {}]   ;;  %s768_s5 = inlined_call_operand.vmem [shape: f32[1,32], index: 5, kind: input, shape index: {}]   ;;  %s769_s6 = inlined_call_operand.vmem [shape: f32[1,32], index: 6, kind: input, shape index: {}]   ;;  %s770_s7 = inlined_call_operand.vmem [shape: f32[1,32], index: 7, kind: input, shape index: {}]   ;;  %s771_s8 = inlined_call_operand.vmem [shape: f32[1,32], index: 8, kind: input, shape index: {}]   ;;  %s772_s9 = inlined_call_operand.vmem [shape: bf16[32,64], index: 9, kind: input, shape index: {}]   ;;  %s773_s10 = inlined_call_operand.vmem [shape: f32[1,64], index: 10, kind: input, shape index: {}]   ;;  %s774_s11 = inlined_call_operand.vmem [shape: bf16[64,32], index: 11, kind: input, shape index: {}]   ;;  %s775_s12 = inlined_call_operand.vmem [shape: f32[1,32], index: 12, kind: input, shape index: {}]   ;;  %s776_s13 = inlined_call_operand.vmem [shape: f32[16,32], index: 13, kind: output, shape index: {0}]   ;;  %s777_s14 = inlined_call_operand.hbm [shape: f32[16,1], index: 14, kind: output, shape index: {1}]  }
   0x1   :  { %v527_v0 = vld [vmem:[%s766_s3] sm:$0xff]   ;;  %486 = vmatprep.subr.bf16.mxu0 %v573_v1  ;;  %494 = vmatprep.subr.bf16.mxu1 %v573_v1  ;;  %v528_v2 = vld [vmem:[%s766_s3 + $0x8] sm:$0xff]  }
   0x2   :  { %487 = vmatpush3.bf16.msra.mxu0 %v527_v0  ;;  %495 = vmatpush3.bf16.msra.mxu1 %v527_v0  ;;  %v529_v3 = vld [vmem:[%s763_s0] sm:$0xff]  }
   0x3   :  { %488 = vmatprep.subr.bf16.mxu0 %v573_v1  ;;  %496 = vmatprep.subr.bf16.mxu1 %v573_v1  ;;  %v530_v4 = vld [vmem:[%s764_s1] sm:$0xff]  }
   0x4   :  { %490 = vmatprep.mubr.msk.bf16.mxu0 %vm574_vm0, %v573_v1  ;;  %498 = vmatprep.mubr.msk.bf16.mxu1 %vm574_vm0, %v573_v1 }
   0x6   :  { %489 = vmatpush3.bf16.msra.mxu0 %v528_v2  ;;  %497 = vmatpush3.bf16.msra.mxu1 %v528_v2 }
   0x7   :  { %502 = vmatprep.subr.bf16.mxu0 %v573_v1  ;;  %510 = vmatprep.subr.bf16.mxu1 %v573_v1 }
   0x8   :  { %20 = vsyncpa [#allocation3], 0  ;;  %v451_v5 = vld [vmem:[%s767_s4] ss:$0 sm:$0xff]  ;;  %vm212_vm2 = vcmask 7168   ;;  %v224_v49 = vld [vmem:[%s765_s2 + $0x8] sm:$0xff] }
   0x9   :  { %491 = vmatmul.mubr.msk.bf16.vlgmr.msra.gmra.mrb[0].mxu0 %vm78_vm1, %v529_v3  ;;  %499 = vmatmul.mubr.msk.bf16.vlgmr.msra.gmra.mrb[0].mxu1 %vm78_vm1, %v530_v4  ;;  %v458_v7 = vld [vmem:[%s768_s5] ss:$0 sm:$0xff]  ;;  %v532_v2 = vld [vmem:[%s772_s9 + $0x8] sm:$0xff]   ;;  %vm382_vm3 = vcmask 523264   ;;  %s575_s1 = smov [#allocation2]  }
   0xa   :  { %506 = vmatprep.mubr.msk.bf16.mxu0 %vm574_vm0, %v573_v1  ;;  %518 = vmatprep.mubr.msk.bf16.mxu1 %vm574_vm0, %v573_v1  ;;  %v459_v9 = vld [vmem:[%s769_s6] ss:$0 sm:$0xff]  ;;  %v534_v4 = vld [vmem:[%s774_s11 + $0x8] sm:$0xff]   ;;  %s438_s21 = sshll.u32 %s575_s1, 4  ;;  %s439_s21 = int_to_ptr.vmem [resolvable:$true] %s438_s21 }
   0xb   :  { %v223_v43 = vld [vmem:[%s765_s2] sm:$0xff]  ;;  %p554_p1 = scmp.lt.s32.totalorder %s439_s21, %s439_s21 }
   0xc   :  { %v531_v0 = vld [vmem:[%s772_s9] sm:$0xff]  }
   0xd   :  { %503 = vmatpush3.bf16.msra.mxu0 %v531_v0  ;;  %v533_v3 = vld [vmem:[%s774_s11] sm:$0xff]  }
   0xe   :  { %504 = vmatprep.subr.bf16.mxu0 %v573_v1  ;;  %511 = vmatpush3.bf16.msra.mxu1 %v533_v3 }
   0xf   :  { %512 = vmatprep.subr.bf16.mxu1 %v573_v1 }
  0x11   :  { %505 = vmatpush3.bf16.msra.mxu0 %v532_v2 }
  0x12   :  { %513 = vmatpush3.bf16.msra.mxu1 %v534_v4 }
  0x13   :  { %514 = vmatprep.subr.bf16.mxu1 %v573_v1 }
  0xdc   :  { %v116_v6 = vpop.f32.mrb[0].mxu0  ;;  %v167_v8 = vpop.f32.mrb[0].mxu1 }
  0xdd   :  { %v117_v10 = vadd.f32 %v451_v5, %v116_v6  ;;  %v168_v11 = vadd.f32 %v451_v5, %v167_v8  ;;  %v492_v12 = vpop.f32.mrb[1].mxu0  ;;  %v500_v13 = vpop.f32.mrb[1].mxu1 }
  0xde   :  { %v119_v14 = vpop.f32.mrb[2].mxu0  ;;  %v170_v15 = vpop.f32.mrb[2].mxu1  ;;  %v460_v13 = vld [vmem:[%s770_s7] ss:$0 sm:$0xff] }
  0xdf   :  { %v181_v16 = vmul.f32 %v458_v7, %v117_v10  ;;  %v190_v17 = vmul.f32 %v459_v9, %v168_v11  ;;  %v120_v18 = vadd.f32 %v451_v5, %v119_v14  ;;  %v171_v19 = vadd.f32 %v451_v5, %v170_v15  ;;  %v493_v20 = vpop.f32.mrb[3].mxu0  ;;  %v501_v21 = vpop.f32.mrb[3].mxu1 }
  0xe1   :  { %v182_v22 = vmul.f32 %v458_v7, %v120_v18  ;;  %v191_v23 = vmul.f32 %v459_v9, %v171_v19  ;;  %v192_v24 = vadd.f32 %v190_v17, %v181_v16  ;;  %v461_v17 = vld [vmem:[%s771_s8] ss:$0 sm:$0xff] }
  0xe3   :  { %v194_v25 = vsel %vm78_vm1, %v192_v24, 0.0  ;;  %v193_v26 = vadd.f32 %v191_v23, %v182_v22  ;;  %v535_v22 = vld [vmem:[%s774_s11 + $0x10] sm:$0xff]   ;;  %v536_v23 = vld [vmem:[%s774_s11 + $0x18] sm:$0xff]   ;;  %v462_v24 = vld [vmem:[%s773_s10] ss:$0 sm:$0xff]  ;;  %s549_s11 = scalar_lea.vmem %s439_s21, 256 }
  0xe4   :  { %195 = vadd.xlane.f32.xlu0 %v194_v25  ;;  %515 = vmatpush3.bf16.msra.mxu1 %v535_v22  ;;  %p550_p0 = scmp.ne.s32.totalorder %s439_s21, %s549_s11  ;;  %p555_p2 = scmp.lt.s32.totalorder %s549_s11, %s549_s11 }
  0xe5   :  { %v197_v27 = vsel %vm78_vm1, %v193_v26, 0.0  ;;  %516 = vmatprep.subr.bf16.mxu1 %v573_v1 }
  0xe6   :  { %p556_p3 = por %p555_p2, %p554_p1 }
  0xe8   :  { %198 = vadd.xlane.f32.xlu0 %v197_v27  ;;  %517 = vmatpush3.bf16.msra.mxu1 %v536_v23  ;;  %p557_p4 = pnand %p556_p3, %p550_p0 }
 0x171   :  { %v196_v28 = vpop.xlane.xlu0 %195 }
 0x172   :  { %v200_v29 = vsub.f32 0.0, %v196_v28 }
 0x174   :  { %v202_v30 = vmul.f32 1.442695, %v200_v29 }
 0x175   :  { %v199_v31 = vpop.xlane.xlu0 %198 }
 0x176   :  { %537 = vpow2.f32 %v202_v30  ;;  %v201_v32 = vsub.f32 0.0, %v199_v31 }
 0x178   :  { %v204_v33 = vmul.f32 1.442695, %v201_v32 }
 0x17a   :  { %539 = vpow2.f32 %v204_v33 }
 0x180   :  { %v538_v34 = vpop.eup %537 }
 0x181   :  { %v206_v35 = vadd.f32 1.0, %v538_v34 }
 0x183   :  { %541 = vrcp.f32 %v206_v35 }
 0x184   :  { %v540_v36 = vpop.eup %539 }
 0x185   :  { %v207_v37 = vadd.f32 1.0, %v540_v36 }
 0x187   :  { %543 = vrcp.f32 %v207_v37 }
 0x18d   :  { %v542_v38 = vpop.eup %541 }
 0x18e   :  { %v217_v39 = vsub.f32 1.0, %v542_v38  ;;  %213 = vst.msk [vmem:[#allocation2] sm:$0xff] %vm212_vm2, %v542_v38  ;;  %v215_v40 = vmul.f32 %v542_v38, %v117_v10 }
 0x190   :  { %v219_v41 = vmul.f32 %v217_v39, %v168_v11 }
 0x191   :  { %v544_v42 = vpop.eup %543 }
 0x192   :  { %v221_v44 = vadd.f32 %v219_v41, %v215_v40  ;;  %v218_v45 = vsub.f32 1.0, %v544_v42  ;;  %214 = vst.msk [vmem:[#allocation2 + $0x8] sm:$0xff] %vm212_vm2, %v544_v42  ;;  %v216_v47 = vmul.f32 %v544_v42, %v120_v18 }
 0x194   :  { %v691_v46 = vadd.f32 %v223_v43, %v221_v44  ;;  %v220_v48 = vmul.f32 %v218_v45, %v171_v19 }
 0x196   :  { %v229_v50 = vsel %vm78_vm1, %v691_v46, 0.0  ;;  %v222_v51 = vadd.f32 %v220_v48, %v216_v47 }
 0x197   :  { %230 = vadd.xlane.f32.xlu1 %v229_v50 }
 0x198   :  { %v698_v52 = vadd.f32 %v224_v49, %v222_v51 }
 0x19a   :  { %v232_v53 = vsel %vm78_vm1, %v698_v52, 0.0 }
 0x19b   :  { %233 = vadd.xlane.f32.xlu1 %v232_v53 }
 0x224   :  { %v231_v54 = vpop.xlane.xlu1 %230 }
 0x225   :  { %v236_v55 = vmul.f32 0.03125, %v231_v54 }
 0x227   :  { %v238_v56 = vsub.f32 %v691_v46, %v236_v55 }
 0x228   :  { %v234_v57 = vpop.xlane.xlu1 %233 }
 0x229   :  { %v237_v58 = vmul.f32 0.03125, %v234_v57  ;;  %v240_v59 = vmul.f32 %v238_v56, %v238_v56 }
 0x22b   :  { %v239_v60 = vsub.f32 %v698_v52, %v237_v58  ;;  %v242_v61 = vsel %vm78_vm1, %v240_v59, 0.0 }
 0x22c   :  { %243 = vadd.xlane.f32.xlu0 %v242_v61 }
 0x22d   :  { %v241_v62 = vmul.f32 %v239_v60, %v239_v60 }
 0x22f   :  { %v245_v63 = vsel %vm78_vm1, %v241_v62, 0.0 }
 0x230   :  { %246 = vadd.xlane.f32.xlu1 %v245_v63 }
 0x2b9   :  { %v244_v5 = vpop.xlane.xlu0 %243 }
 0x2ba   :  { %v248_v6 = vmul.f32 0.03125, %v244_v5 }
 0x2bc   :  { %v250_v7 = vadd.f32 1e-06, %v248_v6 }
 0x2bd   :  { %v247_v8 = vpop.xlane.xlu1 %246 }
 0x2be   :  { %545 = vrsqrt.f32 %v250_v7  ;;  %v249_v9 = vmul.f32 0.03125, %v247_v8 }
 0x2c0   :  { %v251_v10 = vadd.f32 1e-06, %v249_v9 }
 0x2c2   :  { %547 = vrsqrt.f32 %v251_v10 }
 0x2c8   :  { %v546_v11 = vpop.eup %545 }
 0x2c9   :  { %v254_v12 = vmul.f32 %v546_v11, %v238_v56 }
 0x2cb   :  { %v262_v15 = vmul.f32 %v460_v13, %v254_v12 }
 0x2cc   :  { %v548_v14 = vpop.eup %547 }
 0x2cd   :  { %v255_v16 = vmul.f32 %v548_v14, %v239_v60  ;;  %v270_v19 = vadd.f32 %v461_v17, %v262_v15 }
 0x2cf   :  { %v263_v18 = vmul.f32 %v460_v13, %v255_v16 }
 0x2d1   :  { %v271_v20 = vadd.f32 %v461_v17, %v263_v18 }
 0x2d3   :  { %v272_v21 = vpack.c.bf16 %v271_v20, %v270_v19 }
 0x2d5   :  { %507 = vmatmul.mubr.msk.bf16.vlgmr.msra.gmra.mrb[4].mxu0 %vm78_vm1, %v272_v21 }
 0x3a8   :  { %v333_v25 = vpop.f32.mrb[4].mxu0 }
 0x3a9   :  { %v334_v26 = vadd.f32 %v462_v24, %v333_v25  ;;  %v508_v27 = vpop.f32.mrb[5].mxu0 }
 0x3aa   :  { %v336_v28 = vpop.f32.mrb[6].mxu0 }
 0x3ab   :  { %v337_v29 = vadd.f32 %v462_v24, %v336_v28  ;;  %v509_v30 = vpop.f32.mrb[7].mxu0  ;;  %v340_v31 = vmax.f32 %v334_v26, 0.0 }
 0x3ad   :  { %v341_v32 = vmax.f32 %v337_v29, 0.0 }
 0x3af   :  { %v342_v33 = vpack.c.bf16 %v341_v32, %v340_v31 }
 0x3b1   :  { %519 = vmatmul.mubr.msk.bf16.vlgmr.msra.gmra.mrb[4].mxu1 %vm382_vm3, %v342_v33 }
 0x3b2   :  { %560 = shalt.err (!%p557_p4)
}
 0x3b3   :  { %s561_s23 = scalar_lea.hbm %s777_s14, 256 }
 0x3b4   :  { %p562_p5 = scmp.ne.s32.totalorder %s777_s14, %s561_s23  ;;  %p565_p6 = scmp.lt.u32.totalorder %s561_s23, %s777_s14 }
 0x3b6   :  { %p567_p7 = pnand %p565_p6, %p562_p5 }
 0x3b8   :  { %570 = shalt.err (!%p567_p7)
}
 0x3b9   :  { %s576_s2 = smov 128   ;;  %s577_s25 = smov 8   ;;  %v466_v1 = vld [vmem:[%s775_s12] ss:$0 sm:$0xff] }
 0x3ba   :  { %444 = dma.vmem_to_hbm [thread:$0]  %s439_s21, 256, %s777_s14, [#allocation3], %s576_s2, %s576_s2, %s577_s25  }
 0x484   :  { %v420_v34 = vpop.f32.mrb[4].mxu1 }
 0x485   :  { %v421_v35 = vadd.f32 %v466_v1, %v420_v34  ;;  %v520_v36 = vpop.f32.mrb[5].mxu1 }
 0x486   :  { %v423_v37 = vpop.f32.mrb[6].mxu1 }
 0x487   :  { %v427_v38 = vadd.f32 %v421_v35, %v691_v46  ;;  %v424_v39 = vadd.f32 %v466_v1, %v423_v37  ;;  %v521_v40 = vpop.f32.mrb[7].mxu1 }
 0x489   :  { %429 = vst.msk [vmem:[%s776_s13] sm:$0xff] %vm78_vm1, %v427_v38  ;;  %v428_v41 = vadd.f32 %v424_v39, %v698_v52 }
 0x48b   :  { %430 = vst.msk [vmem:[%s776_s13 + $0x8] sm:$0xff] %vm78_vm1, %v428_v41 }
 0x48c   :  { %571 = dma.done.wait [#allocation3], 256  }
 0x48d   :  { %572 = vsyncadd [#allocation3], 4294967040 }
 0x48e   :  { %450 = vsyncpa [#allocation3], 1 }

// kernel: transformer_decoder_forward.24
= control target key start
LH: loop header
LB: loop body
LE: loop exit
PB: predicated region body
PF: predicated region fallthrough
CT: control target
= control target key end

     0   :  { %v533_v0 = vmov 0.0   ;;  %vm534_vm0 = vmmov 0   ;;  %vm77_vm1 = vcmask 261120   ;;  %vm211_vm2 = vcmask 7168   ;;  %s718_s3 = inlined_call_operand.vmem [shape: bf16[32,32], index: 3, kind: input, shape index: {}]   ;;  %s719_s0 = inlined_call_operand.vmem [shape: bf16[16,32], index: 0, kind: input, shape index: {}]   ;;  %s720_s1 = inlined_call_operand.vmem [shape: bf16[16,32], index: 1, kind: input, shape index: {}]   ;;  %s721_s4 = inlined_call_operand.vmem [shape: f32[1,32], index: 4, kind: input, shape index: {}]   ;;  %s722_s5 = inlined_call_operand.vmem [shape: f32[1,32], index: 5, kind: input, shape index: {}]   ;;  %s723_s6 = inlined_call_operand.vmem [shape: f32[1,32], index: 6, kind: input, shape index: {}]   ;;  %s724_s14 = inlined_call_operand.vmem [shape: f32[16,1], index: 14, kind: output, shape index: {1}]   ;;  %s725_s2 = inlined_call_operand.vmem [shape: f32[16,32], index: 2, kind: input, shape index: {}]   ;;  %s726_s9 = inlined_call_operand.vmem [shape: bf16[32,64], index: 9, kind: input, shape index: {}]   ;;  %s727_s11 = inlined_call_operand.vmem [shape: bf16[64,32], index: 11, kind: input, shape index: {}]   ;;  %s728_s7 = inlined_call_operand.vmem [shape: f32[1,32], index: 7, kind: input, shape index: {}]   ;;  %s729_s8 = inlined_call_operand.vmem [shape: f32[1,32], index: 8, kind: input, shape index: {}]   ;;  %s730_s10 = inlined_call_operand.vmem [shape: f32[1,64], index: 10, kind: input, shape index: {}]   ;;  %s731_s12 = inlined_call_operand.vmem [shape: f32[1,32], index: 12, kind: input, shape index: {}]   ;;  %s732_s13 = inlined_call_operand.vmem [shape: f32[16,32], index: 13, kind: output, shape index: {0}]  }
   0x1   :  { %473 = vmatprep.subr.bf16.mxu0 %v533_v0  ;;  %481 = vmatprep.subr.bf16.mxu1 %v533_v0  ;;  %v511_v1 = vld [vmem:[%s718_s3] sm:$0xff]   ;;  %v512_v2 = vld [vmem:[%s718_s3 + $0x8] sm:$0xff]   ;;  %vm381_vm3 = vcmask 523264  }
   0x2   :  { %477 = vmatprep.mubr.msk.bf16.mxu0 %vm534_vm0, %v533_v0  ;;  %485 = vmatprep.mubr.msk.bf16.mxu1 %vm534_vm0, %v533_v0  ;;  %v513_v3 = vld [vmem:[%s719_s0] sm:$0xff]   ;;  %v223_v49 = vld [vmem:[%s725_s2 + $0x8] sm:$0xff] }
   0x3   :  { %474 = vmatpush3.bf16.msra.mxu0 %v511_v1  ;;  %482 = vmatpush3.bf16.msra.mxu1 %v511_v1  ;;  %v514_v4 = vld [vmem:[%s720_s1] sm:$0xff]  }
   0x4   :  { %475 = vmatprep.subr.bf16.mxu0 %v533_v0  ;;  %483 = vmatprep.subr.bf16.mxu1 %v533_v0  ;;  %v438_v5 = vld [vmem:[%s721_s4] ss:$0 sm:$0xff] }
   0x5   :  { %v445_v7 = vld [vmem:[%s722_s5] ss:$0 sm:$0xff] }
   0x6   :  { %v446_v9 = vld [vmem:[%s723_s6] ss:$0 sm:$0xff] }
   0x7   :  { %476 = vmatpush3.bf16.msra.mxu0 %v512_v2  ;;  %484 = vmatpush3.bf16.msra.mxu1 %v512_v2  ;;  %v222_v43 = vld [vmem:[%s725_s2] sm:$0xff]  ;;  %v516_v2 = vld [vmem:[%s726_s9 + $0x8] sm:$0xff]  }
   0x8   :  { %489 = vmatprep.subr.bf16.mxu0 %v533_v0  ;;  %497 = vmatprep.subr.bf16.mxu1 %v533_v0  ;;  %v515_v1 = vld [vmem:[%s726_s9] sm:$0xff]  }
   0xa   :  { %478 = vmatmul.mubr.msk.bf16.vlgmr.msra.gmra.mrb[0].mxu0 %vm77_vm1, %v513_v3  ;;  %486 = vmatmul.mubr.msk.bf16.vlgmr.msra.gmra.mrb[0].mxu1 %vm77_vm1, %v514_v4  ;;  %v517_v3 = vld [vmem:[%s727_s11] sm:$0xff]   ;;  %v518_v4 = vld [vmem:[%s727_s11 + $0x8] sm:$0xff]  }
   0xb   :  { %493 = vmatprep.mubr.msk.bf16.mxu0 %vm534_vm0, %v533_v0  ;;  %505 = vmatprep.mubr.msk.bf16.mxu1 %vm534_vm0, %v533_v0 }
   0xc   :  { %490 = vmatpush3.bf16.msra.mxu0 %v515_v1  ;;  %498 = vmatpush3.bf16.msra.mxu1 %v517_v3 }
   0xd   :  { %491 = vmatprep.subr.bf16.mxu0 %v533_v0  ;;  %499 = vmatprep.subr.bf16.mxu1 %v533_v0 }
  0x10   :  { %492 = vmatpush3.bf16.msra.mxu0 %v516_v2  ;;  %500 = vmatpush3.bf16.msra.mxu1 %v518_v4 }
  0x11   :  { %501 = vmatprep.subr.bf16.mxu1 %v533_v0 }
  0xdd   :  { %v115_v6 = vpop.f32.mrb[0].mxu0  ;;  %v166_v8 = vpop.f32.mrb[0].mxu1 }
  0xde   :  { %v116_v10 = vadd.f32 %v438_v5, %v115_v6  ;;  %v167_v11 = vadd.f32 %v438_v5, %v166_v8  ;;  %v479_v12 = vpop.f32.mrb[1].mxu0  ;;  %v487_v13 = vpop.f32.mrb[1].mxu1 }
  0xdf   :  { %v118_v14 = vpop.f32.mrb[2].mxu0  ;;  %v169_v15 = vpop.f32.mrb[2].mxu1  ;;  %v447_v13 = vld [vmem:[%s728_s7] ss:$0 sm:$0xff] }
  0xe0   :  { %v180_v16 = vmul.f32 %v445_v7, %v116_v10  ;;  %v189_v17 = vmul.f32 %v446_v9, %v167_v11  ;;  %v119_v18 = vadd.f32 %v438_v5, %v118_v14  ;;  %v170_v19 = vadd.f32 %v438_v5, %v169_v15  ;;  %v480_v20 = vpop.f32.mrb[3].mxu0  ;;  %v488_v21 = vpop.f32.mrb[3].mxu1 }
  0xe2   :  { %v181_v22 = vmul.f32 %v445_v7, %v119_v18  ;;  %v190_v23 = vmul.f32 %v446_v9, %v170_v19  ;;  %v191_v24 = vadd.f32 %v189_v17, %v180_v16  ;;  %v448_v17 = vld [vmem:[%s729_s8] ss:$0 sm:$0xff] }
  0xe4   :  { %v193_v25 = vsel %vm77_vm1, %v191_v24, 0.0  ;;  %v192_v26 = vadd.f32 %v190_v23, %v181_v22  ;;  %v519_v22 = vld [vmem:[%s727_s11 + $0x10] sm:$0xff]   ;;  %v520_v23 = vld [vmem:[%s727_s11 + $0x18] sm:$0xff]   ;;  %v449_v24 = vld [vmem:[%s730_s10] ss:$0 sm:$0xff] }
  0xe5   :  { %194 = vadd.xlane.f32.xlu0 %v193_v25  ;;  %502 = vmatpush3.bf16.msra.mxu1 %v519_v22 }
  0xe6   :  { %v196_v27 = vsel %vm77_vm1, %v192_v26, 0.0  ;;  %503 = vmatprep.subr.bf16.mxu1 %v533_v0  ;;  %v453_v0 = vld [vmem:[%s731_s12] ss:$0 sm:$0xff] }
  0xe9   :  { %197 = vadd.xlane.f32.xlu0 %v196_v27  ;;  %504 = vmatpush3.bf16.msra.mxu1 %v520_v23 }
 0x172   :  { %v195_v28 = vpop.xlane.xlu0 %194 }
 0x173   :  { %v199_v29 = vsub.f32 0.0, %v195_v28 }
 0x175   :  { %v201_v30 = vmul.f32 1.442695, %v199_v29 }
 0x176   :  { %v198_v31 = vpop.xlane.xlu0 %197 }
 0x177   :  { %521 = vpow2.f32 %v201_v30  ;;  %v200_v32 = vsub.f32 0.0, %v198_v31 }
 0x179   :  { %v203_v33 = vmul.f32 1.442695, %v200_v32 }
 0x17b   :  { %523 = vpow2.f32 %v203_v33 }
 0x181   :  { %v522_v34 = vpop.eup %521 }
 0x182   :  { %v205_v35 = vadd.f32 1.0, %v522_v34 }
 0x184   :  { %525 = vrcp.f32 %v205_v35 }
 0x185   :  { %v524_v36 = vpop.eup %523 }
 0x186   :  { %v206_v37 = vadd.f32 1.0, %v524_v36 }
 0x188   :  { %527 = vrcp.f32 %v206_v37 }
 0x18e   :  { %v526_v38 = vpop.eup %525 }
 0x18f   :  { %212 = vst.msk [vmem:[%s724_s14] sm:$0xff] %vm211_vm2, %v526_v38  ;;  %v216_v39 = vsub.f32 1.0, %v526_v38  ;;  %v214_v40 = vmul.f32 %v526_v38, %v116_v10 }
 0x191   :  { %v218_v41 = vmul.f32 %v216_v39, %v167_v11 }
 0x192   :  { %v528_v42 = vpop.eup %527 }
 0x193   :  { %213 = vst.msk [vmem:[%s724_s14 + $0x8] sm:$0xff] %vm211_vm2, %v528_v42  ;;  %v220_v44 = vadd.f32 %v218_v41, %v214_v40  ;;  %v217_v45 = vsub.f32 1.0, %v528_v42  ;;  %v215_v47 = vmul.f32 %v528_v42, %v119_v18 }
 0x195   :  { %v658_v46 = vadd.f32 %v222_v43, %v220_v44  ;;  %v219_v48 = vmul.f32 %v217_v45, %v170_v19 }
 0x197   :  { %v228_v50 = vsel %vm77_vm1, %v658_v46, 0.0  ;;  %v221_v51 = vadd.f32 %v219_v48, %v215_v47 }
 0x198   :  { %229 = vadd.xlane.f32.xlu1 %v228_v50 }
 0x199   :  { %v665_v52 = vadd.f32 %v223_v49, %v221_v51 }
 0x19b   :  { %v231_v53 = vsel %vm77_vm1, %v665_v52, 0.0 }
 0x19c   :  { %232 = vadd.xlane.f32.xlu1 %v231_v53 }
 0x225   :  { %v230_v54 = vpop.xlane.xlu1 %229 }
 0x226   :  { %v235_v55 = vmul.f32 0.03125, %v230_v54 }
 0x228   :  { %v237_v56 = vsub.f32 %v658_v46, %v235_v55 }
 0x229   :  { %v233_v57 = vpop.xlane.xlu1 %232 }
 0x22a   :  { %v236_v58 = vmul.f32 0.03125, %v233_v57  ;;  %v239_v59 = vmul.f32 %v237_v56, %v237_v56 }
 0x22c   :  { %v238_v60 = vsub.f32 %v665_v52, %v236_v58  ;;  %v241_v61 = vsel %vm77_vm1, %v239_v59, 0.0 }
 0x22d   :  { %242 = vadd.xlane.f32.xlu0 %v241_v61 }
 0x22e   :  { %v240_v62 = vmul.f32 %v238_v60, %v238_v60 }
 0x230   :  { %v244_v63 = vsel %vm77_vm1, %v240_v62, 0.0 }
 0x231   :  { %245 = vadd.xlane.f32.xlu1 %v244_v63 }
 0x2ba   :  { %v243_v5 = vpop.xlane.xlu0 %242 }
 0x2bb   :  { %v247_v6 = vmul.f32 0.03125, %v243_v5 }
 0x2bd   :  { %v249_v7 = vadd.f32 1e-06, %v247_v6 }
 0x2be   :  { %v246_v8 = vpop.xlane.xlu1 %245 }
 0x2bf   :  { %529 = vrsqrt.f32 %v249_v7  ;;  %v248_v9 = vmul.f32 0.03125, %v246_v8 }
 0x2c1   :  { %v250_v10 = vadd.f32 1e-06, %v248_v9 }
 0x2c3   :  { %531 = vrsqrt.f32 %v250_v10 }
 0x2c9   :  { %v530_v11 = vpop.eup %529 }
 0x2ca   :  { %v253_v12 = vmul.f32 %v530_v11, %v237_v56 }
 0x2cc   :  { %v261_v15 = vmul.f32 %v447_v13, %v253_v12 }
 0x2cd   :  { %v532_v14 = vpop.eup %531 }
 0x2ce   :  { %v254_v16 = vmul.f32 %v532_v14, %v238_v60  ;;  %v269_v19 = vadd.f32 %v448_v17, %v261_v15 }
 0x2d0   :  { %v262_v18 = vmul.f32 %v447_v13, %v254_v16 }
 0x2d2   :  { %v270_v20 = vadd.f32 %v448_v17, %v262_v18 }
 0x2d4   :  { %v271_v21 = vpack.c.bf16 %v270_v20, %v269_v19 }
 0x2d6   :  { %494 = vmatmul.mubr.msk.bf16.vlgmr.msra.gmra.mrb[4].mxu0 %vm77_vm1, %v271_v21 }
 0x3a9   :  { %v332_v25 = vpop.f32.mrb[4].mxu0 }
 0x3aa   :  { %v333_v26 = vadd.f32 %v449_v24, %v332_v25  ;;  %v495_v27 = vpop.f32.mrb[5].mxu0 }
 0x3ab   :  { %v335_v28 = vpop.f32.mrb[6].mxu0 }
 0x3ac   :  { %v336_v29 = vadd.f32 %v449_v24, %v335_v28  ;;  %v496_v30 = vpop.f32.mrb[7].mxu0  ;;  %v339_v31 = vmax.f32 %v333_v26, 0.0 }
 0x3ae   :  { %v340_v32 = vmax.f32 %v336_v29, 0.0 }
 0x3b0   :  { %v341_v33 = vpack.c.bf16 %v340_v32, %v339_v31 }
 0x3b2   :  { %506 = vmatmul.mubr.msk.bf16.vlgmr.msra.gmra.mrb[4].mxu1 %vm381_vm3, %v341_v33 }
 0x485   :  { %v419_v34 = vpop.f32.mrb[4].mxu1 }
 0x486   :  { %v420_v35 = vadd.f32 %v453_v0, %v419_v34  ;;  %v507_v36 = vpop.f32.mrb[5].mxu1 }
 0x487   :  { %v422_v37 = vpop.f32.mrb[6].mxu1 }
 0x488   :  { %v426_v38 = vadd.f32 %v420_v35, %v658_v46  ;;  %v423_v39 = vadd.f32 %v453_v0, %v422_v37  ;;  %v508_v40 = vpop.f32.mrb[7].mxu1 }
 0x48a   :  { %428 = vst.msk [vmem:[%s732_s13] sm:$0xff] %vm77_vm1, %v426_v38  ;;  %v427_v41 = vadd.f32 %v423_v39, %v665_v52 }
 0x48c   :  { %429 = vst.msk [vmem:[%s732_s13 + $0x8] sm:$0xff] %vm77_vm1, %v427_v41 }

// kernel: transformer_decoder_forward.17
= control target key start
LH: loop header
LB: loop body
LE: loop exit
PB: predicated region body
PF: predicated region fallthrough
CT: control target
= control target key end

     0   :  { %s1551_s21 = smov 0   ;;  %s1553_s22 = smov 0   ;;  %s1744_s0 = inlined_call_operand.vmem [shape: bf16[2,8,32], index: 0, kind: input, shape index: {}]   ;;  %s1745_s1 = inlined_call_operand.vmem [shape: bf16[2,16,32], index: 1, kind: input, shape index: {}]   ;;  %s1746_s2 = inlined_call_operand.vmem [shape: bf16[2,16,32], index: 2, kind: input, shape index: {}]   ;;  %s1747_s3 = inlined_call_operand.vmem [shape: s32[2,1,16], index: 3, kind: input, shape index: {}]   ;;  %s1748_s4 = inlined_call_operand.vmem [shape: s32[2,1,16], index: 4, kind: input, shape index: {}]   ;;  %s1749_s5 = inlined_call_operand.vmem [shape: bf16[2,8,32], index: 5, kind: output, shape index: {0}]   ;;  %s1750_s6 = inlined_call_operand.vmem [shape: bf16[2,8,32], index: 6, kind: output, shape index: {1}]  }
   0x1   :  { %s1555_s23 = smov 0  }
   0x2 LB: > { %s29_s24 = sadd.s32 1, %s1502_s22  ;;  %p1282_p0 = scmp.ge.s32.totalorder %s1506_s23, 1  ;;  %s1506_s23 = sphi %s1555_s23, %s17_s23   ;;  %s1502_s22 = sphi %s1553_s22, %s1752_s22   ;;  %s1498_s21 = sphi %s1551_s21, %s1751_s21  }
   0x3   : > { %p31_p1 = scmp.ge.s32.totalorder %s29_s24, 2  ;;  %p271_p2 = scmp.lt.s32.totalorder %s1506_s23, 3 }
   0x5   : > { %s1754_s24 = smov (%p31_p1, %s29_s24), 0  ;;  %p272_p3 = pnand %p1282_p0, %p271_p2 }
   0x6   : > { %p328_p4 = scmp.lt.s32.totalorder (!%p272_p3), %s1498_s21, 1  ;;  %v1508_v0 = vmov (!%p272_p3), 0.0   ;;  %vm1509_vm0 = vmmov (!%p272_p3), 0   ;;  %vm385_vm1 = vcmask (!%p272_p3), 64512   ;;  %s1510_s12 = smov (!%p272_p3), 120   ;;  %v434_v10 = vlaneseq (!%p272_p3) }
   0x7   : > { %275 = sbr.rel (%p272_p3) target bundleno = 2084 (0x824), region = 40  ;;  %1345 = vmatprep.subr.bf16.mxu0 (!%p272_p3), %v1508_v0  ;;  %1347 = vmatprep.mubr.msk.bf16.mxu0 (!%p272_p3), %vm1509_vm0, %v1508_v0  ;;  %vm440_vm7 = vcmask (!%p272_p3), 130048   ;;  %s1511_s19 = smov (!%p272_p3), 112   ;;  %vm521_vm8 = vcmask (!%p272_p3), 60416   ;;  %vm701_vm9 = vcmask (!%p272_p3), 126016   ;;  %vm884_vm10 = vcmask (!%p272_p3), 191616  }
   0x8   : > { %1351 = vmatprep.subr.bf16.mxu1 (!%p272_p3), %v1508_v0  ;;  %1353 = vmatprep.mubr.msk.bf16.mxu1 (!%p272_p3), %vm1509_vm0, %v1508_v0  ;;  %v435_v11 = vshrl.u32 (!%p272_p3), %v434_v10, 7  ;;  %s1513_s30 = smov (!%p272_p3), 8   ;;  %s1514_s7 = smov (!%p272_p3), 16   ;;  %vm1067_vm11 = vcmask (!%p272_p3), 257216  }
   0xa   : > { %v436_v12 = vsub.s32 (!%p272_p3), 0, %v435_v11 }
   0xe   : > { %s1756_s21 = smov (!%p328_p4, %s1498_s21), 1 }
   0xf   : > { %s1313_s25 = sshll.u32 %s1756_s21, 3  ;;  %s1579_s26 = sshll.u32 %s1756_s21, 2 }
  0x10   : > { %s339_s29 = scalar_lea.vmem %s1745_s1, %s1313_s25  ;;  %s1587_s8 = scalar_lea.vmem %s1746_s2, %s1313_s25 }
  0x11   : > { %s334_s11 = scalar_lea.vmem %s1744_s0, %s1579_s26  ;;  %v1593_v1 = vld [vmem:[%s339_s29] sm:$0xff]   ;;  %s347_s15 = scalar_lea.vmem %s1747_s3, %s1756_s21 }
  0x12   : > { %v366_v2 = vld [vmem:[%s334_s11] sm:$0xf]  ;;  %574 = vrot.lane.b32.xlu0 %v1593_v1, %s1510_s12  ;;  %v390_v3 = vsel %vm385_vm1, %v1593_v1, 0  ;;  %s350_s18 = scalar_lea.vmem %s1748_s4, %s1756_s21  ;;  %s1671_s25 = scalar_lea.vmem %s1749_s5, %s1579_s26 }
  0x13   : > { %v1599_v4 = vcombine.low %v366_v2, %v366_v2  ;;  %1346 = vmatpush3.bf16.xpose.msra.mxu0 %v390_v3  ;;  %v371_v8 = vld [vmem:[%s347_s15] sm:$0x1]  ;;  %s1678_s29 = scalar_lea.vmem %s1750_s6, %s1579_s26  ;;  %s1512_s26 = smov 104  }
  0x14   : > { %1363 = vmatprep.subr.bf16.mxu0 %v1508_v0  ;;  %v373_v9 = vld [vmem:[%s350_s18] sm:$0x1]  ;;  %vm372_vm2 = vcmp.gt.s32.totalorder %v371_v8, 0 }
  0x15   : > { %vm374_vm3 = vcmp.ne.s32.totalorder %v373_v9, 1  ;;  %vm376_vm4 = vcmp.ne.s32.totalorder %v373_v9, 2  ;;  %v1631_v26 = vld [vmem:[%s1587_s8] sm:$0xff]   ;;  %s1515_s8 = smov 24  }
  0x16   : > { %572 = vrot.lane.b32.xlu0 %v1599_v4, %s1510_s12  ;;  %vm375_vm5 = vmor %vm372_vm2, %vm374_vm3  ;;  %1352 = vmatpush3.bf16.msra.mxu1 %v1631_v26 }
  0x17   : > { %vm377_vm6 = vmor %vm372_vm2, %vm376_vm4  ;;  %v378_v13 = vsel %vm375_vm5, -1e+18, %v1508_v0  ;;  %1357 = vmatprep.subr.bf16.mxu1 %v1508_v0 }
  0x18   : > { %v379_v14 = vsel %vm377_vm6, -1e+18, %v1508_v0  ;;  %v1622_v15 = vrot.slane %v378_v13, %v436_v12 }
  0x19   : > { %v1624_v16 = vrot.slane %v379_v14, %v436_v12 }
  0x1a   : > { %1348 = vmatmul.mubr.msk.bf16.vlgmr.msra.gmra.mrb[0].mxu0 %vm385_vm1, %v366_v2 }
  0x1b   : > { %1365 = vmatprep.mubr.msk.bf16.mxu0 %vm1509_vm0, %v1508_v0 }
  0x84   : > { %v575_v5 = vpop.permute.xlu0 %574 }
  0x85   : > { %v580_v6 = vsel %vm385_vm1, %v575_v5, 0 }
  0x86   : > { %1364 = vmatpush3.bf16.xpose.msra.mxu0 %v580_v6 }
  0x87   : > { %1375 = vmatprep.subr.bf16.mxu0 %v1508_v0 }
  0x88   : > { %v573_v7 = vpop.permute.xlu0 %572 }
  0x8d   : > { %1366 = vmatmul.mubr.msk.bf16.vlgmr.msra.gmra.mrb[4].mxu0 %vm385_vm1, %v573_v7 }
  0x8e   : > { %1377 = vmatprep.mubr.msk.bf16.mxu0 %vm1509_vm0, %v1508_v0 }
  0xed   : > { %v426_v17 = vpop.f32.mrb[0].mxu0 }
  0xee   : > { %v432_v18 = vmul.f32 0.35355338, %v426_v17  ;;  %v1349_v19 = vpop.f32.mrb[1].mxu0 }
  0xef   : > { %v429_v20 = vpop.f32.mrb[2].mxu0 }
  0xf0   : > { %v439_v21 = vadd.f32 %v1622_v15, %v432_v18  ;;  %v458_v22 = vadd.f32 %v1624_v16, %v432_v18  ;;  %v1350_v23 = vpop.f32.mrb[3].mxu0 }
  0xf2   : > { %v441_v24 = vsel %vm440_vm7, %v439_v21, -inf  ;;  %v459_v25 = vsel %vm440_vm7, %v458_v22, -inf }
  0xf3   : > { %442 = vmax.xlane.f32.xlu1 %v441_v24 }
  0xf7   : > { %460 = vmax.xlane.f32.xlu1 %v459_v25 }
 0x160   : > { %v616_v27 = vpop.f32.mrb[4].mxu0 }
 0x161   : > { %v622_v28 = vmul.f32 0.35355338, %v616_v27  ;;  %v1367_v29 = vpop.f32.mrb[5].mxu0 }
 0x162   : > { %v619_v30 = vpop.f32.mrb[6].mxu0 }
 0x163   : > { %v1368_v31 = vpop.f32.mrb[7].mxu0  ;;  %v623_v32 = vadd.f32 %v622_v28, %v1622_v15  ;;  %v635_v54 = vadd.f32 %v622_v28, %v1624_v16 }
 0x165   : > { %v624_v33 = vsel %vm440_vm7, %v623_v32, -inf  ;;  %v636_v55 = vsel %vm440_vm7, %v635_v54, -inf }
 0x166   : > { %625 = vmax.xlane.f32.xlu0 %v624_v33 }
 0x17c   : > { %755 = vrot.lane.b32.xlu0 %v1599_v4, %s1511_s19 }
 0x180   : > { %v443_v34 = vpop.xlane.xlu1 %442 }
 0x181   : > { %v444_v35 = vsub.f32 %v439_v21, %v443_v34 }
 0x183   : > { %v445_v36 = vmul.f32 1.442695, %v444_v35 }
 0x184   : > { %v461_v39 = vpop.xlane.xlu1 %460 }
 0x185   : > { %1452 = vpow2.f32 %v445_v36  ;;  %v462_v40 = vsub.f32 %v458_v22, %v461_v39 }
 0x187   : > { %v463_v41 = vmul.f32 1.442695, %v462_v40 }
 0x189   : > { %1454 = vpow2.f32 %v463_v41 }
 0x18f   : > { %v1453_v37 = vpop.eup %1452 }
 0x190   : > { %v447_v38 = vsel %vm440_vm7, %v1453_v37, 0.0 }
 0x191   : > { %448 = vadd.xlane.f32.xlu1 %v447_v38 }
 0x193   : > { %v1455_v42 = vpop.eup %1454 }
 0x194   : > { %v465_v43 = vsel %vm440_vm7, %v1455_v42, 0.0 }
 0x1a2   : > { %648 = vrot.lane.b32.xlu1 %v1631_v26, %s1510_s12 }
 0x1c6   : > { %466 = vadd.xlane.f32.xlu1 %v465_v43 }
 0x1f3   : > { %v626_v44 = vpop.xlane.xlu0 %625 }
 0x1f4   : > { %v627_v45 = vsub.f32 %v623_v32, %v626_v44 }
 0x1f6   : > { %v628_v46 = vmul.f32 1.442695, %v627_v45 }
 0x1f7   : > { %v756_v5 = vpop.permute.xlu0 %755 }
 0x1f8   : > { %1456 = vpow2.f32 %v628_v46 }
 0x202   : > { %v1457_v47 = vpop.eup %1456 }
 0x203   : > { %v630_v48 = vsel %vm440_vm7, %v1457_v47, 0.0 }
 0x204   : > { %631 = vadd.xlane.f32.xlu1 %v630_v48 }
 0x215   : > { %757 = vrot.lane.b32.xlu1 %v1593_v1, %s1511_s19 }
 0x21e   : > { %v449_v49 = vpop.xlane.xlu1 %448 }
 0x21f   : > { %1458 = vrcp.f32 %v449_v49 }
 0x222   : > { %v649_v50 = vpop.permute.xlu1 %648 }
 0x223   : > { %1376 = vmatpush3.bf16.msra.mxu0 %v649_v50 }
 0x224   : > { %1387 = vmatprep.subr.bf16.mxu0 %v1508_v0 }
 0x229   : > { %v1459_v51 = vpop.eup %1458 }
 0x22a   : > { %v451_v52 = vmul.f32 %v1459_v51, %v1453_v37 }
 0x22c   : > { %v470_v53 = vpack.c.bf16 %v451_v52, %v451_v52 }
 0x22e   : > { %1354 = vmatmul.mubr.msk.bf16.vlgmr.msra.gmra.mrb[0].mxu1 %vm440_vm7, %v470_v53 }
 0x22f   : > { %1358 = vmatpush3.bf16.msra.mxu1 %v1631_v26  ;;  %1359 = vmatprep.mubr.msk.bf16.mxu1 %vm1509_vm0, %v1508_v0 }
 0x230   : > { %1369 = vmatprep.subr.bf16.mxu1 %v1508_v0 }
 0x239   : > { %637 = vmax.xlane.f32.xlu1 %v636_v55 }
 0x253   : > { %v467_v56 = vpop.xlane.xlu1 %466 }
 0x254   : > { %1460 = vrcp.f32 %v467_v56 }
 0x25e   : > { %v1461_v57 = vpop.eup %1460 }
 0x25f   : > { %v469_v58 = vmul.f32 %v1461_v57, %v1455_v42 }
 0x261   : > { %v523_v59 = vpack.c.bf16 %v469_v58, %v469_v58 }
 0x263   : > { %1360 = vmatmul.mubr.msk.bf16.vlgmr.msra.gmra.mrb[4].mxu1 %vm440_vm7, %v523_v59 }
 0x264   : > { %1370 = vmatpush3.bf16.msra.mxu1 %v649_v50  ;;  %1371 = vmatprep.mubr.msk.bf16.mxu1 %vm1509_vm0, %v1508_v0 }
 0x265   : > { %1381 = vmatprep.subr.bf16.mxu1 %v1508_v0 }
 0x291   : > { %v632_v60 = vpop.xlane.xlu1 %631 }
 0x292   : > { %1462 = vrcp.f32 %v632_v60 }
 0x295   : > { %v758_v62 = vpop.permute.xlu1 %757 }
 0x296   : > { %v763_v2 = vsel %vm385_vm1, %v758_v62, 0 }
 0x29c   : > { %v1463_v61 = vpop.eup %1462 }
 0x29d   : > { %v634_v63 = vmul.f32 %v1463_v61, %v1457_v47 }
 0x29f   : > { %v647_v3 = vpack.c.bf16 %v634_v63, %v634_v63 }
 0x2a1   : > { %1372 = vmatmul.mubr.msk.bf16.vlgmr.msra.gmra.mrb[8].mxu1 %vm440_vm7, %v647_v3 }
 0x2a2   : > { %1382 = vmatpush3.bf16.xpose.msra.mxu1 %v763_v2  ;;  %1383 = vmatprep.mubr.msk.bf16.mxu1 %vm1509_vm0, %v1508_v0 }
 0x2a3   : > { %1393 = vmatprep.subr.bf16.mxu1 %v1508_v0 }
 0x2a9   : > { %1384 = vmatmul.mubr.msk.bf16.vlgmr.msra.gmra.mrb[12].mxu1 %vm385_vm1, %v756_v5 }
 0x2aa   : > { %1395 = vmatprep.mubr.msk.bf16.mxu1 %vm1509_vm0, %v1508_v0 }
 0x2c6   : > { %v638_v6 = vpop.xlane.xlu1 %637 }
 0x2c7   : > { %v639_v7 = vsub.f32 %v635_v54, %v638_v6 }
 0x2c9   : > { %v640_v8 = vmul.f32 1.442695, %v639_v7 }
 0x2cb   : > { %1464 = vpow2.f32 %v640_v8 }
 0x2d5   : > { %v1465_v9 = vpop.eup %1464 }
 0x2d6   : > { %v642_v10 = vsel %vm440_vm7, %v1465_v9, 0.0 }
 0x2d7   : > { %643 = vadd.xlane.f32.xlu1 %v642_v10 }
 0x301   : > { %v514_v11 = vpop.f32.mrb[0].mxu1 }
 0x302   : > { %v520_v12 = vpack.c.bf16 %v514_v11, %v514_v11  ;;  %v1355_v13 = vpop.f32.mrb[1].mxu1 }
 0x303   : > { %v517_v14 = vpop.f32.mrb[2].mxu1 }
 0x304   : > { %522 = vst.msk [vmem:[%s1671_s25] sm:$0xf] %vm521_vm8, %v520_v12  ;;  %v1356_v17 = vpop.f32.mrb[3].mxu1 }
 0x336   : > { %v561_v18 = vpop.f32.mrb[4].mxu1 }
 0x337   : > { %v567_v19 = vpack.c.bf16 %v561_v18, %v561_v18  ;;  %v1361_v20 = vpop.f32.mrb[5].mxu1 }
 0x338   : > { %v564_v21 = vpop.f32.mrb[6].mxu1 }
 0x339   : > { %568 = vst.msk [vmem:[%s1678_s29] sm:$0xf] %vm521_vm8, %v567_v19  ;;  %v1362_v22 = vpop.f32.mrb[7].mxu1 }
 0x364   : > { %v644_v23 = vpop.xlane.xlu1 %643 }
 0x365   : > { %1466 = vrcp.f32 %v644_v23 }
 0x36f   : > { %v1467_v24 = vpop.eup %1466 }
 0x370   : > { %v646_v25 = vmul.f32 %v1467_v24, %v1465_v9 }
 0x372   : > { %v703_v27 = vpack.c.bf16 %v646_v25, %v646_v25 }
 0x374   : > { %v1681_v28 = vpop.f32.mrb[8].mxu1  ;;  %1378 = vmatmul.mubr.msk.bf16.vlgmr.msra.gmra.mrb[8].mxu0 %vm440_vm7, %v703_v27 }
 0x375   : > { %v1373_v29 = vpop.f32.mrb[9].mxu1  ;;  %1389 = vmatprep.mubr.msk.bf16.mxu0 %vm1509_vm0, %v1508_v0 }
 0x376   : > { %v691_v30 = vpop.f32.mrb[10].mxu1  ;;  %v1315_v29 = vpack.c.bf16 %v1681_v28, %v1681_v28 }
 0x377   : > { %v1374_v31 = vpop.f32.mrb[11].mxu1 }
 0x37c   : > { %v799_v32 = vpop.f32.mrb[12].mxu1 }
 0x37d   : > { %v805_v33 = vmul.f32 0.35355338, %v799_v32  ;;  %v1385_v34 = vpop.f32.mrb[13].mxu1 }
 0x37e   : > { %v802_v35 = vpop.f32.mrb[14].mxu1 }
 0x37f   : > { %v1386_v36 = vpop.f32.mrb[15].mxu1  ;;  %v806_v37 = vadd.f32 %v805_v33, %v1622_v15 }
 0x381   : > { %v807_v38 = vsel %vm440_vm7, %v806_v37, -inf }
 0x382   : > { %808 = vmax.xlane.f32.xlu0 %v807_v38 }
 0x398   : > { %940 = vrot.lane.b32.xlu0 %v1593_v1, %s1512_s26  ;;  %v818_v1 = vadd.f32 %v805_v33, %v1624_v16 }
 0x39a   : > { %v819_v48 = vsel %vm440_vm7, %v818_v1, -inf }
 0x40f   : > { %v809_v39 = vpop.xlane.xlu0 %808 }
 0x410   : > { %v810_v40 = vsub.f32 %v806_v37, %v809_v39 }
 0x412   : > { %v811_v41 = vmul.f32 1.442695, %v810_v40 }
 0x413   : > { %v941_v51 = vpop.permute.xlu0 %940 }
 0x414   : > { %1468 = vpow2.f32 %v811_v41  ;;  %v946_v53 = vsel %vm385_vm1, %v941_v51, 0 }
 0x41e   : > { %v1469_v42 = vpop.eup %1468 }
 0x41f   : > { %v813_v43 = vsel %vm440_vm7, %v1469_v42, 0.0 }
 0x420   : > { %814 = vadd.xlane.f32.xlu1 %v813_v43 }
 0x431   : > { %831 = vrot.lane.b32.xlu1 %v1631_v26, %s1511_s19 }
 0x435   : > { %938 = vrot.lane.b32.xlu1 %v1599_v4, %s1512_s26 }
 0x447   : > { %v1695_v44 = vpop.f32.mrb[8].mxu0 }
 0x448   : > { %v1379_v45 = vpop.f32.mrb[9].mxu0  ;;  %v1316_v30 = vpack.c.bf16 %v1695_v44, %v1695_v44 }
 0x449   : > { %v744_v46 = vpop.f32.mrb[10].mxu0 }
 0x44a   : > { %v1380_v47 = vpop.f32.mrb[11].mxu0 }
 0x459   : > { %820 = vmax.xlane.f32.xlu1 %v819_v48 }
 0x4ad   : > { %v815_v49 = vpop.xlane.xlu1 %814 }
 0x4ae   : > { %1470 = vrcp.f32 %v815_v49 }
 0x4b1   : > { %v832_v50 = vpop.permute.xlu1 %831 }
 0x4b2   : > { %1388 = vmatpush3.bf16.msra.mxu0 %v832_v50  ;;  %1394 = vmatpush3.bf16.msra.mxu1 %v832_v50 }
 0x4b3   : > { %1399 = vmatprep.subr.bf16.mxu0 %v1508_v0  ;;  %1405 = vmatprep.subr.bf16.mxu1 %v1508_v0 }
 0x4b5   : > { %v939_v55 = vpop.permute.xlu1 %938 }
 0x4b8   : > { %v1471_v4 = vpop.eup %1470 }
 0x4b9   : > { %v817_v52 = vmul.f32 %v1471_v4, %v1469_v42 }
 0x4bb   : > { %v830_v54 = vpack.c.bf16 %v817_v52, %v817_v52 }
 0x4bd   : > { %1390 = vmatmul.mubr.msk.bf16.vlgmr.msra.gmra.mrb[12].mxu0 %vm440_vm7, %v830_v54 }
 0x4be   : > { %1400 = vmatpush3.bf16.xpose.msra.mxu0 %v946_v53  ;;  %1401 = vmatprep.mubr.msk.bf16.mxu0 %vm1509_vm0, %v1508_v0 }
 0x4bf   : > { %1411 = vmatprep.subr.bf16.mxu0 %v1508_v0 }
 0x4c5   : > { %1402 = vmatmul.mubr.msk.bf16.vlgmr.msra.gmra.mrb[16].mxu0 %vm385_vm1, %v939_v55 }
 0x4c6   : > { %1413 = vmatprep.mubr.msk.bf16.mxu0 %vm1509_vm0, %v1508_v0 }
 0x4e6   : > { %v821_v56 = vpop.xlane.xlu1 %820 }
 0x4e7   : > { %v822_v57 = vsub.f32 %v818_v1, %v821_v56 }
 0x4e9   : > { %v823_v58 = vmul.f32 1.442695, %v822_v57 }
 0x4eb   : > { %1472 = vpow2.f32 %v823_v58 }
 0x4f5   : > { %v1473_v11 = vpop.eup %1472 }
 0x4f6   : > { %v825_v12 = vsel %vm440_vm7, %v1473_v11, 0.0 }
 0x590   : > { %v871_v59 = vpop.f32.mrb[12].mxu0 }
 0x591   : > { %v1391_v60 = vpop.f32.mrb[13].mxu0  ;;  %v1317_v31 = vpack.c.bf16 %v871_v59, %v871_v59 }
 0x592   : > { %v874_v61 = vpop.f32.mrb[14].mxu0 }
 0x593   : > { %v1392_v62 = vpop.f32.mrb[15].mxu0 }
 0x598   : > { %v982_v63 = vpop.f32.mrb[16].mxu0 }
 0x599   : > { %v988_v2 = vmul.f32 0.35355338, %v982_v63  ;;  %v1403_v3 = vpop.f32.mrb[17].mxu0 }
 0x59a   : > { %v985_v5 = vpop.f32.mrb[18].mxu0 }
 0x59b   : > { %v1404_v6 = vpop.f32.mrb[19].mxu0  ;;  %v1001_v7 = vadd.f32 %v988_v2, %v1624_v16  ;;  %v989_v8 = vadd.f32 %v988_v2, %v1622_v15 }
 0x59d   : > { %v1002_v9 = vsel %vm440_vm7, %v1001_v7, -inf  ;;  %v990_v10 = vsel %vm440_vm7, %v989_v8, -inf }
 0x59e   : > { %1003 = vmax.xlane.f32.xlu1 %v1002_v9  ;;  %991 = vmax.xlane.f32.xlu0 %v990_v10 }
 0x5a2   : > { %826 = vadd.xlane.f32.xlu0 %v825_v12 }
 0x62b   : > { %v1004_v13 = vpop.xlane.xlu1 %1003  ;;  %v992_v14 = vpop.xlane.xlu0 %991 }
 0x62c   : > { %v1005_v17 = vsub.f32 %v1001_v7, %v1004_v13  ;;  %v993_v18 = vsub.f32 %v989_v8, %v992_v14 }
 0x62e   : > { %v1006_v19 = vmul.f32 1.442695, %v1005_v17  ;;  %v994_v20 = vmul.f32 1.442695, %v993_v18 }
 0x62f   : > { %v827_v21 = vpop.xlane.xlu0 %826 }
 0x630   : > { %1474 = vpow2.f32 %v1006_v19 }
 0x631   : > { %1476 = vpow2.f32 %v994_v20 }
 0x632   : > { %1478 = vrcp.f32 %v827_v21 }
 0x63a   : > { %v1475_v15 = vpop.eup %1474 }
 0x63b   : > { %v1477_v16 = vpop.eup %1476  ;;  %v1008_v22 = vsel %vm440_vm7, %v1475_v15, 0.0 }
 0x63c   : > { %v1479_v23 = vpop.eup %1478  ;;  %1009 = vadd.xlane.f32.xlu0 %v1008_v22  ;;  %v996_v24 = vsel %vm440_vm7, %v1477_v16, 0.0 }
 0x63d   : > { %v829_v25 = vmul.f32 %v1479_v23, %v1473_v11  ;;  %997 = vadd.xlane.f32.xlu1 %v996_v24 }
 0x63f   : > { %v886_v27 = vpack.c.bf16 %v829_v25, %v829_v25 }
 0x641   : > { %1396 = vmatmul.mubr.msk.bf16.vlgmr.msra.gmra.mrb[16].mxu1 %vm440_vm7, %v886_v27 }
 0x642   : > { %1407 = vmatprep.mubr.msk.bf16.mxu1 %vm1509_vm0, %v1508_v0 }
 0x64e   : > { %1014 = vrot.lane.b32.xlu1 %v1631_v26, %s1512_s26 }
 0x652   : > { %751 = vrot.lane.b32.xlu1 %v1316_v30, %s1513_s30  ;;  %698 = vrot.lane.b32.xlu0 %v1315_v29, %s1513_s30 }
 0x656   : > { %881 = vrot.lane.b32.xlu1 %v1317_v31, %s1514_s7 }
 0x6c9   : > { %v1010_v32 = vpop.xlane.xlu0 %1009 }
 0x6ca   : > { %v998_v33 = vpop.xlane.xlu1 %997  ;;  %1480 = vrcp.f32 %v1010_v32 }
 0x6cb   : > { %1482 = vrcp.f32 %v998_v33 }
 0x6cd   : > { %v699_v0 = vpop.permute.xlu0 %698 }
 0x6ce   : > { %v1015_v26 = vpop.permute.xlu1 %1014  ;;  %702 = vst.msk [vmem:[%s1671_s25] sm:$0xf] %vm701_vm9, %v699_v0 }
 0x6cf   : > { %1406 = vmatpush3.bf16.msra.mxu1 %v1015_v26  ;;  %1412 = vmatpush3.bf16.msra.mxu0 %v1015_v26 }
 0x6d2   : > { %v752_v28 = vpop.permute.xlu1 %751 }
 0x6d3   : > { %754 = vst.msk [vmem:[%s1678_s29] sm:$0xf] %vm701_vm9, %v752_v28 }
 0x6d4   : > { %v1481_v34 = vpop.eup %1480 }
 0x6d5   : > { %v1483_v35 = vpop.eup %1482  ;;  %v1012_v36 = vmul.f32 %v1481_v34, %v1475_v15 }
 0x6d6   : > { %v1000_v37 = vmul.f32 %v1483_v35, %v1477_v16  ;;  %v882_v38 = vpop.permute.xlu1 %881 }
 0x6d7   : > { %885 = vst.msk [vmem:[%s1671_s25] sm:$0xf] %vm884_vm10, %v882_v38  ;;  %v1069_v39 = vpack.c.bf16 %v1012_v36, %v1012_v36 }
 0x6d8   : > { %v1013_v40 = vpack.c.bf16 %v1000_v37, %v1000_v37 }
 0x6d9   : > { %1414 = vmatmul.mubr.msk.bf16.vlgmr.msra.gmra.mrb[20].mxu0 %vm440_vm7, %v1069_v39 }
 0x6da   : > { %1408 = vmatmul.mubr.msk.bf16.vlgmr.msra.gmra.mrb[20].mxu1 %vm440_vm7, %v1013_v40 }
 0x714   : > { %v924_v41 = vpop.f32.mrb[16].mxu1 }
 0x715   : > { %v1318_v42 = vpack.c.bf16 %v924_v41, %v924_v41  ;;  %v1397_v43 = vpop.f32.mrb[17].mxu1 }
 0x716   : > { %v927_v44 = vpop.f32.mrb[18].mxu1 }
 0x717   : > { %934 = vrot.lane.b32.xlu0 %v1318_v42, %s1514_s7  ;;  %v1398_v45 = vpop.f32.mrb[19].mxu1 }
 0x789   : > { %v935_v46 = vpop.permute.xlu0 %934 }
 0x78a   : > { %937 = vst.msk [vmem:[%s1678_s29] sm:$0xf] %vm884_vm10, %v935_v46 }
 0x7ac   : > { %v1107_v47 = vpop.f32.mrb[20].mxu0 }
 0x7ad   : > { %v1054_v1 = vpop.f32.mrb[20].mxu1  ;;  %v1320_v48 = vpack.c.bf16 %v1107_v47, %v1107_v47  ;;  %v1415_v49 = vpop.f32.mrb[21].mxu0 }
 0x7ae   : > { %v1319_v50 = vpack.c.bf16 %v1054_v1, %v1054_v1  ;;  %v1409_v4 = vpop.f32.mrb[21].mxu1  ;;  %v1110_v51 = vpop.f32.mrb[22].mxu0 }
 0x7af   : > { %v1057_v52 = vpop.f32.mrb[22].mxu1  ;;  %1117 = vrot.lane.b32.xlu0 %v1320_v48, %s1515_s8  ;;  %v1416_v53 = vpop.f32.mrb[23].mxu0 }
 0x7b0   : > { %1064 = vrot.lane.b32.xlu1 %v1319_v50, %s1515_s8  ;;  %v1410_v54 = vpop.f32.mrb[23].mxu1 }
 0x821   : > { %v1118_v55 = vpop.permute.xlu0 %1117 }
 0x822   : > { %v1065_v56 = vpop.permute.xlu1 %1064  ;;  %1120 = vst.msk [vmem:[%s1678_s29] sm:$0xf] %vm1067_vm11, %v1118_v55 }
 0x823   : > { %1068 = vst.msk [vmem:[%s1671_s25] sm:$0xf] %vm1067_vm11, %v1065_v56 }
 0x824 PF: > { %s17_s23 = sadd.s32 1, %s1506_s23   ;;  %s1751_s21 = smov %s1502_s22 }
 0x825   : > { %p14_p5 = scmp.ge.s32.totalorder %s17_s23, 4   ;;  %s1752_s22 = smov %s1754_s24 }
 0x827   :  { %16 = sbr.rel (!%p14_p5) target bundleno = 2 (0x2), region = 94 }

// kernel: mul.13
= control target key start
LH: loop header
LB: loop body
LE: loop exit
PB: predicated region body
PF: predicated region fallthrough
CT: control target
= control target key end

     0   :  { %vm7_vm0 = vcmask 64512   ;;  %s39_s0 = inlined_call_operand.vmem [shape: f32[16], index: 0, kind: input, shape index: {}]   ;;  %s40_s1 = inlined_call_operand.vmem [shape: f32[2,8], index: 1, kind: output, shape index: {}]  }
   0x1   :  { %v4_v0 = vld [vmem:[%s39_s0] sm:$0x1]  ;;  %s22_s0 = smov 120  }
   0x2   :  { %5 = vst [vmem:[#allocation1] sm:$0x1] %v4_v0 }
   0x9   :  { %v9_v1 = vld [vmem:[#allocation1] sm:$0x1]  }
   0xa   :  { %v6_v2 = vld [vmem:[#allocation1] sm:$0x1]   ;;  %10 = vrot.lane.b32.xlu0 %v9_v1, %s22_s0 }
   0xb   :  { %8 = vst.msk [vmem:[#allocation0] sm:$0x1] %vm7_vm0, %v6_v2  }
  0x7c   :  { %v11_v3 = vpop.permute.xlu0 %10  }
  0x7d   :  { %14 = vst.msk [vmem:[#allocation0 + $0x1] sm:$0x1] %vm7_vm0, %v11_v3  }
  0x84   :  { %v18_v4 = vld [vmem:[#allocation0] sm:$0x3] }
  0x85   :  { %20 = vst [vmem:[%s40_s1] sm:$0x3] %v18_v4 }

// kernel: transformer_decoder_forward.23
= control target key start
LH: loop header
LB: loop body
LE: loop exit
PB: predicated region body
PF: predicated region fallthrough
CT: control target
= control target key end

     0   :  { %s1939_s30 = smov 0   ;;  %s1941_s10 = smov 0   ;;  %s2278_s0 = inlined_call_operand.vmem [shape: bf16[2,8,32], index: 0, kind: input, shape index: {}]   ;;  %s2279_s1 = inlined_call_operand.vmem [shape: bf16[2,16,32], index: 1, kind: input, shape index: {}]   ;;  %s2280_s2 = inlined_call_operand.vmem [shape: bf16[2,16,32], index: 2, kind: input, shape index: {}]   ;;  %s2281_s3 = inlined_call_operand.vmem [shape: s32[2,1,16], index: 3, kind: input, shape index: {}]   ;;  %s2282_s4 = inlined_call_operand.vmem [shape: s32[2,1,16], index: 4, kind: input, shape index: {}]   ;;  %s2283_s5 = inlined_call_operand.vmem [shape: s32[2,8,16], index: 5, kind: input, shape index: {}]   ;;  %s2284_s6 = inlined_call_operand.vmem [shape: bf16[2,8,32], index: 6, kind: output, shape index: {0}]   ;;  %s2285_s7 = inlined_call_operand.vmem [shape: bf16[2,8,32], index: 7, kind: output, shape index: {1}]   ;;  %s2286_s8 = inlined_call_operand.vmem [shape: f32[2,8,16], index: 8, kind: output, shape index: {2}]   ;;  %s2287_s9 = inlined_call_operand.vmem [shape: f32[2,8,16], index: 9, kind: output, shape index: {3}]  }
   0x1   :  { %s1943_s11 = smov 0  }
   0x2 LB: > { %s32_s12 = sadd.s32 1, %s1873_s10  ;;  %p1632_p0 = scmp.ge.s32.totalorder %s1877_s11, 1  ;;  %s1877_s11 = sphi %s1943_s11, %s20_s11   ;;  %s1873_s10 = sphi %s1941_s10, %s2293_s10   ;;  %s1869_s30 = sphi %s1939_s30, %s2292_s30  }
   0x3   : > { %p34_p1 = scmp.ge.s32.totalorder %s32_s12, 2  ;;  %p368_p2 = scmp.lt.s32.totalorder %s1877_s11, 3 }
   0x5   : > { %s2295_s12 = smov (%p34_p1, %s32_s12), 0  ;;  %p369_p3 = pnand %p1632_p0, %p368_p2 }
   0x6   : > { %p452_p4 = scmp.lt.s32.totalorder (!%p369_p3), %s1869_s30, 1  ;;  %v1879_v0 = vmov (!%p369_p3), 0.0   ;;  %vm1880_vm0 = vmmov (!%p369_p3), 0   ;;  %vm551_vm1 = vcmask (!%p369_p3), 64512   ;;  %s1881_s21 = smov (!%p369_p3), 120   ;;  %vm543_vm2 = vcmask (!%p369_p3), 130048  }
   0x7   : > { %372 = sbr.rel (%p369_p3) target bundleno = 2088 (0x828), region = 44  ;;  %1698 = vmatprep.subr.bf16.mxu0 (!%p369_p3), %v1879_v0  ;;  %1700 = vmatprep.mubr.msk.bf16.mxu0 (!%p369_p3), %vm1880_vm0, %v1879_v0  ;;  %v528_v10 = vlaneseq (!%p369_p3)  ;;  %s1882_s22 = smov (!%p369_p3), 112   ;;  %vm686_vm8 = vcmask (!%p369_p3), 60416   ;;  %vm888_vm14 = vcmask (!%p369_p3), 126016   ;;  %vm1093_vm15 = vcmask (!%p369_p3), 191616  }
   0x8   : > { %1704 = vmatprep.subr.bf16.mxu1 (!%p369_p3), %v1879_v0  ;;  %1706 = vmatprep.mubr.msk.bf16.mxu1 (!%p369_p3), %vm1880_vm0, %v1879_v0 }
   0x9   : > { %v529_v11 = vshrl.u32 (!%p369_p3), %v528_v10, 7 }
   0xb   : > { %v2032_v14 = vsub.s32 (!%p369_p3), 0, %v529_v11 }
   0xe   : > { %s2297_s30 = smov (!%p452_p4, %s1869_s30), 1 }
   0xf   : > { %s1966_s13 = sshll.u32 %s2297_s30, 3  ;;  %s1969_s14 = sshll.u32 %s2297_s30, 2 }
  0x10   : > { %s463_s17 = scalar_lea.vmem %s2279_s1, %s1966_s13  ;;  %s458_s20 = scalar_lea.vmem %s2278_s0, %s1969_s14 }
  0x11   : > { %v1975_v1 = vld [vmem:[%s463_s17] sm:$0xff]   ;;  %s1997_s24 = scalar_lea.vmem %s2286_s8, %s1966_s13  ;;  %s2003_s27 = scalar_lea.vmem %s2287_s9, %s1966_s13 }
  0x12   : > { %v511_v2 = vld [vmem:[%s458_s20] sm:$0xf]  ;;  %761 = vrot.lane.b32.xlu0 %v1975_v1, %s1881_s21  ;;  %v556_v3 = vsel %vm551_vm1, %v1975_v1, 0  ;;  %544 = vst.msk [vmem:[%s1997_s24] sm:$0xff] %vm543_vm2, %v1879_v0  ;;  %545 = vst.msk [vmem:[%s2003_s27] sm:$0xff] %vm543_vm2, %v1879_v0  ;;  %s471_s15 = scalar_lea.vmem %s2281_s3, %s2297_s30  ;;  %s474_s18 = scalar_lea.vmem %s2282_s4, %s2297_s30 }
  0x13   : > { %v1985_v4 = vcombine.low %v511_v2, %v511_v2  ;;  %1699 = vmatpush3.bf16.xpose.msra.mxu0 %v556_v3  ;;  %v516_v8 = vld [vmem:[%s471_s15] sm:$0x1]  ;;  %s468_s20 = scalar_lea.vmem %s2280_s2, %s1966_s13  ;;  %s2106_s25 = scalar_lea.vmem %s2284_s6, %s1969_s14 }
  0x14   : > { %1716 = vmatprep.subr.bf16.mxu0 %v1879_v0  ;;  %v518_v9 = vld [vmem:[%s474_s18] sm:$0x1]  ;;  %vm517_vm3 = vcmp.gt.s32.totalorder %v516_v8, 0  ;;  %s2113_s29 = scalar_lea.vmem %s2285_s7, %s1969_s14  ;;  %s1883_s14 = smov 104  }
  0x15   : > { %vm519_vm4 = vcmp.ne.s32.totalorder %v518_v9, 1  ;;  %vm521_vm5 = vcmp.ne.s32.totalorder %v518_v9, 2  ;;  %v2054_v28 = vld [vmem:[%s468_s20] sm:$0xff]   ;;  %s481_s17 = scalar_lea.vmem %s2283_s5, %s1966_s13  ;;  %s1886_s13 = smov 8  }
  0x16   : > { %759 = vrot.lane.b32.xlu0 %v1985_v4, %s1881_s21  ;;  %vm2024_vm6 = vmor %vm517_vm3, %vm519_vm4  ;;  %1705 = vmatpush3.bf16.msra.mxu1 %v2054_v28  ;;  %s1887_s18 = smov 16   ;;  %s1888_s30 = smov 24  }
  0x17   : > { %vm2028_vm7 = vmor %vm517_vm3, %vm521_vm5  ;;  %v523_v15 = vsel %vm2024_vm6, -1e+18, %v1879_v0  ;;  %1710 = vmatprep.subr.bf16.mxu1 %v1879_v0 }
  0x18   : > { %v524_v16 = vsel %vm2028_vm7, -1e+18, %v1879_v0  ;;  %v2041_v17 = vrot.slane %v523_v15, %v2032_v14 }
  0x19   : > { %v2044_v18 = vrot.slane %v524_v16, %v2032_v14 }
  0x1a   : > { %1701 = vmatmul.mubr.msk.bf16.vlgmr.msra.gmra.mrb[0].mxu0 %vm551_vm1, %v511_v2 }
  0x1b   : > { %1718 = vmatprep.mubr.msk.bf16.mxu0 %vm1880_vm0, %v1879_v0 }
  0x84   : > { %v762_v5 = vpop.permute.xlu0 %761 }
  0x85   : > { %v767_v6 = vsel %vm551_vm1, %v762_v5, 0 }
  0x86   : > { %1717 = vmatpush3.bf16.xpose.msra.mxu0 %v767_v6 }
  0x87   : > { %1728 = vmatprep.subr.bf16.mxu0 %v1879_v0 }
  0x88   : > { %v760_v7 = vpop.permute.xlu0 %759 }
  0x8d   : > { %1719 = vmatmul.mubr.msk.bf16.vlgmr.msra.gmra.mrb[4].mxu0 %vm551_vm1, %v760_v7 }
  0x8e   : > { %1730 = vmatprep.mubr.msk.bf16.mxu0 %vm1880_vm0, %v1879_v0 }
  0xed   : > { %v592_v19 = vpop.f32.mrb[0].mxu0 }
  0xee   : > { %v598_v20 = vmul.f32 0.35355338, %v592_v19  ;;  %v1702_v21 = vpop.f32.mrb[1].mxu0 }
  0xef   : > { %v595_v22 = vpop.f32.mrb[2].mxu0 }
  0xf0   : > { %v605_v23 = vadd.f32 %v2041_v17, %v598_v20  ;;  %v623_v24 = vadd.f32 %v2044_v18, %v598_v20  ;;  %v1703_v25 = vpop.f32.mrb[3].mxu0 }
  0xf2   : > { %v606_v26 = vsel %vm543_vm2, %v605_v23, -inf  ;;  %v624_v27 = vsel %vm543_vm2, %v623_v24, -inf }
  0xf3   : > { %607 = vmax.xlane.f32.xlu1 %v606_v26 }
  0xf7   : > { %625 = vmax.xlane.f32.xlu1 %v624_v27 }
 0x160   : > { %v803_v29 = vpop.f32.mrb[4].mxu0 }
 0x161   : > { %v809_v30 = vmul.f32 0.35355338, %v803_v29  ;;  %v1720_v31 = vpop.f32.mrb[5].mxu0 }
 0x162   : > { %v806_v32 = vpop.f32.mrb[6].mxu0 }
 0x163   : > { %v1721_v33 = vpop.f32.mrb[7].mxu0  ;;  %v810_v34 = vadd.f32 %v809_v30, %v2041_v17  ;;  %v822_v56 = vadd.f32 %v809_v30, %v2044_v18 }
 0x165   : > { %v811_v35 = vsel %vm543_vm2, %v810_v34, -inf  ;;  %v823_v57 = vsel %vm543_vm2, %v822_v56, -inf }
 0x166   : > { %812 = vmax.xlane.f32.xlu0 %v811_v35 }
 0x17c   : > { %964 = vrot.lane.b32.xlu0 %v1985_v4, %s1882_s22 }
 0x180   : > { %v608_v36 = vpop.xlane.xlu1 %607 }
 0x181   : > { %v609_v37 = vsub.f32 %v605_v23, %v608_v36 }
 0x183   : > { %v610_v38 = vmul.f32 1.442695, %v609_v37 }
 0x184   : > { %v626_v41 = vpop.xlane.xlu1 %625 }
 0x185   : > { %1807 = vpow2.f32 %v610_v38  ;;  %v627_v42 = vsub.f32 %v623_v24, %v626_v41 }
 0x187   : > { %v628_v43 = vmul.f32 1.442695, %v627_v42 }
 0x189   : > { %1809 = vpow2.f32 %v628_v43 }
 0x18f   : > { %v1808_v39 = vpop.eup %1807 }
 0x190   : > { %v612_v40 = vsel %vm543_vm2, %v1808_v39, 0.0 }
 0x191   : > { %613 = vadd.xlane.f32.xlu1 %v612_v40 }
 0x193   : > { %v1810_v44 = vpop.eup %1809 }
 0x194   : > { %v630_v45 = vsel %vm543_vm2, %v1810_v44, 0.0 }
 0x1a2   : > { %835 = vrot.lane.b32.xlu1 %v2054_v28, %s1881_s21 }
 0x1c6   : > { %631 = vadd.xlane.f32.xlu1 %v630_v45 }
 0x1f3   : > { %v813_v46 = vpop.xlane.xlu0 %812 }
 0x1f4   : > { %v814_v47 = vsub.f32 %v810_v34, %v813_v46 }
 0x1f6   : > { %v815_v48 = vmul.f32 1.442695, %v814_v47 }
 0x1f7   : > { %v965_v7 = vpop.permute.xlu0 %964 }
 0x1f8   : > { %1811 = vpow2.f32 %v815_v48 }
 0x202   : > { %v1812_v49 = vpop.eup %1811 }
 0x203   : > { %v817_v50 = vsel %vm543_vm2, %v1812_v49, 0.0 }
 0x204   : > { %818 = vadd.xlane.f32.xlu1 %v817_v50 }
 0x215   : > { %966 = vrot.lane.b32.xlu1 %v1975_v1, %s1882_s22 }
 0x21e   : > { %v614_v51 = vpop.xlane.xlu1 %613 }
 0x21f   : > { %1813 = vrcp.f32 %v614_v51 }
 0x222   : > { %v836_v52 = vpop.permute.xlu1 %835 }
 0x223   : > { %1729 = vmatpush3.bf16.msra.mxu0 %v836_v52 }
 0x224   : > { %1740 = vmatprep.subr.bf16.mxu0 %v1879_v0 }
 0x229   : > { %v1814_v53 = vpop.eup %1813 }
 0x22a   : > { %v2070_v54 = vmul.f32 %v1814_v53, %v1808_v39 }
 0x22c   : > { %v635_v55 = vpack.c.bf16 %v2070_v54, %v2070_v54 }
 0x22e   : > { %1707 = vmatmul.mubr.msk.bf16.vlgmr.msra.gmra.mrb[0].mxu1 %vm543_vm2, %v635_v55 }
 0x22f   : > { %1711 = vmatpush3.bf16.msra.mxu1 %v2054_v28  ;;  %1712 = vmatprep.mubr.msk.bf16.mxu1 %vm1880_vm0, %v1879_v0 }
 0x230   : > { %1722 = vmatprep.subr.bf16.mxu1 %v1879_v0 }
 0x239   : > { %824 = vmax.xlane.f32.xlu1 %v823_v57 }
 0x253   : > { %v632_v58 = vpop.xlane.xlu1 %631 }
 0x254   : > { %1815 = vrcp.f32 %v632_v58 }
 0x25e   : > { %v1816_v59 = vpop.eup %1815 }
 0x25f   : > { %v2081_v60 = vmul.f32 %v1816_v59, %v1810_v44 }
 0x261   : > { %v688_v61 = vpack.c.bf16 %v2081_v60, %v2081_v60 }
 0x263   : > { %1713 = vmatmul.mubr.msk.bf16.vlgmr.msra.gmra.mrb[4].mxu1 %vm543_vm2, %v688_v61 }
 0x264   : > { %1723 = vmatpush3.bf16.msra.mxu1 %v836_v52  ;;  %1724 = vmatprep.mubr.msk.bf16.mxu1 %vm1880_vm0, %v1879_v0 }
 0x265   : > { %1734 = vmatprep.subr.bf16.mxu1 %v1879_v0 }
 0x291   : > { %v819_v62 = vpop.xlane.xlu1 %818 }
 0x292   : > { %1817 = vrcp.f32 %v819_v62 }
 0x295   : > { %v967_v2 = vpop.permute.xlu1 %966 }
 0x296   : > { %v972_v5 = vsel %vm551_vm1, %v967_v2, 0 }
 0x29c   : > { %v1818_v63 = vpop.eup %1817 }
 0x29d   : > { %v2089_v3 = vmul.f32 %v1818_v63, %v1812_v49 }
 0x29f   : > { %v834_v6 = vpack.c.bf16 %v2089_v3, %v2089_v3 }
 0x2a1   : > { %1725 = vmatmul.mubr.msk.bf16.vlgmr.msra.gmra.mrb[8].mxu1 %vm543_vm2, %v834_v6 }
 0x2a2   : > { %1735 = vmatpush3.bf16.xpose.msra.mxu1 %v972_v5  ;;  %1736 = vmatprep.mubr.msk.bf16.mxu1 %vm1880_vm0, %v1879_v0 }
 0x2a3   : > { %1746 = vmatprep.subr.bf16.mxu1 %v1879_v0 }
 0x2a9   : > { %1737 = vmatmul.mubr.msk.bf16.vlgmr.msra.gmra.mrb[12].mxu1 %vm551_vm1, %v965_v7 }
 0x2aa   : > { %1748 = vmatprep.mubr.msk.bf16.mxu1 %vm1880_vm0, %v1879_v0 }
 0x2c6   : > { %v825_v8 = vpop.xlane.xlu1 %824 }
 0x2c7   : > { %v826_v9 = vsub.f32 %v822_v56, %v825_v8 }
 0x2c9   : > { %v827_v10 = vmul.f32 1.442695, %v826_v9 }
 0x2cb   : > { %1819 = vpow2.f32 %v827_v10 }
 0x2d5   : > { %v1820_v11 = vpop.eup %1819 }
 0x2d6   : > { %v829_v15 = vsel %vm543_vm2, %v1820_v11, 0.0 }
 0x2d7   : > { %830 = vadd.xlane.f32.xlu1 %v829_v15 }
 0x301   : > { %v679_v16 = vpop.f32.mrb[0].mxu1 }
 0x302   : > { %v685_v19 = vpack.c.bf16 %v679_v16, %v679_v16  ;;  %v1708_v20 = vpop.f32.mrb[1].mxu1 }
 0x303   : > { %v682_v21 = vpop.f32.mrb[2].mxu1 }
 0x304   : > { %687 = vst.msk [vmem:[%s2106_s25] sm:$0xf] %vm686_vm8, %v685_v19  ;;  %v1709_v22 = vpop.f32.mrb[3].mxu1 }
 0x336   : > { %v726_v23 = vpop.f32.mrb[4].mxu1 }
 0x337   : > { %v732_v24 = vpack.c.bf16 %v726_v23, %v726_v23  ;;  %v1714_v25 = vpop.f32.mrb[5].mxu1 }
 0x338   : > { %v729_v26 = vpop.f32.mrb[6].mxu1 }
 0x339   : > { %733 = vst.msk [vmem:[%s2113_s29] sm:$0xf] %vm686_vm8, %v732_v24  ;;  %v1715_v27 = vpop.f32.mrb[7].mxu1 }
 0x364   : > { %v831_v29 = vpop.xlane.xlu1 %830 }
 0x365   : > { %1821 = vrcp.f32 %v831_v29  ;;  %v1884_v29 = vmov 0  }
 0x36f   : > { %v1822_v30 = vpop.eup %1821 }
 0x370   : > { %v2116_v31 = vmul.f32 %v1822_v30, %v1820_v11  ;;  %v527_v30 = vsel %vm2024_vm6, 1, %v1884_v29 }
 0x372   : > { %v890_v32 = vpack.c.bf16 %v2116_v31, %v2116_v31 }
 0x374   : > { %v2120_v33 = vpop.f32.mrb[8].mxu1  ;;  %1731 = vmatmul.mubr.msk.bf16.vlgmr.msra.gmra.mrb[8].mxu0 %vm543_vm2, %v890_v32 }
 0x375   : > { %v1726_v34 = vpop.f32.mrb[9].mxu1  ;;  %1742 = vmatprep.mubr.msk.bf16.mxu0 %vm1880_vm0, %v1879_v0 }
 0x376   : > { %v878_v35 = vpop.f32.mrb[10].mxu1 }
 0x377   : > { %v1727_v36 = vpop.f32.mrb[11].mxu1  ;;  %v531_v35 = vrot.slane %v527_v30, %v2032_v14 }
 0x379   : > { %vm532_vm10 = vcmp.eq.s32.totalorder %v531_v35, 1 }
 0x37c   : > { %v1008_v37 = vpop.f32.mrb[12].mxu1 }
 0x37d   : > { %v1014_v38 = vmul.f32 0.35355338, %v1008_v37  ;;  %v1738_v39 = vpop.f32.mrb[13].mxu1  ;;  %v525_v37 = vld [vmem:[%s481_s17] sm:$0xff] }
 0x37e   : > { %v1011_v40 = vpop.f32.mrb[14].mxu1  ;;  %vm526_vm9 = vcmp.gt.s32.totalorder %v525_v37, 0  ;;  %v1885_v39 = vmov 1.0  }
 0x37f   : > { %v1739_v41 = vpop.f32.mrb[15].mxu1  ;;  %v1015_v42 = vadd.f32 %v1014_v38, %v2041_v17  ;;  %vm533_vm11 = vmor %vm526_vm9, %vm532_vm10 }
 0x380   : > { %v2169_v40 = vsel %vm533_vm11, 0.0, %v1885_v39 }
 0x381   : > { %v1016_v43 = vsel %vm543_vm2, %v1015_v42, -inf  ;;  %v734_v13 = vmul.f32 %v2070_v54, %v2169_v40 }
 0x382   : > { %1017 = vmax.xlane.f32.xlu0 %v1016_v43 }
 0x398   : > { %1171 = vrot.lane.b32.xlu0 %v1975_v1, %s1883_s14  ;;  %v1027_v1 = vadd.f32 %v1014_v38, %v2044_v18  ;;  %v535_v38 = vsel %vm2028_vm7, 1, %v1884_v29 }
 0x399   : > { %v539_v12 = vrot.slane %v535_v38, %v2032_v14 }
 0x39a   : > { %v1028_v53 = vsel %vm543_vm2, %v1027_v1, -inf }
 0x39b   : > { %vm540_vm12 = vcmp.eq.s32.totalorder %v539_v12, 1 }
 0x39c   : > { %vm541_vm13 = vmor %vm526_vm9, %vm540_vm12 }
 0x40f   : > { %v1018_v44 = vpop.xlane.xlu0 %1017 }
 0x410   : > { %v1019_v45 = vsub.f32 %v1015_v42, %v1018_v44 }
 0x412   : > { %v1020_v46 = vmul.f32 1.442695, %v1019_v45 }
 0x413   : > { %v1172_v57 = vpop.permute.xlu0 %1171 }
 0x414   : > { %1823 = vpow2.f32 %v1020_v46  ;;  %v1177_v59 = vsel %vm551_vm1, %v1172_v57, 0  ;;  %v2175_v46 = vsel %vm541_vm13, 0.0, %v1885_v39 }
 0x41e   : > { %v1824_v47 = vpop.eup %1823 }
 0x41f   : > { %v1022_v48 = vsel %vm543_vm2, %v1824_v47, 0.0 }
 0x420   : > { %1023 = vadd.xlane.f32.xlu1 %v1022_v48  ;;  %v738_v48 = vsel %vm543_vm2, %v734_v13, 0.0 }
 0x431   : > { %1040 = vrot.lane.b32.xlu1 %v2054_v28, %s1882_s22 }
 0x435   : > { %1169 = vrot.lane.b32.xlu1 %v1985_v4, %s1883_s14 }
 0x447   : > { %v2134_v49 = vpop.f32.mrb[8].mxu0 }
 0x448   : > { %v1732_v50 = vpop.f32.mrb[9].mxu0 }
 0x449   : > { %v931_v51 = vpop.f32.mrb[10].mxu0  ;;  %v735_v50 = vmul.f32 %v2081_v60, %v2175_v46 }
 0x44a   : > { %v1733_v52 = vpop.f32.mrb[11].mxu0  ;;  %v2186_v51 = vmul.f32 %v2089_v3, %v2169_v40 }
 0x44b   : > { %v748_v54 = vsel %vm543_vm2, %v735_v50, 0.0 }
 0x44c   : > { %v946_v52 = vsel %vm543_vm2, %v2186_v51, 0.0 }
 0x459   : > { %1029 = vmax.xlane.f32.xlu1 %v1028_v53  ;;  %v1668_v53 = vpack.c.bf16 %v2120_v33, %v2120_v33 }
 0x4ad   : > { %v1024_v55 = vpop.xlane.xlu1 %1023 }
 0x4ae   : > { %1825 = vrcp.f32 %v1024_v55 }
 0x4b1   : > { %v1041_v56 = vpop.permute.xlu1 %1040 }
 0x4b2   : > { %1741 = vmatpush3.bf16.msra.mxu0 %v1041_v56  ;;  %1747 = vmatpush3.bf16.msra.mxu1 %v1041_v56 }
 0x4b3   : > { %1752 = vmatprep.subr.bf16.mxu0 %v1879_v0  ;;  %1758 = vmatprep.subr.bf16.mxu1 %v1879_v0 }
 0x4b5   : > { %v1170_v62 = vpop.permute.xlu1 %1169 }
 0x4b8   : > { %v1826_v4 = vpop.eup %1825 }
 0x4b9   : > { %v2140_v58 = vmul.f32 %v1826_v4, %v1824_v47 }
 0x4bb   : > { %v1039_v61 = vpack.c.bf16 %v2140_v58, %v2140_v58  ;;  %v2209_v55 = vmul.f32 %v2140_v58, %v2169_v40 }
 0x4bd   : > { %1743 = vmatmul.mubr.msk.bf16.vlgmr.msra.gmra.mrb[12].mxu0 %vm543_vm2, %v1039_v61 }
 0x4be   : > { %1753 = vmatpush3.bf16.xpose.msra.mxu0 %v1177_v59  ;;  %1754 = vmatprep.mubr.msk.bf16.mxu0 %vm1880_vm0, %v1879_v0 }
 0x4bf   : > { %1764 = vmatprep.subr.bf16.mxu0 %v1879_v0 }
 0x4c5   : > { %1755 = vmatmul.mubr.msk.bf16.vlgmr.msra.gmra.mrb[16].mxu0 %vm551_vm1, %v1170_v62 }
 0x4c6   : > { %1766 = vmatprep.mubr.msk.bf16.mxu0 %vm1880_vm0, %v1879_v0 }
 0x4e6   : > { %v1030_v63 = vpop.xlane.xlu1 %1029 }
 0x4e7   : > { %v1031_v2 = vsub.f32 %v1027_v1, %v1030_v63  ;;  %v2192_v1 = vmul.f32 %v2116_v31, %v2175_v46  ;;  %v1669_v31 = vpack.c.bf16 %v2134_v49, %v2134_v49 }
 0x4e9   : > { %v1032_v5 = vmul.f32 1.442695, %v1031_v2  ;;  %v956_v60 = vsel %vm543_vm2, %v2192_v1, 0.0  ;;  %v955_v37 = vmul.f32 0.25, %v2192_v1 }
 0x4eb   : > { %1827 = vpow2.f32 %v1032_v5 }
 0x4f5   : > { %v1828_v24 = vpop.eup %1827 }
 0x4f6   : > { %v1034_v25 = vsel %vm543_vm2, %v1828_v24, 0.0 }
 0x590   : > { %v2152_v6 = vpop.f32.mrb[12].mxu0 }
 0x591   : > { %v1744_v7 = vpop.f32.mrb[13].mxu0  ;;  %v1670_v56 = vpack.c.bf16 %v2152_v6, %v2152_v6 }
 0x592   : > { %v1083_v8 = vpop.f32.mrb[14].mxu0 }
 0x593   : > { %v1745_v9 = vpop.f32.mrb[15].mxu0 }
 0x598   : > { %v1213_v10 = vpop.f32.mrb[16].mxu0 }
 0x599   : > { %v1219_v11 = vmul.f32 0.35355338, %v1213_v10  ;;  %v1756_v15 = vpop.f32.mrb[17].mxu0  ;;  %v737_v10 = vmul.f32 0.25, %v734_v13 }
 0x59a   : > { %v1216_v16 = vpop.f32.mrb[18].mxu0 }
 0x59b   : > { %v1757_v19 = vpop.f32.mrb[19].mxu0  ;;  %v1232_v20 = vadd.f32 %v1219_v11, %v2044_v18  ;;  %v1220_v21 = vadd.f32 %v1219_v11, %v2041_v17  ;;  %v736_v16 = vld [vmem:[%s1997_s24] sm:$0xff] }
 0x59d   : > { %v1233_v22 = vsel %vm543_vm2, %v1232_v20, -inf  ;;  %v1221_v23 = vsel %vm543_vm2, %v1220_v21, -inf }
 0x59e   : > { %1234 = vmax.xlane.f32.xlu1 %v1233_v22  ;;  %1222 = vmax.xlane.f32.xlu0 %v1221_v23 }
 0x5a2   : > { %1035 = vadd.xlane.f32.xlu0 %v1034_v25  ;;  %v746_v25 = vld [vmem:[%s2003_s27] sm:$0xff] }
 0x62b   : > { %v1235_v26 = vpop.xlane.xlu1 %1234  ;;  %v1223_v27 = vpop.xlane.xlu0 %1222 }
 0x62c   : > { %v1236_v32 = vsub.f32 %v1232_v20, %v1235_v26  ;;  %v1224_v18 = vsub.f32 %v1220_v21, %v1223_v27  ;;  %v747_v21 = vmul.f32 0.25, %v735_v50  ;;  %v1150_v50 = vmul.f32 0.25, %v2209_v55 }
 0x62e   : > { %v1237_v17 = vmul.f32 1.442695, %v1236_v32  ;;  %v1225_v34 = vmul.f32 1.442695, %v1224_v18  ;;  %v945_v18 = vmul.f32 0.25, %v2186_v51 }
 0x62f   : > { %v1036_v36 = vpop.xlane.xlu0 %1035 }
 0x630   : > { %1829 = vpow2.f32 %v1237_v17 }
 0x631   : > { %1831 = vpow2.f32 %v1225_v34 }
 0x632   : > { %1833 = vrcp.f32 %v1036_v36 }
 0x63a   : > { %v1830_v41 = vpop.eup %1829 }
 0x63b   : > { %v1832_v42 = vpop.eup %1831  ;;  %v1239_v43 = vsel %vm543_vm2, %v1830_v41, 0.0 }
 0x63c   : > { %v1834_v44 = vpop.eup %1833  ;;  %1240 = vadd.xlane.f32.xlu0 %v1239_v43  ;;  %v1227_v45 = vsel %vm543_vm2, %v1832_v42, 0.0 }
 0x63d   : > { %v1038_v14 = vmul.f32 %v1834_v44, %v1828_v24  ;;  %1228 = vadd.xlane.f32.xlu1 %v1227_v45 }
 0x63f   : > { %v1095_v47 = vpack.c.bf16 %v1038_v14, %v1038_v14 }
 0x640   : > { %739 = vadd.xlane.f32.xlu0 %v738_v48 }
 0x641   : > { %1749 = vmatmul.mubr.msk.bf16.vlgmr.msra.gmra.mrb[16].mxu1 %vm543_vm2, %v1095_v47 }
 0x642   : > { %1760 = vmatprep.mubr.msk.bf16.mxu1 %vm1880_vm0, %v1879_v0  ;;  %v2197_v0 = vmul.f32 %v1038_v14, %v2175_v46  ;;  %vm1298_vm0 = vcmask 257216  }
 0x644   : > { %749 = vadd.xlane.f32.xlu0 %v748_v54  ;;  %v1161_v3 = vsel %vm543_vm2, %v2197_v0, 0.0  ;;  %v1160_v43 = vmul.f32 0.25, %v2197_v0 }
 0x648   : > { %947 = vadd.xlane.f32.xlu0 %v946_v52 }
 0x64c   : > { %957 = vadd.xlane.f32.xlu0 %v956_v60 }
 0x64e   : > { %1245 = vrot.lane.b32.xlu1 %v2054_v28, %s1883_s14  ;;  %v1151_v28 = vsel %vm543_vm2, %v2209_v55, 0.0 }
 0x650   : > { %1162 = vadd.xlane.f32.xlu0 %v1161_v3 }
 0x666   : > { %885 = vrot.lane.b32.xlu0 %v1668_v53, %s1886_s13 }
 0x66a   : > { %938 = vrot.lane.b32.xlu0 %v1669_v31, %s1886_s13 }
 0x672   : > { %1152 = vadd.xlane.f32.xlu1 %v1151_v28 }
 0x683   : > { %1090 = vrot.lane.b32.xlu1 %v1670_v56, %s1887_s18 }
 0x6c9   : > { %v1241_v33 = vpop.xlane.xlu0 %1240 }
 0x6ca   : > { %v1229_v4 = vpop.xlane.xlu1 %1228  ;;  %1835 = vrcp.f32 %v1241_v33 }
 0x6cb   : > { %1837 = vrcp.f32 %v1229_v4 }
 0x6cd   : > { %v740_v49 = vpop.xlane.xlu0 %739 }
 0x6ce   : > { %v741_v57 = vmax.f32 %v740_v49, 1e-20  ;;  %v1246_v59 = vpop.permute.xlu1 %1245 }
 0x6cf   : > { %1759 = vmatpush3.bf16.msra.mxu1 %v1246_v59  ;;  %1765 = vmatpush3.bf16.msra.mxu0 %v1246_v59 }
 0x6d0   : > { %1839 = vrcp.f32 %v741_v57 }
 0x6d1   : > { %v750_v58 = vpop.xlane.xlu0 %749 }
 0x6d2   : > { %v751_v61 = vmax.f32 %v750_v58, 1e-20 }
 0x6d4   : > { %v1836_v62 = vpop.eup %1835  ;;  %1841 = vrcp.f32 %v751_v61 }
 0x6d5   : > { %v1838_v63 = vpop.eup %1837  ;;  %v2216_v2 = vmul.f32 %v1836_v62, %v1830_v41  ;;  %v948_v5 = vpop.xlane.xlu0 %947 }
 0x6d6   : > { %v2218_v6 = vmul.f32 %v1838_v63, %v1832_v42  ;;  %v949_v7 = vmax.f32 %v948_v5, 1e-20 }
 0x6d7   : > { %v1300_v8 = vpack.c.bf16 %v2216_v2, %v2216_v2  ;;  %v1353_v55 = vmul.f32 %v2216_v2, %v2175_v46 }
 0x6d8   : > { %1843 = vrcp.f32 %v949_v7  ;;  %v1244_v9 = vpack.c.bf16 %v2218_v6, %v2218_v6  ;;  %v1352_v28 = vmul.f32 %v2218_v6, %v2169_v40 }
 0x6d9   : > { %1767 = vmatmul.mubr.msk.bf16.vlgmr.msra.gmra.mrb[20].mxu0 %vm543_vm2, %v1300_v8  ;;  %v958_v11 = vpop.xlane.xlu0 %957  ;;  %v1366_v33 = vsel %vm543_vm2, %v1353_v55, 0.0 }
 0x6da   : > { %v1840_v15 = vpop.eup %1839  ;;  %1761 = vmatmul.mubr.msk.bf16.vlgmr.msra.gmra.mrb[20].mxu1 %vm543_vm2, %v1244_v9  ;;  %v959_v19 = vmax.f32 %v958_v11, 1e-20  ;;  %v1356_v56 = vsel %vm543_vm2, %v1352_v28, 0.0  ;;  %v1355_v9 = vmul.f32 0.25, %v1352_v28 }
 0x6db   : > { %v743_v20 = vmul.f32 %v1840_v15, %v737_v10 }
 0x6dc   : > { %1845 = vrcp.f32 %v959_v19 }
 0x6dd   : > { %v744_v22 = vadd.f32 %v743_v20, %v736_v16  ;;  %v1163_v23 = vpop.xlane.xlu0 %1162  ;;  %v1365_v16 = vmul.f32 0.25, %v1353_v55 }
 0x6de   : > { %v1842_v24 = vpop.eup %1841  ;;  %v1164_v32 = vmax.f32 %v1163_v23, 1e-20 }
 0x6df   : > { %745 = vst.msk [vmem:[%s1997_s24] sm:$0xff] %vm543_vm2, %v744_v22  ;;  %v753_v26 = vmul.f32 %v1842_v24, %v747_v21 }
 0x6e0   : > { %1847 = vrcp.f32 %v1164_v32 }
 0x6e1   : > { %v754_v27 = vadd.f32 %v753_v26, %v746_v25  ;;  %v886_v29 = vpop.permute.xlu0 %885 }
 0x6e2   : > { %v1844_v30 = vpop.eup %1843  ;;  %889 = vst.msk [vmem:[%s2106_s25] sm:$0xf] %vm888_vm14, %v886_v29 }
 0x6e3   : > { %755 = vst.msk [vmem:[%s2003_s27] sm:$0xff] %vm543_vm2, %v754_v27  ;;  %v951_v17 = vmul.f32 %v1844_v30, %v945_v18 }
 0x6e5   : > { %v939_v34 = vpop.permute.xlu0 %938 }
 0x6e6   : > { %v1846_v35 = vpop.eup %1845  ;;  %v944_v36 = vld [vmem:[%s1997_s24] sm:$0xff]  ;;  %941 = vst.msk [vmem:[%s2113_s29] sm:$0xf] %vm888_vm14, %v939_v34 }
 0x6e7   : > { %v952_v38 = vadd.f32 %v951_v17, %v944_v36  ;;  %v961_v12 = vmul.f32 %v1846_v35, %v955_v37 }
 0x6e9   : > { %953 = vst.msk [vmem:[%s1997_s24] sm:$0xff] %vm543_vm2, %v952_v38 }
 0x6ea   : > { %v954_v39 = vld [vmem:[%s2003_s27] sm:$0xff]  ;;  %v1848_v42 = vpop.eup %1847 }
 0x6eb   : > { %v962_v41 = vadd.f32 %v961_v12, %v954_v39  ;;  %v1166_v13 = vmul.f32 %v1848_v42, %v1160_v43 }
 0x6ed   : > { %963 = vst.msk [vmem:[%s2003_s27] sm:$0xff] %vm543_vm2, %v962_v41 }
 0x6f0   : > { %v1149_v52 = vld [vmem:[%s1997_s24] sm:$0xff] }
 0x6f4   : > { %v1159_v44 = vld [vmem:[%s2003_s27] sm:$0xff] }
 0x6f5   : > { %v1167_v45 = vadd.f32 %v1166_v13, %v1159_v44 }
 0x6f7   : > { %1168 = vst.msk [vmem:[%s2003_s27] sm:$0xff] %vm543_vm2, %v1167_v45 }
 0x6fe   : > { %v1364_v22 = vld [vmem:[%s2003_s27] sm:$0xff] }
 0x6ff   : > { %v1153_v14 = vpop.xlane.xlu1 %1152 }
 0x700   : > { %v1154_v47 = vmax.f32 %v1153_v14, 1e-20 }
 0x702   : > { %1849 = vrcp.f32 %v1154_v47 }
 0x703   : > { %v1091_v48 = vpop.permute.xlu1 %1090 }
 0x704   : > { %1094 = vst.msk [vmem:[%s2106_s25] sm:$0xf] %vm1093_vm15, %v1091_v48 }
 0x70c   : > { %v1850_v54 = vpop.eup %1849 }
 0x70d   : > { %v1156_v51 = vmul.f32 %v1850_v54, %v1150_v50 }
 0x70f   : > { %v1157_v1 = vadd.f32 %v1156_v51, %v1149_v52 }
 0x711   : > { %1158 = vst.msk [vmem:[%s1997_s24] sm:$0xff] %vm543_vm2, %v1157_v1 }
 0x714   : > { %v1133_v60 = vpop.f32.mrb[16].mxu1 }
 0x715   : > { %v1671_v0 = vpack.c.bf16 %v1133_v60, %v1133_v60  ;;  %v1750_v3 = vpop.f32.mrb[17].mxu1 }
 0x716   : > { %v1136_v53 = vpop.f32.mrb[18].mxu1 }
 0x717   : > { %1143 = vrot.lane.b32.xlu0 %v1671_v0, %s1887_s18  ;;  %v1751_v31 = vpop.f32.mrb[19].mxu1 }
 0x718   : > { %v1354_v15 = vld [vmem:[%s1997_s24] sm:$0xff] }
 0x736   : > { %1357 = vadd.xlane.f32.xlu0 %v1356_v56 }
 0x73a   : > { %1367 = vadd.xlane.f32.xlu0 %v1366_v33 }
 0x789   : > { %v1144_v4 = vpop.permute.xlu0 %1143 }
 0x78a   : > { %1146 = vst.msk [vmem:[%s2113_s29] sm:$0xf] %vm1093_vm15, %v1144_v4 }
 0x7ac   : > { %v1338_v49 = vpop.f32.mrb[20].mxu0 }
 0x7ad   : > { %v1285_v57 = vpop.f32.mrb[20].mxu1  ;;  %v1768_v59 = vpop.f32.mrb[21].mxu0  ;;  %v1673_v46 = vpack.c.bf16 %v1338_v49, %v1338_v49 }
 0x7ae   : > { %v1672_v58 = vpack.c.bf16 %v1285_v57, %v1285_v57  ;;  %v1762_v61 = vpop.f32.mrb[21].mxu1  ;;  %v1341_v62 = vpop.f32.mrb[22].mxu0 }
 0x7af   : > { %v1288_v63 = vpop.f32.mrb[22].mxu1  ;;  %v1769_v40 = vpop.f32.mrb[23].mxu0 }
 0x7b0   : > { %v1763_v5 = vpop.f32.mrb[23].mxu1  ;;  %1295 = vrot.lane.b32.xlu0 %v1672_v58, %s1888_s30 }
 0x7b4   : > { %1348 = vrot.lane.b32.xlu0 %v1673_v46, %s1888_s30 }
 0x7c3   : > { %v1358_v2 = vpop.xlane.xlu0 %1357 }
 0x7c4   : > { %v1359_v6 = vmax.f32 %v1358_v2, 1e-20 }
 0x7c6   : > { %1851 = vrcp.f32 %v1359_v6 }
 0x7c7   : > { %v1368_v7 = vpop.xlane.xlu0 %1367 }
 0x7c8   : > { %v1369_v8 = vmax.f32 %v1368_v7, 1e-20 }
 0x7ca   : > { %1853 = vrcp.f32 %v1369_v8 }
 0x7d0   : > { %v1852_v10 = vpop.eup %1851 }
 0x7d1   : > { %v1361_v11 = vmul.f32 %v1852_v10, %v1355_v9 }
 0x7d3   : > { %v1362_v19 = vadd.f32 %v1361_v11, %v1354_v15 }
 0x7d4   : > { %v1854_v20 = vpop.eup %1853 }
 0x7d5   : > { %1363 = vst.msk [vmem:[%s1997_s24] sm:$0xff] %vm543_vm2, %v1362_v19  ;;  %v1371_v21 = vmul.f32 %v1854_v20, %v1365_v16 }
 0x7d7   : > { %v1372_v23 = vadd.f32 %v1371_v21, %v1364_v22 }
 0x7d9   : > { %1373 = vst.msk [vmem:[%s2003_s27] sm:$0xff] %vm543_vm2, %v1372_v23 }
 0x822   : > { %v1296_v24 = vpop.permute.xlu0 %1295 }
 0x823   : > { %1299 = vst.msk [vmem:[%s2106_s25] sm:$0xf] %vm1298_vm0, %v1296_v24 }
 0x826   : > { %v1349_v25 = vpop.permute.xlu0 %1348 }
 0x827   : > { %1351 = vst.msk [vmem:[%s2113_s29] sm:$0xf] %vm1298_vm0, %v1349_v25 }
 0x828 PF: > { %s20_s11 = sadd.s32 1, %s1877_s11   ;;  %s2292_s30 = smov %s1873_s10 }
 0x829   : > { %p17_p5 = scmp.ge.s32.totalorder %s20_s11, 4   ;;  %s2293_s10 = smov %s2295_s12 }
 0x82b   :  { %19 = sbr.rel (!%p17_p5) target bundleno = 2 (0x2), region = 125 }

// kernel: transformer_decoder_forward.25
= control target key start
LH: loop header
LB: loop body
LE: loop exit
PB: predicated region body
PF: predicated region fallthrough
CT: control target
= control target key end

     0   :  { %vm19_vm0 = vcmask 261120   ;;  %s167_s0 = inlined_call_operand.vmem [shape: f32[16,32], index: 0, kind: input, shape index: {}]   ;;  %s168_s1 = inlined_call_operand.vmem [shape: f32[1,32], index: 1, kind: input, shape index: {}]   ;;  %s169_s2 = inlined_call_operand.vmem [shape: f32[1,32], index: 2, kind: input, shape index: {}]   ;;  %s170_s3 = inlined_call_operand.hbm [shape: f32[16,32], index: 3, kind: output, shape index: {}]  }
   0x1   :  { %v15_v0 = vld [vmem:[%s167_s0] sm:$0xff]  ;;  %v16_v1 = vld [vmem:[%s167_s0 + $0x8] sm:$0xff] }
   0x2   :  { %8 = vsyncpa [#allocation3], 0  ;;  %v20_v2 = vsel %vm19_vm0, %v15_v0, 0.0  ;;  %v23_v3 = vsel %vm19_vm0, %v16_v1, 0.0  ;;  %v81_v21 = vld [vmem:[%s168_s1] ss:$0 sm:$0xff] }
   0x3   :  { %21 = vadd.xlane.f32.xlu0 %v20_v2  ;;  %v82_v23 = vld [vmem:[%s169_s2] ss:$0 sm:$0xff]  ;;  %s114_s19 = smov [#allocation2]  }
   0x4   :  { %s70_s20 = sshll.u32 %s114_s19, 4  ;;  %s71_s20 = int_to_ptr.vmem [resolvable:$true] %s70_s20 }
   0x5   :  { %s90_s21 = scalar_lea.vmem %s71_s20, 256  ;;  %p95_p1 = scmp.lt.s32.totalorder %s71_s20, %s71_s20 }
   0x6   :  { %p91_p0 = scmp.ne.s32.totalorder %s71_s20, %s90_s21  ;;  %p96_p2 = scmp.lt.s32.totalorder %s90_s21, %s90_s21 }
   0x7   :  { %24 = vadd.xlane.f32.xlu0 %v23_v3 }
   0x8   :  { %p97_p3 = por %p96_p2, %p95_p1 }
   0xa   :  { %p98_p4 = pnand %p97_p3, %p91_p0 }
  0x90   :  { %v22_v4 = vpop.xlane.xlu0 %21 }
  0x91   :  { %v27_v5 = vmul.f32 0.03125, %v22_v4 }
  0x93   :  { %v29_v6 = vsub.f32 %v15_v0, %v27_v5 }
  0x94   :  { %v25_v7 = vpop.xlane.xlu0 %24 }
  0x95   :  { %v28_v8 = vmul.f32 0.03125, %v25_v7  ;;  %v31_v9 = vmul.f32 %v29_v6, %v29_v6 }
  0x97   :  { %v30_v10 = vsub.f32 %v16_v1, %v28_v8  ;;  %v33_v11 = vsel %vm19_vm0, %v31_v9, 0.0 }
  0x98   :  { %34 = vadd.xlane.f32.xlu1 %v33_v11 }
  0x99   :  { %v32_v12 = vmul.f32 %v30_v10, %v30_v10 }
  0x9b   :  { %v36_v13 = vsel %vm19_vm0, %v32_v12, 0.0 }
  0x9c   :  { %37 = vadd.xlane.f32.xlu1 %v36_v13 }
 0x125   :  { %v35_v14 = vpop.xlane.xlu1 %34 }
 0x126   :  { %v39_v15 = vmul.f32 0.03125, %v35_v14 }
 0x128   :  { %v41_v16 = vadd.f32 1e-06, %v39_v15 }
 0x129   :  { %v38_v17 = vpop.xlane.xlu1 %37 }
 0x12a   :  { %86 = vrsqrt.f32 %v41_v16  ;;  %v40_v18 = vmul.f32 0.03125, %v38_v17 }
 0x12c   :  { %v42_v19 = vadd.f32 1e-06, %v40_v18 }
 0x12e   :  { %88 = vrsqrt.f32 %v42_v19 }
 0x134   :  { %v87_v20 = vpop.eup %86 }
 0x135   :  { %v45_v22 = vmul.f32 %v87_v20, %v29_v6 }
 0x137   :  { %v53_v24 = vmul.f32 %v81_v21, %v45_v22 }
 0x138   :  { %v89_v25 = vpop.eup %88 }
 0x139   :  { %v46_v26 = vmul.f32 %v89_v25, %v30_v10  ;;  %v61_v27 = vadd.f32 %v82_v23, %v53_v24 }
 0x13b   :  { %v54_v28 = vmul.f32 %v81_v21, %v46_v26  ;;  %63 = vst.msk [vmem:[#allocation2] sm:$0xff] %vm19_vm0, %v61_v27 }
 0x13d   :  { %v62_v29 = vadd.f32 %v82_v23, %v54_v28 }
 0x13f   :  { %64 = vst.msk [vmem:[#allocation2 + $0x8] sm:$0xff] %vm19_vm0, %v62_v29 }
 0x140   :  { %101 = shalt.err (!%p98_p4)
}
 0x141   :  { %s102_s22 = scalar_lea.hbm %s170_s3, 256 }
 0x142   :  { %p103_p5 = scmp.ne.s32.totalorder %s170_s3, %s102_s22  ;;  %p106_p6 = scmp.lt.u32.totalorder %s102_s22, %s170_s3 }
 0x144   :  { %p108_p7 = pnand %p106_p6, %p103_p5 }
 0x146   :  { %111 = shalt.err (!%p108_p7)
}
 0x147   :  { %s115_s27 = smov 128   ;;  %s116_s28 = smov 8  }
 0x148   :  { %76 = dma.vmem_to_hbm [thread:$0]  %s71_s20, 256, %s170_s3, [#allocation3], %s115_s27, %s115_s27, %s116_s28  }
 0x149   :  { %112 = dma.done.wait [#allocation3], 256  }
 0x14a   :  { %113 = vsyncadd [#allocation3], 4294967040 }
 0x14b   :  { %80 = vsyncpa [#allocation3], 1 }

</bundles_post_ra>
